<compile_context>
chip_gen: v6e
topology: v6e:2x2x1
jax: 0.10.0
libtpu: 0.0.40
codegen_flags: <defaults>
</compile_context>

<pallas_src>
import jax
import jax.numpy as jnp
from jax import lax
from jax.experimental import pallas as pl
from jax.experimental.pallas import tpu as pltpu

DIM = 24    # matches Encoder(dim=24)
LANE = 128  # lane-dense channel padding

_CONV_VMEM_BUDGET = 22 * 1024 * 1024  # per-call tiling budget (fits 32 MiB scoped)
_CONV_VMEM_LIMIT = 32 * 1024 * 1024   # explicit scoped-VMEM limit (raises v5e default)


def _round_up(x, m):
    return (x + m - 1) // m * m


# ----------------------------------------------------------------------------
# Pallas kernels
# ----------------------------------------------------------------------------
def _conv_relu_pool_kernel(p0_ref, p1_ref, p2_ref, p3_ref, w_ref, b_ref, o_ref):
    """Fused conv(im2col matmul) + 2x2 max-pool + bias + ReLU for one row tile.

    p{q}_ref : (TM, K)  bf16 im2col patches of pool-window pixel q (q = 2*dy+dx).
    w_ref    : (K, 128) bf16 conv weight, output channels zero-padded to 128.
    b_ref    : (1, 128) f32 bias (zero-padded).
    o_ref    : (TM, 128) bf16 pooled activations.

    Pooling is applied to the pre-bias conv results; exact because per-channel
    bias add and ReLU are monotone, so they commute with max.  The RHS is read
    once and the four quadrant matmuls fold into a running max, keeping only
    one f32 (TM, 128) accumulator live.
    """
    w = w_ref[...]
    pooled = jnp.dot(p0_ref[...], w, preferred_element_type=jnp.float32)
    pooled = jnp.maximum(
        pooled, jnp.dot(p1_ref[...], w, preferred_element_type=jnp.float32))
    pooled = jnp.maximum(
        pooled, jnp.dot(p2_ref[...], w, preferred_element_type=jnp.float32))
    pooled = jnp.maximum(
        pooled, jnp.dot(p3_ref[...], w, preferred_element_type=jnp.float32))
    o_ref[...] = jnp.maximum(pooled + b_ref[...], 0.0).astype(o_ref.dtype)


def _choose_conv_tile(M, K):
    """Row tile TM (multiple of 16) from a VMEM budget, as a function of K.

    Budget counts the double-buffered patch blocks (4 arrays), the bf16 output
    block, ~2 live f32 (TM, 128) temps, and the double-buffered weight, with K
    lane-padded to 128 (actual VMEM footprint).  TM is additionally capped so
    the row grid has >= 2 steps whenever M allows (v7x megacore sharding).
    """
    k_pad = _round_up(K, LANE)
    tm = (_CONV_VMEM_BUDGET - 512 * k_pad - 8192) // (16 * k_pad + 1536)
    tm = max(16, min(tm, 4096))
    tm = (tm // 16) * 16
    tm = min(tm, _round_up(M, 16))
    if M > 16:  # ensure at least two grid steps when possible
        tm = min(tm, _round_up(pl.cdiv(M, 2), 16))
    return max(tm, 16)


def conv_relu_pool(quads, w_pad, b_pad):
    """quads: 4 x (M, K) bf16 -> (M, 128) bf16 pooled + bias + ReLU."""
    M, K = quads[0].shape
    TM = _choose_conv_tile(M, K)
    grid = pl.cdiv(M, TM)  # boundary blocks may be partial; junk rows are dropped
    q_specs = [pl.BlockSpec((TM, K), lambda m: (m, 0)) for _ in range(4)]
    return pl.pallas_call(
        _conv_relu_pool_kernel,
        out_shape=jax.ShapeDtypeStruct((M, LANE), jnp.bfloat16),
        grid_spec=pltpu.PrefetchScalarGridSpec(
            num_scalar_prefetch=0,
            grid=(grid,),
            in_specs=q_specs + [
                pl.BlockSpec((K, LANE), lambda m: (0, 0)),
                pl.BlockSpec((1, LANE), lambda m: (0, 0)),
            ],
            out_specs=pl.BlockSpec((TM, LANE), lambda m: (m, 0)),
        ),
        compiler_params=pltpu.CompilerParams(
            dimension_semantics=("parallel",),
            vmem_limit_bytes=_CONV_VMEM_LIMIT,
        ),
    )(*quads, w_pad, b_pad)


def _linear_kernel(x_ref, w_ref, b_ref, o_ref):
    o_ref[...] = (
        jnp.dot(x_ref[...], w_ref[...], preferred_element_type=jnp.float32)
        + b_ref[...]
    )


def linear(x_bf16, w_pad, b_pad):
    """x: (N, K) bf16, w_pad: (K, 128) bf16, b_pad: (1, 128) f32 -> (N, 128) f32."""
    N, K = x_bf16.shape
    TM = min(512, _round_up(N, 16))
    Np = _round_up(N, TM)
    if Np != N:  # tiny pad: K*2 bytes per padded row
        x_bf16 = jnp.pad(x_bf16, ((0, Np - N), (0, 0)))
    out = pl.pallas_call(
        _linear_kernel,
        out_shape=jax.ShapeDtypeStruct((Np, LANE), jnp.float32),
        grid_spec=pltpu.PrefetchScalarGridSpec(
            num_scalar_prefetch=0,
            grid=(Np // TM,),
            in_specs=[
                pl.BlockSpec((TM, K), lambda m: (m, 0)),
                pl.BlockSpec((K, LANE), lambda m: (0, 0)),
                pl.BlockSpec((1, LANE), lambda m: (0, 0)),
            ],
            out_specs=pl.BlockSpec((TM, LANE), lambda m: (m, 0)),
        ),
        compiler_params=pltpu.CompilerParams(dimension_semantics=("parallel",)),
    )(x_bf16, w_pad, b_pad)
    return out[:N]


# ----------------------------------------------------------------------------
# Plain-JAX glue: parameter packing (one-time), im2col, layout plumbing
# ----------------------------------------------------------------------------
def weight_norm_conv(v, g):
    """PyTorch weight_norm on Conv2d (default dim=0): per-output-channel norm."""
    norm = jnp.sqrt(jnp.sum(v * v, axis=(1, 2, 3), keepdims=True))
    return v * (g[:, None, None, None] / norm)


def weight_norm_all(v, g):
    """PyTorch weight_norm with dim=None: scalar g, Frobenius norm."""
    return v * (g / jnp.sqrt(jnp.sum(v * v)))


def prepare_params(conv_ws, conv_bs, w_lin, b_lin, dim=DIM):
    """One-time packing: weight-norm'd weights -> lane-padded bf16 matmul operands."""
    conv_params = []
    for w_eff, b in zip(conv_ws, conv_bs):
        cout, cin = w_eff.shape[0], w_eff.shape[1]
        # (Cout, Cin, 5, 5) -> (25*Cin, Cout); row index = (ky*5 + kx)*Cin + cin,
        # matching the im2col feature order below.
        w_mat = jnp.transpose(w_eff, (2, 3, 1, 0)).reshape(25 * cin, cout)
        w_pad = jnp.zeros((25 * cin, LANE), jnp.float32).at[:, :cout].set(w_mat)
        b_pad = jnp.zeros((1, LANE), jnp.float32).at[0, :cout].set(b)
        conv_params.append((w_pad.astype(jnp.bfloat16), b_pad))
    # Linear: permute PyTorch NCHW-flatten columns (c*9 + h*3 + w) to our
    # NHWC-flatten order ((h*3 + w)*C + c), then lane-pad Dout to 128.
    in_feat = 3 * 3 * 4 * dim
    w_nhwc = (
        w_lin.reshape(dim, 4 * dim, 3, 3)
        .transpose(0, 2, 3, 1)
        .reshape(dim, in_feat)
    )
    wl_pad = jnp.zeros((in_feat, LANE), jnp.float32).at[:, :dim].set(w_nhwc.T)
    bl_pad = jnp.zeros((1, LANE), jnp.float32).at[0, :dim].set(b_lin)
    return tuple(conv_params), (wl_pad.astype(jnp.bfloat16), bl_pad)


def im2col_pool_quadrants(x_nhwc):
    """(N, H, W, C) -> list of 4 arrays (N*(H//2)*(W//2), 25*C), one per quadrant.

    Quadrant q = 2*dy + dx holds the 5x5 'same'-padded im2col patch of conv
    output pixel (2i+dy, 2j+dx) at row n*(Ho*Wo) + i*Wo + j; feature index is
    (ky*5 + kx)*C + c, matching prepare_params.  Each quadrant is built with
    one strided slice per (ky, kx) of the halo-padded activation — no
    full-resolution patch intermediate and no restack.  A 2x2/stride-2 max
    pool of the conv output is then an elementwise max over the 4 quadrant
    matmul results.  Odd H/W floor behaviour (7 -> 3) matches nn.MaxPool2d(2).
    """
    N, H, W, C = x_nhwc.shape
    Ho, Wo = H // 2, W // 2
    xp = jnp.pad(x_nhwc, ((0, 0), (2, 2), (2, 2), (0, 0)))
    quads = []
    for dy in range(2):
        for dx in range(2):
            feats = []
            for ky in range(5):
                for kx in range(5):
                    y0, x0 = dy + ky, dx + kx
                    feats.append(lax.slice(
                        xp,
                        (0, y0, x0, 0),
                        (N, y0 + 2 * (Ho - 1) + 1, x0 + 2 * (Wo - 1) + 1, C),
                        (1, 2, 2, 1)))
            q = jnp.stack(feats, axis=3)              # (N, Ho, Wo, 25, C)
            quads.append(q.reshape(N * Ho * Wo, 25 * C))
    return quads


@jax.jit
def encoder_forward(x_nchw, params):
    """Pallas-backed forward pass matching Encoder.forward semantics (eval mode)."""
    conv_params, (wl_pad, bl_pad) = params
    x = x_nchw.reshape(-1, 1, 28, 28).astype(jnp.float32)
    N = x.shape[0]
    out = jnp.transpose(x, (0, 2, 3, 1)).astype(jnp.bfloat16)  # NHWC, bf16
    H = 28
    couts = (DIM, 2 * DIM, 4 * DIM)
    for (w_pad, b_pad), cout in zip(conv_params, couts):
        Ho = H // 2
        quads = im2col_pool_quadrants(out)             # 4 x (N*Ho*Ho, 25*Cin)
        pooled = conv_relu_pool(quads, w_pad, b_pad)   # (N*Ho*Ho, 128) bf16
        out = pooled[:, :cout].reshape(N, Ho, Ho, cout)
        H = Ho
    feat = out.reshape(N, 3 * 3 * couts[-1])           # NHWC flatten (h*3+w)*C + c
    y = linear(feat, wl_pad, bl_pad)                   # (N, 128) f32
    return y[:, :DIM]


def reference_forward(x_nchw, conv_ws, conv_bs, w_lin, b_lin):
    """Pure-JAX (XLA, f32) reference replicating the PyTorch forward (eval mode)."""
    out = x_nchw.reshape(-1, 1, 28, 28).astype(jnp.float32)
    for w, b in zip(conv_ws, conv_bs):
        out = lax.conv_general_dilated(
            out, w, window_strides=(1, 1), padding=((2, 2), (2, 2)),
            dimension_numbers=("NCHW", "OIHW", "NCHW"))
        out = jnp.maximum(out + b[None, :, None, None], 0.0)
        out = lax.reduce_window(
            out, -jnp.inf, lax.max, (1, 1, 2, 2), (1, 1, 2, 2), "VALID")
    flat = out.reshape(out.shape[0], -1)  # NCHW flatten: c*9 + h*3 + w
    return flat @ w_lin.T + b_lin


# ----------------------------------------------------------------------------
if __name__ == "__main__":
    key = jax.random.PRNGKey(0)
    k_x, k1, k2, k3, k4 = jax.random.split(key, 5)

    # deterministic synthetic input (module hard-codes 28x28 single-channel)
    x = jax.random.normal(k_x, (2, 1, 28, 28), jnp.float32)

    def init_conv(k, cout, cin):
        kv, kg, kb = jax.random.split(k, 3)
        fan_in = cin * 5 * 5
        v = jax.random.normal(kv, (cout, cin, 5, 5), jnp.float32) / jnp.sqrt(
            jnp.float32(fan_in))
        g = 1.0 + 0.1 * jax.random.normal(kg, (cout,), jnp.float32)
        b = 0.1 * jax.random.normal(kb, (cout,), jnp.float32)
        return weight_norm_conv(v, g), b

    w1, b1 = init_conv(k1, 1 * DIM, 1)
    w2, b2 = init_conv(k2, 2 * DIM, 1 * DIM)
    w3, b3 = init_conv(k3, 4 * DIM, 2 * DIM)

    kv, kg, kb = jax.random.split(k4, 3)
    in_feat = 4 * 3 * 3 * DIM
    v_lin = jax.random.normal(kv, (DIM, in_feat), jnp.float32) / jnp.sqrt(
        jnp.float32(in_feat))
    g_lin = 1.0 + 0.1 * jax.random.normal(kg, (), jnp.float32)
    w_lin = weight_norm_all(v_lin, g_lin)
    b_lin = 0.1 * jax.random.normal(kb, (DIM,), jnp.float32)

    conv_ws = [w1, w2, w3]
    conv_bs = [b1, b2, b3]

    # One-time parameter packing (weight_norm already applied above).
    params = prepare_params(conv_ws, conv_bs, w_lin, b_lin)

    out = encoder_forward(x, params)
    out = jax.block_until_ready(out)
    assert out.shape == (2, DIM), out.shape

    ref = reference_forward(x, conv_ws, conv_bs, w_lin, b_lin)
    max_err = float(jnp.max(jnp.abs(out - ref)))
    # bf16 matmul operands (f32 accumulate) vs the f32 XLA reference: allow a
    # bf16-appropriate tolerance; real layout/semantics bugs produce O(0.1-1).
    assert max_err < 5e-2, f"mismatch vs reference: max_err={max_err}"

    print("KERNEL_OK")
</pallas_src>

<mosaic_0001>
module attributes {stable_mosaic.version = 11 : i64} {
  func.func @_conv_relu_pool_kernel(%arg0: i32, %arg1: memref<208x25xbf16, #tpu.memory_space<vmem>>, %arg2: memref<208x25xbf16, #tpu.memory_space<vmem>>, %arg3: memref<208x25xbf16, #tpu.memory_space<vmem>>, %arg4: memref<208x25xbf16, #tpu.memory_space<vmem>>, %arg5: memref<25x128xbf16, #tpu.memory_space<vmem>>, %arg6: memref<1x128xf32, #tpu.memory_space<vmem>>, %arg7: memref<208x128xbf16, #tpu.memory_space<vmem>>) attributes {dimension_semantics = [#tpu.dimension_semantics<parallel>], iteration_bounds = array<i64: 2>, scalar_prefetch = 0 : i64, scratch_operands = 0 : i64, tpu.core_type = #tpu.core_type<tc>, window_params = [{transform_indices = @transform_0, window_bounds = array<i64: 208, 25>}, {transform_indices = @transform_1, window_bounds = array<i64: 208, 25>}, {transform_indices = @transform_2, window_bounds = array<i64: 208, 25>}, {transform_indices = @transform_3, window_bounds = array<i64: 208, 25>}, {pipeline_mode = #tpu.pipeline_mode<synchronous>, transform_indices = @transform_4, window_bounds = array<i64: 25, 128>}, {pipeline_mode = #tpu.pipeline_mode<synchronous>, transform_indices = @transform_5, window_bounds = array<i64: 1, 128>}, {transform_indices = @transform_6, window_bounds = array<i64: 208, 128>}]} {
    %c0 = arith.constant 0 : index
    %c0_0 = arith.constant 0 : index
    %0 = vector.load %arg5[%c0, %c0_0] : memref<25x128xbf16, #tpu.memory_space<vmem>>, vector<25x128xbf16>
    %c0_1 = arith.constant 0 : index
    %c0_2 = arith.constant 0 : index
    %1 = vector.load %arg1[%c0_1, %c0_2] : memref<208x25xbf16, #tpu.memory_space<vmem>>, vector<208x25xbf16>
    %cst = arith.constant dense<0.000000e+00> : vector<208x128xf32>
    %2 = tpu.matmul %1, %0, %cst {dimension_numbers = #tpu.dot_dimension_numbers<[1], [0], [0], [1], [0, 0, 1, 1], [], []>} : vector<208x25xbf16>, vector<25x128xbf16>, vector<208x128xf32> -> vector<208x128xf32>
    %c0_3 = arith.constant 0 : index
    %c0_4 = arith.constant 0 : index
    %3 = vector.load %arg2[%c0_3, %c0_4] : memref<208x25xbf16, #tpu.memory_space<vmem>>, vector<208x25xbf16>
    %cst_5 = arith.constant dense<0.000000e+00> : vector<208x128xf32>
    %4 = tpu.matmul %3, %0, %cst_5 {dimension_numbers = #tpu.dot_dimension_numbers<[1], [0], [0], [1], [0, 0, 1, 1], [], []>} : vector<208x25xbf16>, vector<25x128xbf16>, vector<208x128xf32> -> vector<208x128xf32>
    %5 = arith.maximumf %2, %4 : vector<208x128xf32>
    %c0_6 = arith.constant 0 : index
    %c0_7 = arith.constant 0 : index
    %6 = vector.load %arg3[%c0_6, %c0_7] : memref<208x25xbf16, #tpu.memory_space<vmem>>, vector<208x25xbf16>
    %cst_8 = arith.constant dense<0.000000e+00> : vector<208x128xf32>
    %7 = tpu.matmul %6, %0, %cst_8 {dimension_numbers = #tpu.dot_dimension_numbers<[1], [0], [0], [1], [0, 0, 1, 1], [], []>} : vector<208x25xbf16>, vector<25x128xbf16>, vector<208x128xf32> -> vector<208x128xf32>
    %8 = arith.maximumf %5, %7 : vector<208x128xf32>
    %c0_9 = arith.constant 0 : index
    %c0_10 = arith.constant 0 : index
    %9 = vector.load %arg4[%c0_9, %c0_10] : memref<208x25xbf16, #tpu.memory_space<vmem>>, vector<208x25xbf16>
    %cst_11 = arith.constant dense<0.000000e+00> : vector<208x128xf32>
    %10 = tpu.matmul %9, %0, %cst_11 {dimension_numbers = #tpu.dot_dimension_numbers<[1], [0], [0], [1], [0, 0, 1, 1], [], []>} : vector<208x25xbf16>, vector<25x128xbf16>, vector<208x128xf32> -> vector<208x128xf32>
    %11 = arith.maximumf %8, %10 : vector<208x128xf32>
    %c0_12 = arith.constant 0 : index
    %c0_13 = arith.constant 0 : index
    %12 = vector.load %arg6[%c0_12, %c0_13] : memref<1x128xf32, #tpu.memory_space<vmem>>, vector<1x128xf32>
    %13 = vector.broadcast %12 : vector<1x128xf32> to vector<208x128xf32>
    %14 = arith.addf %11, %13 : vector<208x128xf32>
    %cst_14 = arith.constant 0.000000e+00 : f32
    %15 = vector.broadcast %cst_14 : f32 to vector<208x128xf32>
    %16 = arith.maximumf %14, %15 : vector<208x128xf32>
    %17 = arith.truncf %16 : vector<208x128xf32> to vector<208x128xbf16>
    %c0_15 = arith.constant 0 : index
    %c0_16 = arith.constant 0 : index
    %18 = vector.load %arg7[%c0_15, %c0_16] : memref<208x128xbf16, #tpu.memory_space<vmem>>, vector<208x128xbf16>
    tpu.vector_store %arg7[%c0_15, %c0_16], %17 {strides = array<i32>} : memref<208x128xbf16, #tpu.memory_space<vmem>>, vector<208x128xbf16>,
    return
  }
  func.func @transform_0(%arg0: i32) -> (i32, i32) {
    %c0_i32 = arith.constant 0 : i32
    %c0_i32_0 = arith.constant 0 : i32
    return %arg0, %c0_i32 : i32, i32
  }
  func.func @transform_1(%arg0: i32) -> (i32, i32) {
    %c0_i32 = arith.constant 0 : i32
    %c0_i32_0 = arith.constant 0 : i32
    return %arg0, %c0_i32 : i32, i32
  }
  func.func @transform_2(%arg0: i32) -> (i32, i32) {
    %c0_i32 = arith.constant 0 : i32
    %c0_i32_0 = arith.constant 0 : i32
    return %arg0, %c0_i32 : i32, i32
  }
  func.func @transform_3(%arg0: i32) -> (i32, i32) {
    %c0_i32 = arith.constant 0 : i32
    %c0_i32_0 = arith.constant 0 : i32
    return %arg0, %c0_i32 : i32, i32
  }
  func.func @transform_4(%arg0: i32) -> (i32, i32) {
    %c0_i32 = arith.constant 0 : i32
    %c0_i32_0 = arith.constant 0 : i32
    %c0_i32_1 = arith.constant 0 : i32
    return %c0_i32, %c0_i32_0 : i32, i32
  }
  func.func @transform_5(%arg0: i32) -> (i32, i32) {
    %c0_i32 = arith.constant 0 : i32
    %c0_i32_0 = arith.constant 0 : i32
    %c0_i32_1 = arith.constant 0 : i32
    return %c0_i32, %c0_i32_0 : i32, i32
  }
  func.func @transform_6(%arg0: i32) -> (i32, i32) {
    %c0_i32 = arith.constant 0 : i32
    %c0_i32_0 = arith.constant 0 : i32
    return %arg0, %c0_i32 : i32, i32
  }
}

module attributes {stable_mosaic.version = 11 : i64} {
  func.func @_conv_relu_pool_kernel(%arg0: i32, %arg1: memref<64x600xbf16, #tpu.memory_space<vmem>>, %arg2: memref<64x600xbf16, #tpu.memory_space<vmem>>, %arg3: memref<64x600xbf16, #tpu.memory_space<vmem>>, %arg4: memref<64x600xbf16, #tpu.memory_space<vmem>>, %arg5: memref<600x128xbf16, #tpu.memory_space<vmem>>, %arg6: memref<1x128xf32, #tpu.memory_space<vmem>>, %arg7: memref<64x128xbf16, #tpu.memory_space<vmem>>) attributes {dimension_semantics = [#tpu.dimension_semantics<parallel>], iteration_bounds = array<i64: 2>, scalar_prefetch = 0 : i64, scratch_operands = 0 : i64, tpu.core_type = #tpu.core_type<tc>, window_params = [{transform_indices = @transform_0, window_bounds = array<i64: 64, 600>}, {transform_indices = @transform_1, window_bounds = array<i64: 64, 600>}, {transform_indices = @transform_2, window_bounds = array<i64: 64, 600>}, {transform_indices = @transform_3, window_bounds = array<i64: 64, 600>}, {pipeline_mode = #tpu.pipeline_mode<synchronous>, transform_indices = @transform_4, window_bounds = array<i64: 600, 128>}, {pipeline_mode = #tpu.pipeline_mode<synchronous>, transform_indices = @transform_5, window_bounds = array<i64: 1, 128>}, {transform_indices = @transform_6, window_bounds = array<i64: 64, 128>}]} {
    %c0 = arith.constant 0 : index
    %c0_0 = arith.constant 0 : index
    %0 = vector.load %arg5[%c0, %c0_0] : memref<600x128xbf16, #tpu.memory_space<vmem>>, vector<600x128xbf16>
    %c0_1 = arith.constant 0 : index
    %c0_2 = arith.constant 0 : index
    %1 = vector.load %arg1[%c0_1, %c0_2] : memref<64x600xbf16, #tpu.memory_space<vmem>>, vector<64x600xbf16>
    %cst = arith.constant dense<0.000000e+00> : vector<64x128xf32>
    %2 = tpu.matmul %1, %0, %cst {dimension_numbers = #tpu.dot_dimension_numbers<[1], [0], [0], [1], [0, 0, 1, 1], [], []>} : vector<64x600xbf16>, vector<600x128xbf16>, vector<64x128xf32> -> vector<64x128xf32>
    %c0_3 = arith.constant 0 : index
    %c0_4 = arith.constant 0 : index
    %3 = vector.load %arg2[%c0_3, %c0_4] : memref<64x600xbf16, #tpu.memory_space<vmem>>, vector<64x600xbf16>
    %cst_5 = arith.constant dense<0.000000e+00> : vector<64x128xf32>
    %4 = tpu.matmul %3, %0, %cst_5 {dimension_numbers = #tpu.dot_dimension_numbers<[1], [0], [0], [1], [0, 0, 1, 1], [], []>} : vector<64x600xbf16>, vector<600x128xbf16>, vector<64x128xf32> -> vector<64x128xf32>
    %5 = arith.maximumf %2, %4 : vector<64x128xf32>
    %c0_6 = arith.constant 0 : index
    %c0_7 = arith.constant 0 : index
    %6 = vector.load %arg3[%c0_6, %c0_7] : memref<64x600xbf16, #tpu.memory_space<vmem>>, vector<64x600xbf16>
    %cst_8 = arith.constant dense<0.000000e+00> : vector<64x128xf32>
    %7 = tpu.matmul %6, %0, %cst_8 {dimension_numbers = #tpu.dot_dimension_numbers<[1], [0], [0], [1], [0, 0, 1, 1], [], []>} : vector<64x600xbf16>, vector<600x128xbf16>, vector<64x128xf32> -> vector<64x128xf32>
    %8 = arith.maximumf %5, %7 : vector<64x128xf32>
    %c0_9 = arith.constant 0 : index
    %c0_10 = arith.constant 0 : index
    %9 = vector.load %arg4[%c0_9, %c0_10] : memref<64x600xbf16, #tpu.memory_space<vmem>>, vector<64x600xbf16>
    %cst_11 = arith.constant dense<0.000000e+00> : vector<64x128xf32>
    %10 = tpu.matmul %9, %0, %cst_11 {dimension_numbers = #tpu.dot_dimension_numbers<[1], [0], [0], [1], [0, 0, 1, 1], [], []>} : vector<64x600xbf16>, vector<600x128xbf16>, vector<64x128xf32> -> vector<64x128xf32>
    %11 = arith.maximumf %8, %10 : vector<64x128xf32>
    %c0_12 = arith.constant 0 : index
    %c0_13 = arith.constant 0 : index
    %12 = vector.load %arg6[%c0_12, %c0_13] : memref<1x128xf32, #tpu.memory_space<vmem>>, vector<1x128xf32>
    %13 = vector.broadcast %12 : vector<1x128xf32> to vector<64x128xf32>
    %14 = arith.addf %11, %13 : vector<64x128xf32>
    %cst_14 = arith.constant 0.000000e+00 : f32
    %15 = vector.broadcast %cst_14 : f32 to vector<64x128xf32>
    %16 = arith.maximumf %14, %15 : vector<64x128xf32>
    %17 = arith.truncf %16 : vector<64x128xf32> to vector<64x128xbf16>
    %c0_15 = arith.constant 0 : index
    %c0_16 = arith.constant 0 : index
    %18 = vector.load %arg7[%c0_15, %c0_16] : memref<64x128xbf16, #tpu.memory_space<vmem>>, vector<64x128xbf16>
    tpu.vector_store %arg7[%c0_15, %c0_16], %17 {strides = array<i32>} : memref<64x128xbf16, #tpu.memory_space<vmem>>, vector<64x128xbf16>,
    return
  }
  func.func @transform_0(%arg0: i32) -> (i32, i32) {
    %c0_i32 = arith.constant 0 : i32
    %c0_i32_0 = arith.constant 0 : i32
    return %arg0, %c0_i32 : i32, i32
  }
  func.func @transform_1(%arg0: i32) -> (i32, i32) {
    %c0_i32 = arith.constant 0 : i32
    %c0_i32_0 = arith.constant 0 : i32
    return %arg0, %c0_i32 : i32, i32
  }
  func.func @transform_2(%arg0: i32) -> (i32, i32) {
    %c0_i32 = arith.constant 0 : i32
    %c0_i32_0 = arith.constant 0 : i32
    return %arg0, %c0_i32 : i32, i32
  }
  func.func @transform_3(%arg0: i32) -> (i32, i32) {
    %c0_i32 = arith.constant 0 : i32
    %c0_i32_0 = arith.constant 0 : i32
    return %arg0, %c0_i32 : i32, i32
  }
  func.func @transform_4(%arg0: i32) -> (i32, i32) {
    %c0_i32 = arith.constant 0 : i32
    %c0_i32_0 = arith.constant 0 : i32
    %c0_i32_1 = arith.constant 0 : i32
    return %c0_i32, %c0_i32_0 : i32, i32
  }
  func.func @transform_5(%arg0: i32) -> (i32, i32) {
    %c0_i32 = arith.constant 0 : i32
    %c0_i32_0 = arith.constant 0 : i32
    %c0_i32_1 = arith.constant 0 : i32
    return %c0_i32, %c0_i32_0 : i32, i32
  }
  func.func @transform_6(%arg0: i32) -> (i32, i32) {
    %c0_i32 = arith.constant 0 : i32
    %c0_i32_0 = arith.constant 0 : i32
    return %arg0, %c0_i32 : i32, i32
  }
}

module attributes {stable_mosaic.version = 11 : i64} {
  func.func @_conv_relu_pool_kernel(%arg0: i32, %arg1: memref<16x1200xbf16, #tpu.memory_space<vmem>>, %arg2: memref<16x1200xbf16, #tpu.memory_space<vmem>>, %arg3: memref<16x1200xbf16, #tpu.memory_space<vmem>>, %arg4: memref<16x1200xbf16, #tpu.memory_space<vmem>>, %arg5: memref<1200x128xbf16, #tpu.memory_space<vmem>>, %arg6: memref<1x128xf32, #tpu.memory_space<vmem>>, %arg7: memref<16x128xbf16, #tpu.memory_space<vmem>>) attributes {dimension_semantics = [#tpu.dimension_semantics<parallel>], iteration_bounds = array<i64: 2>, scalar_prefetch = 0 : i64, scratch_operands = 0 : i64, tpu.core_type = #tpu.core_type<tc>, window_params = [{transform_indices = @transform_0, window_bounds = array<i64: 16, 1200>}, {transform_indices = @transform_1, window_bounds = array<i64: 16, 1200>}, {transform_indices = @transform_2, window_bounds = array<i64: 16, 1200>}, {transform_indices = @transform_3, window_bounds = array<i64: 16, 1200>}, {pipeline_mode = #tpu.pipeline_mode<synchronous>, transform_indices = @transform_4, window_bounds = array<i64: 1200, 128>}, {pipeline_mode = #tpu.pipeline_mode<synchronous>, transform_indices = @transform_5, window_bounds = array<i64: 1, 128>}, {transform_indices = @transform_6, window_bounds = array<i64: 16, 128>}]} {
    %c0 = arith.constant 0 : index
    %c0_0 = arith.constant 0 : index
    %0 = vector.load %arg5[%c0, %c0_0] : memref<1200x128xbf16, #tpu.memory_space<vmem>>, vector<1200x128xbf16>
    %c0_1 = arith.constant 0 : index
    %c0_2 = arith.constant 0 : index
    %1 = vector.load %arg1[%c0_1, %c0_2] : memref<16x1200xbf16, #tpu.memory_space<vmem>>, vector<16x1200xbf16>
    %cst = arith.constant dense<0.000000e+00> : vector<16x128xf32>
    %2 = tpu.matmul %1, %0, %cst {dimension_numbers = #tpu.dot_dimension_numbers<[1], [0], [0], [1], [0, 0, 1, 1], [], []>} : vector<16x1200xbf16>, vector<1200x128xbf16>, vector<16x128xf32> -> vector<16x128xf32>
    %c0_3 = arith.constant 0 : index
    %c0_4 = arith.constant 0 : index
    %3 = vector.load %arg2[%c0_3, %c0_4] : memref<16x1200xbf16, #tpu.memory_space<vmem>>, vector<16x1200xbf16>
    %cst_5 = arith.constant dense<0.000000e+00> : vector<16x128xf32>
    %4 = tpu.matmul %3, %0, %cst_5 {dimension_numbers = #tpu.dot_dimension_numbers<[1], [0], [0], [1], [0, 0, 1, 1], [], []>} : vector<16x1200xbf16>, vector<1200x128xbf16>, vector<16x128xf32> -> vector<16x128xf32>
    %5 = arith.maximumf %2, %4 : vector<16x128xf32>
    %c0_6 = arith.constant 0 : index
    %c0_7 = arith.constant 0 : index
    %6 = vector.load %arg3[%c0_6, %c0_7] : memref<16x1200xbf16, #tpu.memory_space<vmem>>, vector<16x1200xbf16>
    %cst_8 = arith.constant dense<0.000000e+00> : vector<16x128xf32>
    %7 = tpu.matmul %6, %0, %cst_8 {dimension_numbers = #tpu.dot_dimension_numbers<[1], [0], [0], [1], [0, 0, 1, 1], [], []>} : vector<16x1200xbf16>, vector<1200x128xbf16>, vector<16x128xf32> -> vector<16x128xf32>
    %8 = arith.maximumf %5, %7 : vector<16x128xf32>
    %c0_9 = arith.constant 0 : index
    %c0_10 = arith.constant 0 : index
    %9 = vector.load %arg4[%c0_9, %c0_10] : memref<16x1200xbf16, #tpu.memory_space<vmem>>, vector<16x1200xbf16>
    %cst_11 = arith.constant dense<0.000000e+00> : vector<16x128xf32>
    %10 = tpu.matmul %9, %0, %cst_11 {dimension_numbers = #tpu.dot_dimension_numbers<[1], [0], [0], [1], [0, 0, 1, 1], [], []>} : vector<16x1200xbf16>, vector<1200x128xbf16>, vector<16x128xf32> -> vector<16x128xf32>
    %11 = arith.maximumf %8, %10 : vector<16x128xf32>
    %c0_12 = arith.constant 0 : index
    %c0_13 = arith.constant 0 : index
    %12 = vector.load %arg6[%c0_12, %c0_13] : memref<1x128xf32, #tpu.memory_space<vmem>>, vector<1x128xf32>
    %13 = vector.broadcast %12 : vector<1x128xf32> to vector<16x128xf32>
    %14 = arith.addf %11, %13 : vector<16x128xf32>
    %cst_14 = arith.constant 0.000000e+00 : f32
    %15 = vector.broadcast %cst_14 : f32 to vector<16x128xf32>
    %16 = arith.maximumf %14, %15 : vector<16x128xf32>
    %17 = arith.truncf %16 : vector<16x128xf32> to vector<16x128xbf16>
    %c0_15 = arith.constant 0 : index
    %c0_16 = arith.constant 0 : index
    %18 = vector.load %arg7[%c0_15, %c0_16] : memref<16x128xbf16, #tpu.memory_space<vmem>>, vector<16x128xbf16>
    tpu.vector_store %arg7[%c0_15, %c0_16], %17 {strides = array<i32>} : memref<16x128xbf16, #tpu.memory_space<vmem>>, vector<16x128xbf16>,
    return
  }
  func.func @transform_0(%arg0: i32) -> (i32, i32) {
    %c0_i32 = arith.constant 0 : i32
    %c0_i32_0 = arith.constant 0 : i32
    return %arg0, %c0_i32 : i32, i32
  }
  func.func @transform_1(%arg0: i32) -> (i32, i32) {
    %c0_i32 = arith.constant 0 : i32
    %c0_i32_0 = arith.constant 0 : i32
    return %arg0, %c0_i32 : i32, i32
  }
  func.func @transform_2(%arg0: i32) -> (i32, i32) {
    %c0_i32 = arith.constant 0 : i32
    %c0_i32_0 = arith.constant 0 : i32
    return %arg0, %c0_i32 : i32, i32
  }
  func.func @transform_3(%arg0: i32) -> (i32, i32) {
    %c0_i32 = arith.constant 0 : i32
    %c0_i32_0 = arith.constant 0 : i32
    return %arg0, %c0_i32 : i32, i32
  }
  func.func @transform_4(%arg0: i32) -> (i32, i32) {
    %c0_i32 = arith.constant 0 : i32
    %c0_i32_0 = arith.constant 0 : i32
    %c0_i32_1 = arith.constant 0 : i32
    return %c0_i32, %c0_i32_0 : i32, i32
  }
  func.func @transform_5(%arg0: i32) -> (i32, i32) {
    %c0_i32 = arith.constant 0 : i32
    %c0_i32_0 = arith.constant 0 : i32
    %c0_i32_1 = arith.constant 0 : i32
    return %c0_i32, %c0_i32_0 : i32, i32
  }
  func.func @transform_6(%arg0: i32) -> (i32, i32) {
    %c0_i32 = arith.constant 0 : i32
    %c0_i32_0 = arith.constant 0 : i32
    return %arg0, %c0_i32 : i32, i32
  }
}

module attributes {stable_mosaic.version = 11 : i64} {
  func.func @_linear_kernel(%arg0: i32, %arg1: memref<16x864xbf16, #tpu.memory_space<vmem>>, %arg2: memref<864x128xbf16, #tpu.memory_space<vmem>>, %arg3: memref<1x128xf32, #tpu.memory_space<vmem>>, %arg4: memref<16x128xf32, #tpu.memory_space<vmem>>) attributes {dimension_semantics = [#tpu.dimension_semantics<parallel>], iteration_bounds = array<i64: 1>, scalar_prefetch = 0 : i64, scratch_operands = 0 : i64, tpu.core_type = #tpu.core_type<tc>, window_params = [{transform_indices = @transform_0, window_bounds = array<i64: 16, 864>}, {pipeline_mode = #tpu.pipeline_mode<synchronous>, transform_indices = @transform_1, window_bounds = array<i64: 864, 128>}, {pipeline_mode = #tpu.pipeline_mode<synchronous>, transform_indices = @transform_2, window_bounds = array<i64: 1, 128>}, {transform_indices = @transform_3, window_bounds = array<i64: 16, 128>}]} {
    %c0 = arith.constant 0 : index
    %c0_0 = arith.constant 0 : index
    %0 = vector.load %arg1[%c0, %c0_0] : memref<16x864xbf16, #tpu.memory_space<vmem>>, vector<16x864xbf16>
    %c0_1 = arith.constant 0 : index
    %c0_2 = arith.constant 0 : index
    %1 = vector.load %arg2[%c0_1, %c0_2] : memref<864x128xbf16, #tpu.memory_space<vmem>>, vector<864x128xbf16>
    %cst = arith.constant dense<0.000000e+00> : vector<16x128xf32>
    %2 = tpu.matmul %0, %1, %cst {dimension_numbers = #tpu.dot_dimension_numbers<[1], [0], [0], [1], [0, 0, 1, 1], [], []>} : vector<16x864xbf16>, vector<864x128xbf16>, vector<16x128xf32> -> vector<16x128xf32>
    %c0_3 = arith.constant 0 : index
    %c0_4 = arith.constant 0 : index
    %3 = vector.load %arg3[%c0_3, %c0_4] : memref<1x128xf32, #tpu.memory_space<vmem>>, vector<1x128xf32>
    %4 = vector.broadcast %3 : vector<1x128xf32> to vector<16x128xf32>
    %5 = arith.addf %2, %4 : vector<16x128xf32>
    %c0_5 = arith.constant 0 : index
    %c0_6 = arith.constant 0 : index
    %6 = vector.load %arg4[%c0_5, %c0_6] : memref<16x128xf32, #tpu.memory_space<vmem>>, vector<16x128xf32>
    tpu.vector_store %arg4[%c0_5, %c0_6], %5 {strides = array<i32>} : memref<16x128xf32, #tpu.memory_space<vmem>>, vector<16x128xf32>,
    return
  }
  func.func @transform_0(%arg0: i32) -> (i32, i32) {
    %c0_i32 = arith.constant 0 : i32
    %c0_i32_0 = arith.constant 0 : i32
    return %arg0, %c0_i32 : i32, i32
  }
  func.func @transform_1(%arg0: i32) -> (i32, i32) {
    %c0_i32 = arith.constant 0 : i32
    %c0_i32_0 = arith.constant 0 : i32
    %c0_i32_1 = arith.constant 0 : i32
    return %c0_i32, %c0_i32_0 : i32, i32
  }
  func.func @transform_2(%arg0: i32) -> (i32, i32) {
    %c0_i32 = arith.constant 0 : i32
    %c0_i32_0 = arith.constant 0 : i32
    %c0_i32_1 = arith.constant 0 : i32
    return %c0_i32, %c0_i32_0 : i32, i32
  }
  func.func @transform_3(%arg0: i32) -> (i32, i32) {
    %c0_i32 = arith.constant 0 : i32
    %c0_i32_0 = arith.constant 0 : i32
    return %arg0, %c0_i32 : i32, i32
  }
}

</mosaic_0001>

<bundles_post_ra>
// kernel: encoder_forward.4
= control target key start
LH: loop header
LB: loop body
LE: loop exit
PB: predicated region body
PF: predicated region fallthrough
CT: control target
= control target key end

     0   :  { %s2930_s21 = smov 0   ;;  %s2932_s22 = smov 0   ;;  %s3611_s0 = inlined_call_operand.vmem [shape: bf16[392,25], index: 0, kind: input, shape index: {}]   ;;  %s3612_s1 = inlined_call_operand.vmem [shape: bf16[392,25], index: 1, kind: input, shape index: {}]   ;;  %s3613_s2 = inlined_call_operand.vmem [shape: bf16[392,25], index: 2, kind: input, shape index: {}]   ;;  %s3614_s3 = inlined_call_operand.vmem [shape: bf16[392,25], index: 3, kind: input, shape index: {}]   ;;  %s3615_s4 = inlined_call_operand.vmem [shape: bf16[25,128], index: 4, kind: input, shape index: {}]   ;;  %s3616_s5 = inlined_call_operand.vmem [shape: f32[1,128], index: 5, kind: input, shape index: {}]   ;;  %s3617_s6 = inlined_call_operand.vmem [shape: bf16[392,128], index: 6, kind: output, shape index: {}]  }
   0x1   :  { %s2934_s23 = smov 0  }
   0x2 LB: > { %s2943_s24 = sadd.s32 4294967295, %s2858_s23   ;;  %s2945_s25 = sadd.s32 1, %s2858_s23   ;;  %s2858_s23 = sphi %s2934_s23, %s3661_s23   ;;  %s2854_s22 = sphi %s2932_s22, %s3660_s22   ;;  %s2850_s21 = sphi %s2930_s21, %s3659_s21  }
   0x3   : > { %s166_s26 = ssub.s32 %s2858_s23, %s2945_s25  ;;  %s169_s27 = sadd.s32 1, %s2854_s22 }
   0x4   : > { %p167_p0 = scmp.eq.s32.totalorder %s166_s26, 0  ;;  %p179_p1 = scmp.ne.s32.totalorder %s2854_s22, %s2850_s21 }
   0x5   : > { %p180_p2 = scmp.eq.s32.totalorder %s2943_s24, 1  ;;  %p2115_p3 = scmp.ge.s32.totalorder %s2858_s23, 1 }
   0x6   : > { %s2953_s28 = scalar_select %p167_p0, %s2854_s22, %s169_s27  }
   0x7   : > { %p2955_p4 = por %p180_p2, %p179_p1  ;;  %p278_p5 = scmp.lt.s32.totalorder %s2858_s23, 3 }
   0x9   : > { %p279_p6 = pnand %p2115_p3, %p278_p5 }
   0xb   : > { %282 = sbr.rel (%p279_p6) target bundleno = 507 (0x1fb), region = 44 }
  0x10   : > { %vm546_vm0 = vcmask 1043456   ;;  %v2892_v0 = vmov 0.0   ;;  %v2746_v1 = vld [vmem:[%s3615_s4 + $0x8] sm:$0x1f]   ;;  %vm547_vm1 = vcmask 1044480   ;;  %v2893_v2 = vmov 65535  }
  0x11   : > { %2429 = vmatprep.subr.bf16.mxu0 %v2892_v0  ;;  %2485 = vmatprep.subr.bf16.mxu1 %v2892_v0  ;;  %v548_v3 = vsel %vm546_vm0, 4294967295, %v2893_v2  ;;  %s2965_s8 = smul.u32 26, %s2943_s24  ;;  %vm2894_vm2 = vmmov 0   ;;  %v2747_v6 = vld [vmem:[%s3615_s4] sm:$0xff]   ;;  %vm506_vm3 = vcmask 203776   ;;  %s335_s10 = sand.u32 1, %s2850_s21  }
  0x12   : > { %v549_v4 = vsel %vm547_vm1, %v548_v3, 0  ;;  %2433 = vmatprep.mubr.msk.bf16.mxu0 %vm2894_vm2, %v2892_v0  ;;  %2489 = vmatprep.mubr.msk.bf16.mxu1 %vm2894_vm2, %v2892_v0  ;;  %s2291_s13 = smul.u32 (%p2955_p4), 104, %s2943_s24 }
  0x13   : > { %v551_v5 = vand.u32 %v2746_v1, %v549_v4  ;;  %p343_p7 = scmp.lt.s32.totalorder %s2965_s8, 48 }
  0x14   : > { %s3500_s16 = scalar_lea.vmem (%p2955_p4), %s3617_s6, %s2291_s13  }
  0x15   : > { %2430 = vmatpush3.bf16.msra.mxu0 %v551_v5  ;;  %2486 = vmatpush3.bf16.msra.mxu1 %v551_v5  ;;  %s344_s11 = scalar_select %p343_p7, %s2965_s8, 48 }
  0x16   : > { %2431 = vmatprep.subr.bf16.mxu0 %v2892_v0  ;;  %2487 = vmatprep.subr.bf16.mxu1 %v2892_v0 }
  0x17   : > { %s2978_s12 = sshll.u32 %s344_s11, 2  ;;  %s2653_s11 = smul.u32 104, %s335_s10 }
  0x18   : > { %s2984_s15 = scalar_lea.vmem %s3611_s0, %s2978_s12  ;;  %s2991_s18 = scalar_lea.vmem %s3612_s1, %s2978_s12 }
  0x19   : > { %2432 = vmatpush3.bf16.msra.mxu0 %v2747_v6  ;;  %2488 = vmatpush3.bf16.msra.mxu1 %v2747_v6  ;;  %v2748_v7 = vld [vmem:[%s2984_s15] sm:$0xff]   ;;  %v2750_v9 = vld [vmem:[%s2984_s15 + $0x8] sm:$0xff]   ;;  %v2752_v11 = vld [vmem:[%s2984_s15 + $0x10] sm:$0xff]   ;;  %s3026_s23 = scalar_lea.vmem %s3613_s2, %s2978_s12  ;;  %s3032_s30 = scalar_lea.vmem %s3614_s3, %s2978_s12 }
  0x1a   : > { %v2749_v8 = vld [vmem:[%s2991_s18] sm:$0xff]   ;;  %2541 = vmatprep.subr.bf16.mxu0 %v2892_v0  ;;  %2597 = vmatprep.subr.bf16.mxu1 %v2892_v0  ;;  %v2751_v10 = vld [vmem:[%s2991_s18 + $0x8] sm:$0xff]   ;;  %v2753_v12 = vld [vmem:[%s2991_s18 + $0x10] sm:$0xff]   ;;  %s3388_s21 = scalar_lea.vmem [#allocation2], %s2653_s11   ;;  %s1766_s12 = ssub.s32 (%p2955_p4), 49, %s2965_s8 }
  0x1b   : > { %v2754_v13 = vld [vmem:[%s2984_s15 + $0x18] sm:$0xff]   ;;  %v2756_v15 = vld [vmem:[%s2984_s15 + $0x20] sm:$0xff]   ;;  %v2758_v17 = vld [vmem:[%s2984_s15 + $0x28] sm:$0xff]   ;;  %p1767_p8 = scmp.lt.s32.totalorder (%p2955_p4), %s1766_s12, 26 }
  0x1c   : > { %2434 = vmatmul.mubr.msk.bf16.vlgmr.msra.gmra.mxu0 %vm506_vm3, %v2748_v7  ;;  %2490 = vmatmul.mubr.msk.bf16.vlgmr.msra.gmra.mxu1 %vm506_vm3, %v2749_v8  ;;  %v2755_v14 = vld [vmem:[%s2991_s18 + $0x18] sm:$0xff]   ;;  %v2757_v16 = vld [vmem:[%s2991_s18 + $0x20] sm:$0xff]   ;;  %v2759_v18 = vld [vmem:[%s2991_s18 + $0x28] sm:$0xff]  }
  0x1d   : > { %2542 = vmatpush3.bf16.msra.mxu0 %v551_v5  ;;  %2598 = vmatpush3.bf16.msra.mxu1 %v551_v5  ;;  %v2760_v19 = vld [vmem:[%s2984_s15 + $0x30] sm:$0xff]   ;;  %v2762_v21 = vld [vmem:[%s2984_s15 + $0x38] sm:$0xff]   ;;  %v2764_v23 = vld [vmem:[%s2984_s15 + $0x40] sm:$0xff]  }
  0x1e   : > { %2437 = vmatprep.mubr.msk.bf16.mxu0 %vm2894_vm2, %v2892_v0  ;;  %2493 = vmatprep.mubr.msk.bf16.mxu1 %vm2894_vm2, %v2892_v0  ;;  %v2761_v20 = vld [vmem:[%s2991_s18 + $0x30] sm:$0xff]   ;;  %v2763_v22 = vld [vmem:[%s2991_s18 + $0x38] sm:$0xff]   ;;  %v2765_v24 = vld [vmem:[%s2991_s18 + $0x40] sm:$0xff]  }
  0x1f   : > { %2543 = vmatprep.subr.bf16.mxu0 %v2892_v0  ;;  %2599 = vmatprep.subr.bf16.mxu1 %v2892_v0  ;;  %v2766_v25 = vld [vmem:[%s2984_s15 + $0x48] sm:$0xff]   ;;  %v2768_v27 = vld [vmem:[%s2984_s15 + $0x50] sm:$0xff]   ;;  %v2770_v29 = vld [vmem:[%s2984_s15 + $0x58] sm:$0xff]  }
  0x20   : > { %v2767_v26 = vld [vmem:[%s2991_s18 + $0x48] sm:$0xff]   ;;  %v2769_v28 = vld [vmem:[%s2991_s18 + $0x50] sm:$0xff]   ;;  %v2771_v30 = vld [vmem:[%s2991_s18 + $0x58] sm:$0xff]  }
  0x21   : > { %2544 = vmatpush3.bf16.msra.mxu0 %v2747_v6  ;;  %2600 = vmatpush3.bf16.msra.mxu1 %v2747_v6  ;;  %v2772_v31 = vld [vmem:[%s2984_s15 + $0x60] sm:$0xff]   ;;  %v2776_v35 = vld [vmem:[%s3026_s23 + $0x8] sm:$0xff]   ;;  %v2778_v37 = vld [vmem:[%s3026_s23 + $0x10] sm:$0xff]  }
  0x22   : > { %v2773_v32 = vld [vmem:[%s2991_s18 + $0x60] sm:$0xff]   ;;  %v2777_v36 = vld [vmem:[%s3032_s30 + $0x8] sm:$0xff]   ;;  %v2779_v38 = vld [vmem:[%s3032_s30 + $0x10] sm:$0xff]  }
  0x23   : > { %v2774_v33 = vld [vmem:[%s3026_s23] sm:$0xff]   ;;  %v2780_v39 = vld [vmem:[%s3026_s23 + $0x18] sm:$0xff]   ;;  %v2784_v43 = vld [vmem:[%s3026_s23 + $0x28] sm:$0xff]  }
  0x24   : > { %2438 = vmatmul.mubr.msk.bf16.gmra.mxu0 %vm506_vm3, %v2750_v9  ;;  %2494 = vmatmul.mubr.msk.bf16.gmra.mxu1 %vm506_vm3, %v2751_v10  ;;  %v2775_v34 = vld [vmem:[%s3032_s30] sm:$0xff]   ;;  %v2781_v40 = vld [vmem:[%s3032_s30 + $0x18] sm:$0xff]   ;;  %v2785_v44 = vld [vmem:[%s3032_s30 + $0x28] sm:$0xff]  }
  0x25   : > { %2441 = vmatprep.mubr.msk.bf16.mxu0 %vm2894_vm2, %v2892_v0  ;;  %2497 = vmatprep.mubr.msk.bf16.mxu1 %vm2894_vm2, %v2892_v0  ;;  %v2782_v41 = vld [vmem:[%s3026_s23 + $0x20] sm:$0xff]   ;;  %v2786_v45 = vld [vmem:[%s3026_s23 + $0x30] sm:$0xff]   ;;  %v2788_v47 = vld [vmem:[%s3026_s23 + $0x38] sm:$0xff]  }
  0x26   : > { %v2783_v42 = vld [vmem:[%s3032_s30 + $0x20] sm:$0xff]   ;;  %v2787_v46 = vld [vmem:[%s3032_s30 + $0x30] sm:$0xff]   ;;  %v2789_v48 = vld [vmem:[%s3032_s30 + $0x38] sm:$0xff]  }
  0x27   : > { %v2790_v49 = vld [vmem:[%s3026_s23 + $0x40] sm:$0xff]   ;;  %v2792_v51 = vld [vmem:[%s3026_s23 + $0x48] sm:$0xff]   ;;  %v2794_v53 = vld [vmem:[%s3026_s23 + $0x50] sm:$0xff]  }
  0x28   : > { %v2791_v50 = vld [vmem:[%s3032_s30 + $0x40] sm:$0xff]   ;;  %v2793_v52 = vld [vmem:[%s3032_s30 + $0x48] sm:$0xff]   ;;  %v2795_v54 = vld [vmem:[%s3032_s30 + $0x50] sm:$0xff]  }
  0x29   : > { %v2796_v55 = vld [vmem:[%s3026_s23 + $0x58] sm:$0xff]   ;;  %v2798_v1 = vld [vmem:[%s3026_s23 + $0x60] sm:$0xff]  }
  0x2a   : > { %v2797_v56 = vld [vmem:[%s3032_s30 + $0x58] sm:$0xff]   ;;  %v2799_v2 = vld [vmem:[%s3032_s30 + $0x60] sm:$0xff]  }
  0x2c   : > { %2442 = vmatmul.mubr.msk.bf16.gmra.mxu0 %vm506_vm3, %v2752_v11  ;;  %2498 = vmatmul.mubr.msk.bf16.gmra.mxu1 %vm506_vm3, %v2753_v12 }
  0x2d   : > { %2445 = vmatprep.mubr.msk.bf16.mxu0 %vm2894_vm2, %v2892_v0  ;;  %2501 = vmatprep.mubr.msk.bf16.mxu1 %vm2894_vm2, %v2892_v0 }
  0x34   : > { %2446 = vmatmul.mubr.msk.bf16.gmra.mxu0 %vm506_vm3, %v2754_v13  ;;  %2502 = vmatmul.mubr.msk.bf16.gmra.mxu1 %vm506_vm3, %v2755_v14 }
  0x35   : > { %2449 = vmatprep.mubr.msk.bf16.mxu0 %vm2894_vm2, %v2892_v0  ;;  %2505 = vmatprep.mubr.msk.bf16.mxu1 %vm2894_vm2, %v2892_v0 }
  0x3c   : > { %2450 = vmatmul.mubr.msk.bf16.gmra.mxu0 %vm506_vm3, %v2756_v15  ;;  %2506 = vmatmul.mubr.msk.bf16.gmra.mxu1 %vm506_vm3, %v2757_v16 }
  0x3d   : > { %2453 = vmatprep.mubr.msk.bf16.mxu0 %vm2894_vm2, %v2892_v0  ;;  %2509 = vmatprep.mubr.msk.bf16.mxu1 %vm2894_vm2, %v2892_v0 }
  0x44   : > { %2454 = vmatmul.mubr.msk.bf16.gmra.mxu0 %vm506_vm3, %v2758_v17  ;;  %2510 = vmatmul.mubr.msk.bf16.gmra.mxu1 %vm506_vm3, %v2759_v18 }
  0x45   : > { %2457 = vmatprep.mubr.msk.bf16.mxu0 %vm2894_vm2, %v2892_v0  ;;  %2513 = vmatprep.mubr.msk.bf16.mxu1 %vm2894_vm2, %v2892_v0 }
  0x4c   : > { %2458 = vmatmul.mubr.msk.bf16.gmra.mxu0 %vm506_vm3, %v2760_v19  ;;  %2514 = vmatmul.mubr.msk.bf16.gmra.mxu1 %vm506_vm3, %v2761_v20 }
  0x4d   : > { %2461 = vmatprep.mubr.msk.bf16.mxu0 %vm2894_vm2, %v2892_v0  ;;  %2517 = vmatprep.mubr.msk.bf16.mxu1 %vm2894_vm2, %v2892_v0 }
  0x54   : > { %2462 = vmatmul.mubr.msk.bf16.gmra.mxu0 %vm506_vm3, %v2762_v21  ;;  %2518 = vmatmul.mubr.msk.bf16.gmra.mxu1 %vm506_vm3, %v2763_v22 }
  0x55   : > { %2465 = vmatprep.mubr.msk.bf16.mxu0 %vm2894_vm2, %v2892_v0  ;;  %2521 = vmatprep.mubr.msk.bf16.mxu1 %vm2894_vm2, %v2892_v0 }
  0x5c   : > { %2466 = vmatmul.mubr.msk.bf16.gmra.mxu0 %vm506_vm3, %v2764_v23  ;;  %2522 = vmatmul.mubr.msk.bf16.gmra.mxu1 %vm506_vm3, %v2765_v24 }
  0x5d   : > { %2469 = vmatprep.mubr.msk.bf16.mxu0 %vm2894_vm2, %v2892_v0  ;;  %2525 = vmatprep.mubr.msk.bf16.mxu1 %vm2894_vm2, %v2892_v0 }
  0x64   : > { %2470 = vmatmul.mubr.msk.bf16.gmra.mxu0 %vm506_vm3, %v2766_v25  ;;  %2526 = vmatmul.mubr.msk.bf16.gmra.mxu1 %vm506_vm3, %v2767_v26 }
  0x65   : > { %2473 = vmatprep.mubr.msk.bf16.mxu0 %vm2894_vm2, %v2892_v0  ;;  %2529 = vmatprep.mubr.msk.bf16.mxu1 %vm2894_vm2, %v2892_v0 }
  0x6c   : > { %2474 = vmatmul.mubr.msk.bf16.gmra.mxu0 %vm506_vm3, %v2768_v27  ;;  %2530 = vmatmul.mubr.msk.bf16.gmra.mxu1 %vm506_vm3, %v2769_v28 }
  0x6d   : > { %2477 = vmatprep.mubr.msk.bf16.mxu0 %vm2894_vm2, %v2892_v0  ;;  %2533 = vmatprep.mubr.msk.bf16.mxu1 %vm2894_vm2, %v2892_v0 }
  0x74   : > { %2478 = vmatmul.mubr.msk.bf16.gmra.mxu0 %vm506_vm3, %v2770_v29  ;;  %2534 = vmatmul.mubr.msk.bf16.gmra.mxu1 %vm506_vm3, %v2771_v30 }
  0x75   : > { %2481 = vmatprep.mubr.msk.bf16.mxu0 %vm2894_vm2, %v2892_v0  ;;  %2537 = vmatprep.mubr.msk.bf16.mxu1 %vm2894_vm2, %v2892_v0 }
  0x7c   : > { %2482 = vmatmul.mubr.msk.bf16.gmra.mxu0 %vm506_vm3, %v2772_v31  ;;  %2538 = vmatmul.mubr.msk.bf16.gmra.mxu1 %vm506_vm3, %v2773_v32 }
  0x7d   : > { %2545 = vmatprep.mubr.msk.bf16.mxu0 %vm2894_vm2, %v2892_v0  ;;  %2601 = vmatprep.mubr.msk.bf16.mxu1 %vm2894_vm2, %v2892_v0 }
  0x84   : > { %2546 = vmatmul.mubr.msk.bf16.vlgmr.msra.gmra.mxu0 %vm506_vm3, %v2774_v33  ;;  %2602 = vmatmul.mubr.msk.bf16.vlgmr.msra.gmra.mxu1 %vm506_vm3, %v2775_v34 }
  0x85   : > { %2549 = vmatprep.mubr.msk.bf16.mxu0 %vm2894_vm2, %v2892_v0  ;;  %2605 = vmatprep.mubr.msk.bf16.mxu1 %vm2894_vm2, %v2892_v0 }
  0x8c   : > { %2550 = vmatmul.mubr.msk.bf16.gmra.mxu0 %vm506_vm3, %v2776_v35  ;;  %2606 = vmatmul.mubr.msk.bf16.gmra.mxu1 %vm506_vm3, %v2777_v36 }
  0x8d   : > { %2553 = vmatprep.mubr.msk.bf16.mxu0 %vm2894_vm2, %v2892_v0  ;;  %2609 = vmatprep.mubr.msk.bf16.mxu1 %vm2894_vm2, %v2892_v0 }
  0x94   : > { %2554 = vmatmul.mubr.msk.bf16.gmra.mxu0 %vm506_vm3, %v2778_v37  ;;  %2610 = vmatmul.mubr.msk.bf16.gmra.mxu1 %vm506_vm3, %v2779_v38 }
  0x95   : > { %2557 = vmatprep.mubr.msk.bf16.mxu0 %vm2894_vm2, %v2892_v0  ;;  %2613 = vmatprep.mubr.msk.bf16.mxu1 %vm2894_vm2, %v2892_v0 }
  0x9c   : > { %2558 = vmatmul.mubr.msk.bf16.gmra.mxu0 %vm506_vm3, %v2780_v39  ;;  %2614 = vmatmul.mubr.msk.bf16.gmra.mxu1 %vm506_vm3, %v2781_v40 }
  0x9d   : > { %2561 = vmatprep.mubr.msk.bf16.mxu0 %vm2894_vm2, %v2892_v0  ;;  %2617 = vmatprep.mubr.msk.bf16.mxu1 %vm2894_vm2, %v2892_v0 }
  0xa4   : > { %2562 = vmatmul.mubr.msk.bf16.gmra.mxu0 %vm506_vm3, %v2782_v41  ;;  %2618 = vmatmul.mubr.msk.bf16.gmra.mxu1 %vm506_vm3, %v2783_v42 }
  0xa5   : > { %2565 = vmatprep.mubr.msk.bf16.mxu0 %vm2894_vm2, %v2892_v0  ;;  %2621 = vmatprep.mubr.msk.bf16.mxu1 %vm2894_vm2, %v2892_v0 }
  0xac   : > { %2566 = vmatmul.mubr.msk.bf16.gmra.mxu0 %vm506_vm3, %v2784_v43  ;;  %2622 = vmatmul.mubr.msk.bf16.gmra.mxu1 %vm506_vm3, %v2785_v44 }
  0xad   : > { %2569 = vmatprep.mubr.msk.bf16.mxu0 %vm2894_vm2, %v2892_v0  ;;  %2625 = vmatprep.mubr.msk.bf16.mxu1 %vm2894_vm2, %v2892_v0 }
  0xb4   : > { %2570 = vmatmul.mubr.msk.bf16.gmra.mxu0 %vm506_vm3, %v2786_v45  ;;  %2626 = vmatmul.mubr.msk.bf16.gmra.mxu1 %vm506_vm3, %v2787_v46 }
  0xb5   : > { %2573 = vmatprep.mubr.msk.bf16.mxu0 %vm2894_vm2, %v2892_v0  ;;  %2629 = vmatprep.mubr.msk.bf16.mxu1 %vm2894_vm2, %v2892_v0 }
  0xbc   : > { %2574 = vmatmul.mubr.msk.bf16.gmra.mxu0 %vm506_vm3, %v2788_v47  ;;  %2630 = vmatmul.mubr.msk.bf16.gmra.mxu1 %vm506_vm3, %v2789_v48 }
  0xbd   : > { %2577 = vmatprep.mubr.msk.bf16.mxu0 %vm2894_vm2, %v2892_v0  ;;  %2633 = vmatprep.mubr.msk.bf16.mxu1 %vm2894_vm2, %v2892_v0 }
  0xc4   : > { %2578 = vmatmul.mubr.msk.bf16.gmra.mxu0 %vm506_vm3, %v2790_v49  ;;  %2634 = vmatmul.mubr.msk.bf16.gmra.mxu1 %vm506_vm3, %v2791_v50 }
  0xc5   : > { %2581 = vmatprep.mubr.msk.bf16.mxu0 %vm2894_vm2, %v2892_v0  ;;  %2637 = vmatprep.mubr.msk.bf16.mxu1 %vm2894_vm2, %v2892_v0 }
  0xcc   : > { %2582 = vmatmul.mubr.msk.bf16.gmra.mxu0 %vm506_vm3, %v2792_v51  ;;  %2638 = vmatmul.mubr.msk.bf16.gmra.mxu1 %vm506_vm3, %v2793_v52 }
  0xcd   : > { %2585 = vmatprep.mubr.msk.bf16.mxu0 %vm2894_vm2, %v2892_v0  ;;  %2641 = vmatprep.mubr.msk.bf16.mxu1 %vm2894_vm2, %v2892_v0 }
  0xd4   : > { %2586 = vmatmul.mubr.msk.bf16.gmra.mxu0 %vm506_vm3, %v2794_v53  ;;  %2642 = vmatmul.mubr.msk.bf16.gmra.mxu1 %vm506_vm3, %v2795_v54 }
  0xd5   : > { %2589 = vmatprep.mubr.msk.bf16.mxu0 %vm2894_vm2, %v2892_v0  ;;  %2645 = vmatprep.mubr.msk.bf16.mxu1 %vm2894_vm2, %v2892_v0 }
  0xdc   : > { %v3202_v57 = vpop.f32.mrf.mxu0  ;;  %v3204_v58 = vpop.f32.mrf.mxu1  ;;  %2590 = vmatmul.mubr.msk.bf16.gmra.mxu0 %vm506_vm3, %v2796_v55  ;;  %2646 = vmatmul.mubr.msk.bf16.gmra.mxu1 %vm506_vm3, %v2797_v56 }
  0xdd   : > { %v957_v59 = vmax.f32 %v3202_v57, %v3204_v58  ;;  %2593 = vmatprep.mubr.msk.bf16.mxu0 %vm2894_vm2, %v2892_v0  ;;  %2649 = vmatprep.mubr.msk.bf16.mxu1 %vm2894_vm2, %v2892_v0 }
  0xde   : > { %v2435_v60 = vpop.f32.mrf.mxu0  ;;  %v2491_v61 = vpop.f32.mrf.mxu1 }
  0xe0   : > { %v3214_v62 = vpop.f32.mrf.mxu0  ;;  %v3216_v63 = vpop.f32.mrf.mxu1 }
  0xe2   : > { %v2436_v4 = vpop.f32.mrf.mxu0  ;;  %v2492_v5 = vpop.f32.mrf.mxu1 }
  0xe4   : > { %v3222_v6 = vpop.f32.mrf.mxu0  ;;  %v3224_v7 = vpop.f32.mrf.mxu1  ;;  %2594 = vmatmul.mubr.msk.bf16.gmra.mxu0 %vm506_vm3, %v2798_v1  ;;  %2650 = vmatmul.mubr.msk.bf16.gmra.mxu1 %vm506_vm3, %v2799_v2 }
  0xe6   : > { %v2439_v8 = vpop.f32.mrf.mxu0  ;;  %v2495_v9 = vpop.f32.mrf.mxu1 }
  0xe8   : > { %v3230_v10 = vpop.f32.mrf.mxu0  ;;  %v3232_v11 = vpop.f32.mrf.mxu1 }
  0xea   : > { %v2440_v13 = vpop.f32.mrf.mxu0  ;;  %v2496_v14 = vpop.f32.mrf.mxu1 }
  0xec   : > { %v3236_v15 = vpop.f32.mrf.mxu0  ;;  %v3238_v16 = vpop.f32.mrf.mxu1 }
  0xee   : > { %v2443_v18 = vpop.f32.mrf.mxu0  ;;  %v2499_v19 = vpop.f32.mrf.mxu1 }
  0xf0   : > { %v3242_v20 = vpop.f32.mrf.mxu0  ;;  %v3244_v21 = vpop.f32.mrf.mxu1 }
  0xf2   : > { %v2444_v23 = vpop.f32.mrf.mxu0  ;;  %v2500_v24 = vpop.f32.mrf.mxu1 }
  0xf4   : > { %v3248_v25 = vpop.f32.mrf.mxu0  ;;  %v3250_v26 = vpop.f32.mrf.mxu1 }
  0xf6   : > { %v2447_v28 = vpop.f32.mrf.mxu0  ;;  %v2503_v29 = vpop.f32.mrf.mxu1 }
  0xf8   : > { %v3254_v30 = vpop.f32.mrf.mxu0  ;;  %v3256_v31 = vpop.f32.mrf.mxu1 }
  0xfa   : > { %v2448_v33 = vpop.f32.mrf.mxu0  ;;  %v2504_v34 = vpop.f32.mrf.mxu1 }
  0xfc   : > { %v3260_v35 = vpop.f32.mrf.mxu0  ;;  %v3262_v36 = vpop.f32.mrf.mxu1 }
  0xfe   : > { %v2451_v38 = vpop.f32.mrf.mxu0  ;;  %v2507_v39 = vpop.f32.mrf.mxu1 }
 0x100   : > { %v3266_v40 = vpop.f32.mrf.mxu0  ;;  %v3268_v41 = vpop.f32.mrf.mxu1 }
 0x102   : > { %v2452_v43 = vpop.f32.mrf.mxu0  ;;  %v2508_v44 = vpop.f32.mrf.mxu1 }
 0x104   : > { %v3272_v45 = vpop.f32.mrf.mxu0  ;;  %v3274_v46 = vpop.f32.mrf.mxu1 }
 0x106   : > { %v2455_v48 = vpop.f32.mrf.mxu0  ;;  %v2511_v49 = vpop.f32.mrf.mxu1 }
 0x108   : > { %v3278_v50 = vpop.f32.mrf.mxu0  ;;  %v3280_v51 = vpop.f32.mrf.mxu1 }
 0x10a   : > { %v2456_v53 = vpop.f32.mrf.mxu0  ;;  %v2512_v54 = vpop.f32.mrf.mxu1 }
 0x10c   : > { %v3284_v55 = vpop.f32.mrf.mxu0  ;;  %v3286_v56 = vpop.f32.mrf.mxu1 }
 0x10e   : > { %v2459_v61 = vpop.f32.mrf.mxu0  ;;  %v2515_v1 = vpop.f32.mrf.mxu1 }
 0x110   : > { %v3290_v2 = vpop.f32.mrf.mxu0  ;;  %v3292_v4 = vpop.f32.mrf.mxu1 }
 0x112   : > { %v2460_v8 = vpop.f32.mrf.mxu0  ;;  %v2516_v9 = vpop.f32.mrf.mxu1 }
 0x114   : > { %v3296_v13 = vpop.f32.mrf.mxu0  ;;  %v3298_v14 = vpop.f32.mrf.mxu1 }
 0x116   : > { %v2463_v19 = vpop.f32.mrf.mxu0  ;;  %v2519_v23 = vpop.f32.mrf.mxu1 }
 0x118   : > { %v3302_v24 = vpop.f32.mrf.mxu0  ;;  %v3304_v28 = vpop.f32.mrf.mxu1 }
 0x11a   : > { %v2464_v33 = vpop.f32.mrf.mxu0  ;;  %v2520_v34 = vpop.f32.mrf.mxu1 }
 0x11c   : > { %v3308_v38 = vpop.f32.mrf.mxu0  ;;  %v3310_v39 = vpop.f32.mrf.mxu1 }
 0x11e   : > { %v2467_v44 = vpop.f32.mrf.mxu0  ;;  %v2523_v48 = vpop.f32.mrf.mxu1 }
 0x120   : > { %v3314_v49 = vpop.f32.mrf.mxu0  ;;  %v3316_v53 = vpop.f32.mrf.mxu1 }
 0x122   : > { %v2468_v61 = vpop.f32.mrf.mxu0  ;;  %v2524_v1 = vpop.f32.mrf.mxu1 }
 0x124   : > { %v3320_v8 = vpop.f32.mrf.mxu0  ;;  %v3322_v9 = vpop.f32.mrf.mxu1 }
 0x126   : > { %v2471_v23 = vpop.f32.mrf.mxu0  ;;  %v2527_v33 = vpop.f32.mrf.mxu1 }
 0x128   : > { %v3326_v34 = vpop.f32.mrf.mxu0  ;;  %v3328_v44 = vpop.f32.mrf.mxu1 }
 0x12a   : > { %v2472_v43 = vpop.f32.mrf.mxu0  ;;  %v2528_v54 = vpop.f32.mrf.mxu1 }
 0x12c   : > { %v3332_v61 = vpop.f32.mrf.mxu0  ;;  %v3334_v1 = vpop.f32.mrf.mxu1 }
 0x12e   : > { %v2475_v18 = vpop.f32.mrf.mxu0  ;;  %v2531_v19 = vpop.f32.mrf.mxu1 }
 0x130   : > { %v3338_v23 = vpop.f32.mrf.mxu0  ;;  %v3340_v33 = vpop.f32.mrf.mxu1 }
 0x132   : > { %v2476_v60 = vpop.f32.mrf.mxu0  ;;  %v2532_v48 = vpop.f32.mrf.mxu1 }
 0x134   : > { %v3344_v43 = vpop.f32.mrf.mxu0  ;;  %v3346_v54 = vpop.f32.mrf.mxu1 }
 0x136   : > { %v2479_v47 = vpop.f32.mrf.mxu0  ;;  %v2535_v29 = vpop.f32.mrf.mxu1 }
 0x138   : > { %v3350_v18 = vpop.f32.mrf.mxu0  ;;  %v3352_v19 = vpop.f32.mrf.mxu1 }
 0x13a   : > { %v2480_v37 = vpop.f32.mrf.mxu0  ;;  %v2536_v5 = vpop.f32.mrf.mxu1 }
 0x13c   : > { %v3356_v60 = vpop.f32.mrf.mxu0  ;;  %v3358_v48 = vpop.f32.mrf.mxu1 }
 0x13d   : > { %3623 = vst [vmem:[#allocation3_spill] sm:$0xff] %v3356_v60  ;;  %3624 = vst [vmem:[#allocation4_spill] sm:$0xff] %v3358_v48 }
 0x13e   : > { %v2483_v27 = vpop.f32.mrf.mxu0  ;;  %v2539_v52 = vpop.f32.mrf.mxu1 }
 0x13f   : > { %v3374_v52 = vld [vmem:[%s3616_s5] ss:$0 sm:$0xff] }
 0x140   : > { %v3362_v47 = vpop.f32.mrf.mxu0  ;;  %v3364_v29 = vpop.f32.mrf.mxu1 }
 0x141   : > { %3625 = vst [vmem:[#allocation5_spill] sm:$0xff] %v3362_v47  ;;  %3626 = vst [vmem:[#allocation6_spill] sm:$0xff] %v3364_v29 }
 0x142   : > { %v2484_v42 = vpop.f32.mrf.mxu0  ;;  %v2540_v37 = vpop.f32.mrf.mxu1 }
 0x143   : > { %v3627_v42 = vmax.f32 %v3214_v62, %v3216_v63 }
 0x144   : > { %v1147_v5 = vpop.f32.mrf.mxu0  ;;  %v1440_v17 = vpop.f32.mrf.mxu1 }
 0x145   : > { %v1250_v12 = vmax.f32 %v957_v59, %v1147_v5 }
 0x146   : > { %v2547_v0 = vpop.f32.mrf.mxu0  ;;  %v2603_v32 = vpop.f32.mrf.mxu1 }
 0x147   : > { %v1543_v27 = vmax.f32 %v1250_v12, %v1440_v17  ;;  %v3628_v17 = vmax.f32 %v3222_v6, %v3224_v7 }
 0x148   : > { %v1150_v3 = vpop.f32.mrf.mxu0  ;;  %v1443_v48 = vpop.f32.mrf.mxu1 }
 0x149   : > { %v1251_v37 = vmax.f32 %v3627_v42, %v1150_v3  ;;  %v1576_v57 = vadd.f32 %v3374_v52, %v1543_v27 }
 0x14a   : > { %v2548_v22 = vpop.f32.mrf.mxu0  ;;  %v2604_v29 = vpop.f32.mrf.mxu1 }
 0x14b   : > { %v1544_v58 = vmax.f32 %v1251_v37, %v1443_v48  ;;  %v1602_v60 = vmax.f32 %v1576_v57, 0.0  ;;  %v3629_v48 = vmax.f32 %v3230_v10, %v3232_v11 }
 0x14c   : > { %v1155_v59 = vpop.f32.mrf.mxu0  ;;  %v1448_v0 = vpop.f32.mrf.mxu1 }
 0x14d   : > { %v1577_v12 = vadd.f32 %v3374_v52, %v1544_v58  ;;  %v1252_v32 = vmax.f32 %v3628_v17, %v1155_v59 }
 0x14e   : > { %v2551_v5 = vpop.f32.mrf.mxu0  ;;  %v2607_v47 = vpop.f32.mrf.mxu1 }
 0x14f   : > { %v1603_v62 = vmax.f32 %v1577_v12, 0.0  ;;  %v1545_v63 = vmax.f32 %v1252_v32, %v1448_v0 }
 0x150   : > { %v1158_v3 = vpop.f32.mrf.mxu0  ;;  %v1451_v22 = vpop.f32.mrf.mxu1 }
 0x151   : > { %v2295_v29 = vpack.c.bf16 %v1603_v62, %v1602_v60  ;;  %v1253_v27 = vmax.f32 %v3629_v48, %v1158_v3  ;;  %v1578_v6 = vadd.f32 %v3374_v52, %v1545_v63  ;;  %v3630_v60 = vmax.f32 %v3236_v15, %v3238_v16 }
 0x152   : > { %v2552_v42 = vpop.f32.mrf.mxu0  ;;  %v2608_v37 = vpop.f32.mrf.mxu1  ;;  %v3631_v63 = vmax.f32 %v3242_v20, %v3244_v21 }
 0x153   : > { %2296 = vst [vmem:[%s3388_s21] sm:$0xff] %v2295_v29   ;;  %v1546_v7 = vmax.f32 %v1253_v27, %v1451_v22  ;;  %v1604_v0 = vmax.f32 %v1578_v6, 0.0  ;;  %v3632_v37 = vmax.f32 %v3248_v25, %v3250_v26 }
 0x154   : > { %v1163_v47 = vpop.f32.mrf.mxu0  ;;  %v1456_v57 = vpop.f32.mrf.mxu1 }
 0x155   : > { %v1579_v58 = vadd.f32 %v3374_v52, %v1546_v7  ;;  %v1254_v59 = vmax.f32 %v3630_v60, %v1163_v47 }
 0x156   : > { %v2555_v10 = vpop.f32.mrf.mxu0  ;;  %v2611_v11 = vpop.f32.mrf.mxu1 }
 0x157   : > { %v1605_v12 = vmax.f32 %v1579_v58, 0.0  ;;  %v1547_v17 = vmax.f32 %v1254_v59, %v1456_v57  ;;  %v3633_v10 = vmax.f32 %v3254_v30, %v3256_v31 }
 0x158   : > { %v1166_v32 = vpop.f32.mrf.mxu0  ;;  %v1459_v5 = vpop.f32.mrf.mxu1 }
 0x159   : > { %v2300_v62 = vpack.c.bf16 %v1605_v12, %v1604_v0  ;;  %v1255_v3 = vmax.f32 %v3631_v63, %v1166_v32  ;;  %v1580_v48 = vadd.f32 %v3374_v52, %v1547_v17 }
 0x15a   : > { %v2556_v22 = vpop.f32.mrf.mxu0  ;;  %v2612_v29 = vpop.f32.mrf.mxu1 }
 0x15b   : > { %2357 = vst [vmem:[%s3388_s21 + $0x8] sm:$0xff] %v2300_v62   ;;  %v1548_v27 = vmax.f32 %v1255_v3, %v1459_v5  ;;  %v1606_v57 = vmax.f32 %v1580_v48, 0.0  ;;  %v3634_v62 = vmax.f32 %v3260_v35, %v3262_v36 }
 0x15c   : > { %v1171_v15 = vpop.f32.mrf.mxu0  ;;  %v1464_v16 = vpop.f32.mrf.mxu1 }
 0x15d   : > { %v1581_v42 = vadd.f32 %v3374_v52, %v1548_v27  ;;  %v1256_v6 = vmax.f32 %v3632_v37, %v1171_v15 }
 0x15e   : > { %v2559_v7 = vpop.f32.mrf.mxu0  ;;  %v2615_v47 = vpop.f32.mrf.mxu1 }
 0x15f   : > { %v1607_v20 = vmax.f32 %v1581_v42, 0.0  ;;  %v1549_v21 = vmax.f32 %v1256_v6, %v1464_v16  ;;  %v3635_v16 = vmax.f32 %v3266_v40, %v3268_v41 }
 0x160   : > { %v1174_v58 = vpop.f32.mrf.mxu0  ;;  %v1467_v60 = vpop.f32.mrf.mxu1 }
 0x161   : > { %v2305_v59 = vpack.c.bf16 %v1607_v20, %v1606_v57  ;;  %v1257_v11 = vmax.f32 %v3633_v10, %v1174_v58  ;;  %v1582_v17 = vadd.f32 %v3374_v52, %v1549_v21  ;;  %v3636_v20 = vmax.f32 %v3272_v45, %v3274_v46 }
 0x162   : > { %v2560_v0 = vpop.f32.mrf.mxu0  ;;  %v2616_v12 = vpop.f32.mrf.mxu1 }
 0x163   : > { %2358 = vst [vmem:[%s3388_s21 + $0x10] sm:$0xff] %v2305_v59   ;;  %v1550_v32 = vmax.f32 %v1257_v11, %v1467_v60  ;;  %v1608_v29 = vmax.f32 %v1582_v17, 0.0  ;;  %v3637_v12 = vmax.f32 %v3278_v50, %v3280_v51 }
 0x164   : > { %v1179_v25 = vpop.f32.mrf.mxu0  ;;  %v1472_v26 = vpop.f32.mrf.mxu1 }
 0x165   : > { %v1583_v5 = vadd.f32 %v3374_v52, %v1550_v32  ;;  %v1258_v63 = vmax.f32 %v3634_v62, %v1179_v25 }
 0x166   : > { %v2563_v3 = vpop.f32.mrf.mxu0  ;;  %v2619_v22 = vpop.f32.mrf.mxu1 }
 0x167   : > { %v1609_v30 = vmax.f32 %v1583_v5, 0.0  ;;  %v1551_v31 = vmax.f32 %v1258_v63, %v1472_v26  ;;  %v3638_v63 = vmax.f32 %v3284_v55, %v3286_v56 }
 0x168   : > { %v1182_v48 = vpop.f32.mrf.mxu0  ;;  %v1475_v27 = vpop.f32.mrf.mxu1 }
 0x169   : > { %v2310_v15 = vpack.c.bf16 %v1609_v30, %v1608_v29  ;;  %v1259_v42 = vmax.f32 %v3635_v16, %v1182_v48  ;;  %v1584_v7 = vadd.f32 %v3374_v52, %v1551_v31 }
 0x16a   : > { %v2564_v37 = vpop.f32.mrf.mxu0  ;;  %v2620_v6 = vpop.f32.mrf.mxu1 }
 0x16b   : > { %2359 = vst [vmem:[%s3388_s21 + $0x18] sm:$0xff] %v2310_v15   ;;  %v1552_v47 = vmax.f32 %v1259_v42, %v1475_v27  ;;  %v1610_v59 = vmax.f32 %v1584_v7, 0.0  ;;  %v3639_v15 = vmax.f32 %v3290_v2, %v3292_v4 }
 0x16c   : > { %v1187_v35 = vpop.f32.mrf.mxu0  ;;  %v1480_v36 = vpop.f32.mrf.mxu1 }
 0x16d   : > { %v1585_v57 = vadd.f32 %v3374_v52, %v1552_v47  ;;  %v1260_v21 = vmax.f32 %v3636_v20, %v1187_v35  ;;  %v3640_v35 = vmax.f32 %v3296_v13, %v3298_v14 }
 0x16e   : > { %v2567_v58 = vpop.f32.mrf.mxu0  ;;  %v2623_v60 = vpop.f32.mrf.mxu1 }
 0x16f   : > { %v1611_v40 = vmax.f32 %v1585_v57, 0.0  ;;  %v1553_v41 = vmax.f32 %v1260_v21, %v1480_v36 }
 0x170   : > { %v1190_v10 = vpop.f32.mrf.mxu0  ;;  %v1483_v11 = vpop.f32.mrf.mxu1 }
 0x171   : > { %v2315_v0 = vpack.c.bf16 %v1611_v40, %v1610_v59  ;;  %v1261_v17 = vmax.f32 %v3637_v12, %v1190_v10  ;;  %v1586_v26 = vadd.f32 %v3374_v52, %v1553_v41  ;;  %v3641_v40 = vmax.f32 %v3302_v24, %v3304_v28 }
 0x172   : > { %v2568_v32 = vpop.f32.mrf.mxu0  ;;  %v2624_v25 = vpop.f32.mrf.mxu1 }
 0x173   : > { %2360 = vst [vmem:[%s3388_s21 + $0x20] sm:$0xff] %v2315_v0   ;;  %v1554_v5 = vmax.f32 %v1261_v17, %v1483_v11  ;;  %v1612_v30 = vmax.f32 %v1586_v26, 0.0  ;;  %v3642_v32 = vmax.f32 %v3308_v38, %v3310_v39 }
 0x174   : > { %v1195_v45 = vpop.f32.mrf.mxu0  ;;  %v1488_v46 = vpop.f32.mrf.mxu1 }
 0x175   : > { %v1587_v62 = vadd.f32 %v3374_v52, %v1554_v5  ;;  %v1262_v3 = vmax.f32 %v3638_v63, %v1195_v45 }
 0x176   : > { %v2571_v22 = vpop.f32.mrf.mxu0  ;;  %v2627_v29 = vpop.f32.mrf.mxu1 }
 0x177   : > { %v1613_v50 = vmax.f32 %v1587_v62, 0.0  ;;  %v1555_v51 = vmax.f32 %v1262_v3, %v1488_v46  ;;  %v3643_v3 = vmax.f32 %v3314_v49, %v3316_v53 }
 0x178   : > { %v1198_v31 = vpop.f32.mrf.mxu0  ;;  %v1491_v48 = vpop.f32.mrf.mxu1 }
 0x179   : > { %v2320_v27 = vpack.c.bf16 %v1613_v50, %v1612_v30  ;;  %v1263_v16 = vmax.f32 %v3639_v15, %v1198_v31  ;;  %v1588_v6 = vadd.f32 %v3374_v52, %v1555_v51 }
 0x17a   : > { %v2572_v42 = vpop.f32.mrf.mxu0  ;;  %v2628_v37 = vpop.f32.mrf.mxu1 }
 0x17b   : > { %2361 = vst [vmem:[%s3388_s21 + $0x28] sm:$0xff] %v2320_v27   ;;  %v1556_v7 = vmax.f32 %v1263_v16, %v1491_v48  ;;  %v1614_v21 = vmax.f32 %v1588_v6, 0.0  ;;  %v3644_v48 = vmax.f32 %v3320_v8, %v3322_v9 }
 0x17c   : > { %v1203_v55 = vpop.f32.mrf.mxu0  ;;  %v1496_v56 = vpop.f32.mrf.mxu1 }
 0x17d   : > { %v1589_v47 = vadd.f32 %v3374_v52, %v1556_v7  ;;  %v1264_v36 = vmax.f32 %v3640_v35, %v1203_v55  ;;  %v3645_v55 = vmax.f32 %v3326_v34, %v3328_v44 }
 0x17e   : > { %v2575_v57 = vpop.f32.mrf.mxu0  ;;  %v2631_v20 = vpop.f32.mrf.mxu1 }
 0x17f   : > { %v1615_v2 = vmax.f32 %v1589_v47, 0.0  ;;  %v1557_v4 = vmax.f32 %v1264_v36, %v1496_v56 }
 0x180   : > { %v1206_v58 = vpop.f32.mrf.mxu0  ;;  %v1499_v60 = vpop.f32.mrf.mxu1 }
 0x181   : > { %v2325_v59 = vpack.c.bf16 %v1615_v2, %v1614_v21  ;;  %v1265_v41 = vmax.f32 %v3641_v40, %v1206_v58  ;;  %v1590_v0 = vadd.f32 %v3374_v52, %v1557_v4  ;;  %v3646_v21 = vmax.f32 %v3332_v61, %v3334_v1 }
 0x182   : > { %v2576_v10 = vpop.f32.mrf.mxu0  ;;  %v2632_v11 = vpop.f32.mrf.mxu1 }
 0x183   : > { %2362 = vst [vmem:[%s3388_s21 + $0x30] sm:$0xff] %v2325_v59   ;;  %v1558_v12 = vmax.f32 %v1265_v41, %v1499_v60  ;;  %v1616_v45 = vmax.f32 %v1590_v0, 0.0  ;;  %v3647_v10 = vmax.f32 %v3338_v23, %v3340_v33 }
 0x184   : > { %v1211_v13 = vpop.f32.mrf.mxu0  ;;  %v1504_v14 = vpop.f32.mrf.mxu1 }
 0x185   : > { %v1591_v17 = vadd.f32 %v3374_v52, %v1558_v12  ;;  %v1266_v25 = vmax.f32 %v3642_v32, %v1211_v13  ;;  %v3648_v32 = vmax.f32 %v3344_v43, %v3346_v54 }
 0x186   : > { %v2579_v26 = vpop.f32.mrf.mxu0  ;;  %v2635_v5 = vpop.f32.mrf.mxu1 }
 0x187   : > { %v1617_v24 = vmax.f32 %v1591_v17, 0.0  ;;  %v1559_v28 = vmax.f32 %v1266_v25, %v1504_v14 }
 0x188   : > { %v1214_v46 = vpop.f32.mrf.mxu0  ;;  %v1507_v62 = vpop.f32.mrf.mxu1 }
 0x189   : > { %v2330_v63 = vpack.c.bf16 %v1617_v24, %v1616_v45  ;;  %v1267_v22 = vmax.f32 %v3643_v3, %v1214_v46  ;;  %v1592_v50 = vadd.f32 %v3374_v52, %v1559_v28 }
 0x18a   : > { %v2580_v29 = vpop.f32.mrf.mxu0  ;;  %v2636_v30 = vpop.f32.mrf.mxu1 }
 0x18b   : > { %2363 = vst [vmem:[%s3388_s21 + $0x38] sm:$0xff] %v2330_v63   ;;  %v1560_v51 = vmax.f32 %v1267_v22, %v1507_v62  ;;  %v1618_v42 = vmax.f32 %v1592_v50, 0.0  ;;  %v3649_v62 = vmax.f32 %v3350_v18, %v3352_v19 }
 0x18c   : > { %v1219_v38 = vpop.f32.mrf.mxu0  ;;  %v1512_v39 = vpop.f32.mrf.mxu1 }
 0x18d   : > { %v1593_v31 = vadd.f32 %v3374_v52, %v1560_v51  ;;  %v1268_v27 = vmax.f32 %v3644_v48, %v1219_v38  ;;  %v3650_v51 = vld [vmem:[#allocation3_spill] sm:$0xff]  ;;  %v3651_v38 = vld [vmem:[#allocation4_spill] sm:$0xff] }
 0x18e   : > { %v2583_v15 = vpop.f32.mrf.mxu0  ;;  %v2639_v16 = vpop.f32.mrf.mxu1 }
 0x18f   : > { %v1619_v49 = vmax.f32 %v1593_v31, 0.0  ;;  %v1561_v53 = vmax.f32 %v1268_v27, %v1512_v39  ;;  %v3652_v39 = vmax.f32 %v3650_v51, %v3651_v38 }
 0x190   : > { %v1222_v37 = vpop.f32.mrf.mxu0  ;;  %v1515_v6 = vpop.f32.mrf.mxu1 }
 0x191   : > { %v2335_v7 = vpack.c.bf16 %v1619_v49, %v1618_v42  ;;  %v1269_v56 = vmax.f32 %v3645_v55, %v1222_v37  ;;  %v1594_v36 = vadd.f32 %v3374_v52, %v1561_v53  ;;  %v3653_v53 = vld [vmem:[#allocation5_spill] sm:$0xff]  ;;  %v3654_v37 = vld [vmem:[#allocation6_spill] sm:$0xff] }
 0x192   : > { %v2584_v47 = vpop.f32.mrf.mxu0  ;;  %v2640_v35 = vpop.f32.mrf.mxu1 }
 0x193   : > { %2364 = vst [vmem:[%s3388_s21 + $0x40] sm:$0xff] %v2335_v7   ;;  %v1562_v57 = vmax.f32 %v1269_v56, %v1515_v6  ;;  %v1620_v60 = vmax.f32 %v1594_v36, 0.0  ;;  %v3655_v6 = vmax.f32 %v3653_v53, %v3654_v37 }
 0x194   : > { %v1227_v8 = vpop.f32.mrf.mxu0  ;;  %v1520_v9 = vpop.f32.mrf.mxu1 }
 0x195   : > { %v1595_v20 = vadd.f32 %v3374_v52, %v1562_v57  ;;  %v1270_v2 = vmax.f32 %v3646_v21, %v1227_v8 }
 0x196   : > { %v2587_v4 = vpop.f32.mrf.mxu0  ;;  %v2643_v58 = vpop.f32.mrf.mxu1 }
 0x197   : > { %v1621_v34 = vmax.f32 %v1595_v20, 0.0  ;;  %v1563_v44 = vmax.f32 %v1270_v2, %v1520_v9 }
 0x198   : > { %v1230_v59 = vpop.f32.mrf.mxu0  ;;  %v1523_v40 = vpop.f32.mrf.mxu1 }
 0x199   : > { %v2340_v41 = vpack.c.bf16 %v1621_v34, %v1620_v60  ;;  %v1271_v11 = vmax.f32 %v3647_v10, %v1230_v59  ;;  %v1596_v13 = vadd.f32 %v3374_v52, %v1563_v44 }
 0x19a   : > { %v2588_v0 = vpop.f32.mrf.mxu0  ;;  %v2644_v12 = vpop.f32.mrf.mxu1 }
 0x19b   : > { %2365 = vst [vmem:[%s3388_s21 + $0x48] sm:$0xff] %v2340_v41   ;;  %v1564_v14 = vmax.f32 %v1271_v11, %v1523_v40  ;;  %v1622_v45 = vmax.f32 %v1596_v13, 0.0 }
 0x19c   : > { %v1235_v61 = vpop.f32.mrf.mxu0  ;;  %v1528_v1 = vpop.f32.mrf.mxu1 }
 0x19d   : > { %v1597_v17 = vadd.f32 %v3374_v52, %v1564_v14  ;;  %v1272_v25 = vmax.f32 %v3648_v32, %v1235_v61 }
 0x19e   : > { %v2591_v26 = vpop.f32.mrf.mxu0  ;;  %v2647_v5 = vpop.f32.mrf.mxu1 }
 0x19f   : > { %v1623_v23 = vmax.f32 %v1597_v17, 0.0  ;;  %v1565_v33 = vmax.f32 %v1272_v25, %v1528_v1 }
 0x1a0   : > { %v1238_v24 = vpop.f32.mrf.mxu0  ;;  %v1531_v28 = vpop.f32.mrf.mxu1 }
 0x1a1   : > { %v2345_v46 = vpack.c.bf16 %v1623_v23, %v1622_v45  ;;  %v1273_v63 = vmax.f32 %v3649_v62, %v1238_v24  ;;  %v1598_v29 = vadd.f32 %v3374_v52, %v1565_v33 }
 0x1a2   : > { %v2592_v3 = vpop.f32.mrf.mxu0  ;;  %v2648_v22 = vpop.f32.mrf.mxu1 }
 0x1a3   : > { %2366 = vst [vmem:[%s3388_s21 + $0x50] sm:$0xff] %v2345_v46   ;;  %v1566_v30 = vmax.f32 %v1273_v63, %v1531_v28  ;;  %v1624_v15 = vmax.f32 %v1598_v29, 0.0 }
 0x1a4   : > { %v1243_v43 = vpop.f32.mrf.mxu0  ;;  %v1536_v54 = vpop.f32.mrf.mxu1 }
 0x1a5   : > { %v1599_v50 = vadd.f32 %v3374_v52, %v1566_v30  ;;  %v1274_v31 = vmax.f32 %v3652_v39, %v1243_v43 }
 0x1a6   : > { %v2595_v48 = vpop.f32.mrf.mxu0  ;;  %v2651_v27 = vpop.f32.mrf.mxu1 }
 0x1a7   : > { %v1625_v18 = vmax.f32 %v1599_v50, 0.0  ;;  %v1567_v19 = vmax.f32 %v1274_v31, %v1536_v54 }
 0x1a8   : > { %v1246_v16 = vpop.f32.mrf.mxu0  ;;  %v1539_v42 = vpop.f32.mrf.mxu1 }
 0x1a9   : > { %v2350_v49 = vpack.c.bf16 %v1625_v18, %v1624_v15  ;;  %v1275_v7 = vmax.f32 %v3655_v6, %v1246_v16  ;;  %v1600_v47 = vadd.f32 %v3374_v52, %v1567_v19 }
 0x1aa   : > { %v2596_v55 = vpop.f32.mrf.mxu0  ;;  %v2652_v56 = vpop.f32.mrf.mxu1 }
 0x1ab   : > { %2367 = vst [vmem:[%s3388_s21 + $0x58] sm:$0xff] %v2350_v49   ;;  %v1568_v35 = vmax.f32 %v1275_v7, %v1539_v42  ;;  %v1626_v57 = vmax.f32 %v1600_v47, 0.0 }
 0x1ad   : > { %v1601_v36 = vadd.f32 %v3374_v52, %v1568_v35 }
 0x1af   : > { %v1627_v8 = vmax.f32 %v1601_v36, 0.0  ;;  %1764 = sbr.rel (!%p2955_p4) target bundleno = 507 (0x1fb), region = 48 }
 0x1b1   : > { %v2355_v9 = vpack.c.bf16 %v1627_v8, %v1626_v57 }
 0x1b3   : > { %2368 = vst [vmem:[%s3388_s21 + $0x60] sm:$0xff] %v2355_v9  }
 0x1b4   : > { %s3663_s12 = smov (!%p1767_p8, %s1766_s12), 26 }
 0x1b5   : > { %s2253_s17 = sshll.u32 %s3663_s12, 6 }
 0x1b6   : > { %p2256_p9 = scmp.eq.s32.totalorder %s2253_s17, 0 }
 0x1b7   : > { %2800 = sdivrem.u32 (!%p2256_p9), %s3663_s12, 26 }
 0x1b8   : > { %1775 = sbr.rel (%p2256_p9) target bundleno = 507 (0x1fb), region = 52 }
 0x1c0   : > { %s3506_s29 = spop.drf %2800 }
 0x1c1   : > { %p2257_p10 = scmp.le.s32.totalorder %s3506_s29, 0 }
 0x1c2   : > { %s3656_s24 = smov (!%p2257_p10), %s3500_s16  ;;  %s3657_s8 = smov (!%p2257_p10), %s3388_s21 }
 0x1c3   : > { %2050 = sbr.rel (%p2257_p10) target bundleno = 482 (0x1e2), region = 133  ;;  %s3515_s18 = smov (!%p2257_p10), 0  }
 0x1c4   : > { %s3517_s19 = smov (!%p2257_p10), 0  }
 0x1c8 LB: >> { %v1793_v52 = vld [vmem:[%s2866_s8] sm:$0xf]  ;;  %v1795_v20 = vld [vmem:[%s2866_s8 + $0x4] sm:$0xf]  ;;  %v1797_v21 = vld [vmem:[%s2866_s8 + $0x8] sm:$0xf]  ;;  %s2874_s19 = sphi %s3517_s19, %s1787_s19   ;;  %s2870_s18 = sphi %s3515_s18, %s3658_s18   ;;  %s2866_s8 = sphi %s3657_s8, %s1850_s8   ;;  %s2862_s24 = sphi %s3656_s24, %s1851_s24  }
 0x1c9   : >> { %1794 = vst [vmem:[%s2862_s24] sm:$0xf] %v1793_v52  ;;  %1796 = vst [vmem:[%s2862_s24 + $0x4] sm:$0xf] %v1795_v20  ;;  %v1799_v2 = vld [vmem:[%s2866_s8 + $0xc] sm:$0xf]  ;;  %s1845_s20 = sadd.s32 1, %s2870_s18 }
 0x1ca   : >> { %1798 = vst [vmem:[%s2862_s24 + $0x8] sm:$0xf] %v1797_v21  ;;  %v1801_v4 = vld [vmem:[%s2866_s8 + $0x10] sm:$0xf]  ;;  %v1803_v58 = vld [vmem:[%s2866_s8 + $0x14] sm:$0xf]  ;;  %p1846_p11 = scmp.ge.s32.totalorder %s1845_s20, %s3506_s29 }
 0x1cb   : >> { %1800 = vst [vmem:[%s2862_s24 + $0xc] sm:$0xf] %v1799_v2  ;;  %1802 = vst [vmem:[%s2862_s24 + $0x10] sm:$0xf] %v1801_v4  ;;  %v1805_v60 = vld [vmem:[%s2866_s8 + $0x18] sm:$0xf] }
 0x1cc   : >> { %1804 = vst [vmem:[%s2862_s24 + $0x14] sm:$0xf] %v1803_v58  ;;  %v1807_v34 = vld [vmem:[%s2866_s8 + $0x1c] sm:$0xf]  ;;  %v1809_v44 = vld [vmem:[%s2866_s8 + $0x20] sm:$0xf] }
 0x1cd   : >> { %1806 = vst [vmem:[%s2862_s24 + $0x18] sm:$0xf] %v1805_v60  ;;  %1808 = vst [vmem:[%s2862_s24 + $0x1c] sm:$0xf] %v1807_v34  ;;  %v1811_v59 = vld [vmem:[%s2866_s8 + $0x24] sm:$0xf] }
 0x1ce   : >> { %1810 = vst [vmem:[%s2862_s24 + $0x20] sm:$0xf] %v1809_v44  ;;  %v1813_v40 = vld [vmem:[%s2866_s8 + $0x28] sm:$0xf]  ;;  %v1815_v41 = vld [vmem:[%s2866_s8 + $0x2c] sm:$0xf] }
 0x1cf   : >> { %1812 = vst [vmem:[%s2862_s24 + $0x24] sm:$0xf] %v1811_v59  ;;  %1814 = vst [vmem:[%s2862_s24 + $0x28] sm:$0xf] %v1813_v40  ;;  %v1817_v10 = vld [vmem:[%s2866_s8 + $0x30] sm:$0xf] }
 0x1d0   : >> { %1816 = vst [vmem:[%s2862_s24 + $0x2c] sm:$0xf] %v1815_v41  ;;  %v1819_v11 = vld [vmem:[%s2866_s8 + $0x34] sm:$0xf]  ;;  %v1821_v0 = vld [vmem:[%s2866_s8 + $0x38] sm:$0xf] }
 0x1d1   : >> { %1818 = vst [vmem:[%s2862_s24 + $0x30] sm:$0xf] %v1817_v10  ;;  %1820 = vst [vmem:[%s2862_s24 + $0x34] sm:$0xf] %v1819_v11  ;;  %v1823_v12 = vld [vmem:[%s2866_s8 + $0x3c] sm:$0xf] }
 0x1d2   : >> { %1822 = vst [vmem:[%s2862_s24 + $0x38] sm:$0xf] %v1821_v0  ;;  %v1825_v13 = vld [vmem:[%s2866_s8 + $0x40] sm:$0xf]  ;;  %v1827_v14 = vld [vmem:[%s2866_s8 + $0x44] sm:$0xf] }
 0x1d3   : >> { %1824 = vst [vmem:[%s2862_s24 + $0x3c] sm:$0xf] %v1823_v12  ;;  %1826 = vst [vmem:[%s2862_s24 + $0x40] sm:$0xf] %v1825_v13  ;;  %v1829_v61 = vld [vmem:[%s2866_s8 + $0x48] sm:$0xf] }
 0x1d4   : >> { %1828 = vst [vmem:[%s2862_s24 + $0x44] sm:$0xf] %v1827_v14  ;;  %v1831_v1 = vld [vmem:[%s2866_s8 + $0x4c] sm:$0xf]  ;;  %v1833_v17 = vld [vmem:[%s2866_s8 + $0x50] sm:$0xf] }
 0x1d5   : >> { %1830 = vst [vmem:[%s2862_s24 + $0x48] sm:$0xf] %v1829_v61  ;;  %1832 = vst [vmem:[%s2862_s24 + $0x4c] sm:$0xf] %v1831_v1  ;;  %v1835_v32 = vld [vmem:[%s2866_s8 + $0x54] sm:$0xf] }
 0x1d6   : >> { %1834 = vst [vmem:[%s2862_s24 + $0x50] sm:$0xf] %v1833_v17  ;;  %v1837_v25 = vld [vmem:[%s2866_s8 + $0x58] sm:$0xf]  ;;  %v1839_v26 = vld [vmem:[%s2866_s8 + $0x5c] sm:$0xf] }
 0x1d7   : >> { %1836 = vst [vmem:[%s2862_s24 + $0x54] sm:$0xf] %v1835_v32  ;;  %1838 = vst [vmem:[%s2862_s24 + $0x58] sm:$0xf] %v1837_v25  ;;  %v1841_v5 = vld [vmem:[%s2866_s8 + $0x60] sm:$0xf] }
 0x1d8   : >> { %1840 = vst [vmem:[%s2862_s24 + $0x5c] sm:$0xf] %v1839_v26  ;;  %v1843_v45 = vld [vmem:[%s2866_s8 + $0x64] sm:$0xf]  ;;  %1842 = vst [vmem:[%s2862_s24 + $0x60] sm:$0xf] %v1841_v5 }
 0x1d9   : >> { %1844 = vst [vmem:[%s2862_s24 + $0x64] sm:$0xf] %v1843_v45  ;;  %s3665_s20 = smov (%p1846_p11, %s1845_s20), 0  ;;  %s1787_s19 = sadd.s32 1, %s2874_s19  }
 0x1da   : >> { %s1848_s23 = smul.u32 104, %s3665_s20  ;;  %p1786_p12 = scmp.ge.s32.totalorder %s1787_s19, %s3506_s29 }
 0x1db   : >> { %s3658_s18 = smov %s3665_s20 }
 0x1dc   : >> { %s1850_s8 = scalar_lea.vmem %s3388_s21, %s1848_s23 [#allocation2]   ;;  %s1851_s24 = scalar_lea.vmem %s3500_s16, %s1848_s23  }
 0x1dd   : > { %1789 = sbr.rel (!%p1786_p12) target bundleno = 456 (0x1c8), region = 139 }
 0x1e2 PF: > { %2802 = sdivrem.u32 %s3663_s12, 26 }
 0x1e3   : > { %s2258_s26 = smul.u32 104, %s3506_s29 }
 0x1e5   : > { %s1856_s27 = scalar_lea.vmem %s3388_s21, %s2258_s26 [#allocation2]   ;;  %s1858_s30 = scalar_lea.vmem %s3500_s16, %s2258_s26  }
 0x1eb   : > { %s2803_s7 = spop.drf %2802 }
 0x1ec   : > { %p2260_p13 = scmp.le.s32.totalorder %s2803_s7, 0 }
 0x1ed   : > { %s2876_s9 = smov (!%p2260_p13), %s1858_s30   ;;  %s2880_s10 = smov (!%p2260_p13), %s1856_s27  }
 0x1ee   : > { %2064 = sbr.rel (%p2260_p13) target bundleno = 507 (0x1fb), region = 144  ;;  %s2884_s11 = smov (!%p2260_p13), 0  }
 0x1ef   : > { %s2888_s13 = smov (!%p2260_p13), 0  }
 0x1f3 LB: >> { %v1868_v23 = vld [vmem:[%s2882_s10] sm:$0xf]  ;;  %s1870_s14 = sadd.s32 1, %s2886_s11  ;;  %s1862_s13 = sadd.s32 1, %s2890_s13   ;;  %s2890_s13 = sphi %s2888_s13, %s1862_s13   ;;  %s2886_s11 = sphi %s2884_s11, %s2885_s11   ;;  %s2882_s10 = sphi %s2880_s10, %s1875_s10   ;;  %s2878_s9 = sphi %s2876_s9, %s1876_s9  }
 0x1f4   : >> { %1869 = vst [vmem:[%s2878_s9] sm:$0xf] %v1868_v23  ;;  %p1871_p0 = scmp.ge.s32.totalorder %s1870_s14, %s2803_s7  ;;  %p1861_p1 = scmp.ge.s32.totalorder %s1862_s13, %s2803_s7 }
 0x1f6   : >> { %s3667_s14 = smov (%p1871_p0, %s1870_s14), 0  ;;  %1864 = sbr.rel (!%p1861_p1) target bundleno = 499 (0x1f3), region = 150 }
 0x1f7   : >> { %s2261_s21 = sshll.u32 %s3667_s14, 2  ;;  %s2885_s11 = smov %s3667_s14  }
 0x1f8   : >> { %s1875_s10 = scalar_lea.vmem %s1856_s27, %s2261_s21 [#allocation2]   ;;  %s1876_s9 = scalar_lea.vmem %s1858_s30, %s2261_s21  }
 0x1fb PF: > { %p13_p2 = scmp.ge.s32.totalorder %s2945_s25, 4   ;;  %s3659_s21 = smov %s2854_s22 }
 0x1fc   : > { %s3660_s22 = smov %s2953_s28  ;;  %s3661_s23 = smov %s2945_s25 }
 0x1fd   :  { %15 = sbr.rel (!%p13_p2) target bundleno = 2 (0x2), region = 161 }

// kernel: encoder_forward.5
= control target key start
LH: loop header
LB: loop body
LE: loop exit
PB: predicated region body
PF: predicated region fallthrough
CT: control target
= control target key end

     0   :  { %s3441_s21 = smov 0   ;;  %s3443_s22 = smov 0   ;;  %s4208_s0 = inlined_call_operand.vmem [shape: bf16[98,600], index: 0, kind: input, shape index: {}]   ;;  %s4209_s1 = inlined_call_operand.vmem [shape: bf16[98,600], index: 1, kind: input, shape index: {}]   ;;  %s4210_s2 = inlined_call_operand.vmem [shape: bf16[98,600], index: 2, kind: input, shape index: {}]   ;;  %s4211_s3 = inlined_call_operand.vmem [shape: bf16[98,600], index: 3, kind: input, shape index: {}]   ;;  %s4212_s4 = inlined_call_operand.vmem [shape: bf16[600,128], index: 4, kind: input, shape index: {}]   ;;  %s4213_s5 = inlined_call_operand.vmem [shape: f32[1,128], index: 5, kind: input, shape index: {}]   ;;  %s4214_s6 = inlined_call_operand.vmem [shape: bf16[98,128], index: 6, kind: output, shape index: {}]  }
   0x1   :  { %s3445_s23 = smov 0  }
   0x2 LB: > { %s3454_s24 = sadd.s32 4294967295, %s3372_s23   ;;  %s3456_s25 = sadd.s32 1, %s3372_s23   ;;  %s3372_s23 = sphi %s3445_s23, %s4228_s23   ;;  %s3368_s22 = sphi %s3443_s22, %s4227_s22   ;;  %s3364_s21 = sphi %s3441_s21, %s4226_s21  }
   0x3   : > { %s166_s26 = ssub.s32 %s3372_s23, %s3456_s25  ;;  %s169_s27 = sadd.s32 1, %s3368_s22 }
   0x4   : > { %p167_p0 = scmp.eq.s32.totalorder %s166_s26, 0  ;;  %p179_p1 = scmp.ne.s32.totalorder %s3368_s22, %s3364_s21 }
   0x5   : > { %p180_p2 = scmp.eq.s32.totalorder %s3454_s24, 1  ;;  %p2431_p3 = scmp.ge.s32.totalorder %s3372_s23, 1 }
   0x6   : > { %s3464_s28 = scalar_select %p167_p0, %s3368_s22, %s169_s27  }
   0x7   : > { %p3466_p4 = por %p180_p2, %p179_p1  ;;  %p290_p5 = scmp.lt.s32.totalorder %s3372_s23, 3 }
   0x9   : > { %p291_p6 = pnand %p2431_p3, %p290_p5 }
   0xb   : > { %294 = sbr.rel (%p291_p6) target bundleno = 492 (0x1ec), region = 44 }
  0x10   : > { %v3473_v0 = vld [vmem:[%s4212_s4 + $0x78] sm:$0xff]   ;;  %v3496_v4 = vld [vmem:[%s4212_s4 + $0x70] sm:$0xff]   ;;  %v3520_v8 = vld [vmem:[%s4212_s4 + $0x68] sm:$0xff]   ;;  %s3559_s18 = sshll.u32 %s3454_s24, 3  ;;  %vm869_vm0 = vcmask 1043456   ;;  %vm856_vm1 = vcmask 719872  }
  0x11   : > { %v3478_v1 = vld [vmem:[%s4212_s4 + $0xf8] sm:$0xff]   ;;  %2635 = vmatprep.subr.bf16.mxu0 %v3473_v0  ;;  %v3502_v5 = vld [vmem:[%s4212_s4 + $0xf0] sm:$0xff]   ;;  %v3526_v9 = vld [vmem:[%s4212_s4 + $0xe8] sm:$0xff]   ;;  %p364_p7 = scmp.lt.s32.totalorder %s3559_s18, 12  ;;  %s355_s13 = sand.u32 1, %s3364_s21  }
  0x12   : > { %v3484_v2 = vld [vmem:[%s4212_s4 + $0x38] sm:$0xff]   ;;  %2675 = vmatprep.subr.bf16.mxu1 %v3478_v1  ;;  %v3508_v6 = vld [vmem:[%s4212_s4 + $0x30] sm:$0xff]   ;;  %v3532_v10 = vld [vmem:[%s4212_s4 + $0x28] sm:$0xff]   ;;  %s2432_s14 = sshll.u32 %s355_s13, 5  ;;  %s2609_s16 = sshll.u32 (%p3466_p4), %s3454_s24, 5 }
  0x13   : > { %v3490_v3 = vld [vmem:[%s4212_s4 + $0xb8] sm:$0xff]   ;;  %2636 = vmatpush3.bf16.msra.mxu0 %v3484_v2  ;;  %v3514_v7 = vld [vmem:[%s4212_s4 + $0xb0] sm:$0xff]   ;;  %v3538_v11 = vld [vmem:[%s4212_s4 + $0xa8] sm:$0xff]   ;;  %s365_s15 = scalar_select %p364_p7, %s3559_s18, 12 }
  0x14   : > { %2676 = vmatpush3.bf16.msra.mxu1 %v3490_v3  ;;  %2637 = vmatprep.subr.bf16.mxu0 %v3496_v4  ;;  %v3544_v12 = vld [vmem:[%s4212_s4 + $0x60] sm:$0xff]   ;;  %v3571_v16 = vld [vmem:[%s4212_s4 + $0x58] sm:$0xff]   ;;  %v3596_v20 = vld [vmem:[%s4212_s4 + $0x50] sm:$0xff]   ;;  %s4116_s21 = scalar_lea.vmem [#allocation2], %s2432_s14  }
  0x15   : > { %2677 = vmatprep.subr.bf16.mxu1 %v3502_v5  ;;  %v3550_v13 = vld [vmem:[%s4212_s4 + $0xe0] sm:$0xff]   ;;  %v3577_v17 = vld [vmem:[%s4212_s4 + $0xd8] sm:$0xff]   ;;  %v3602_v21 = vld [vmem:[%s4212_s4 + $0xd0] sm:$0xff]   ;;  %s3629_s7 = smul.u32 20, %s365_s15  ;;  %s2156_s15 = ssub.s32 (%p3466_p4), 13, %s3559_s18 }
  0x16   : > { %v3556_v14 = vld [vmem:[%s4212_s4 + $0x20] sm:$0xff]   ;;  %v3584_v18 = vld [vmem:[%s4212_s4 + $0x18] sm:$0xff]   ;;  %v3609_v22 = vld [vmem:[%s4212_s4 + $0x10] sm:$0xff]   ;;  %p2157_p8 = scmp.lt.s32.totalorder (%p3466_p4), %s2156_s15, 8 }
  0x17   : > { %2638 = vmatpush3.bf16.msra.mxu0 %v3508_v6  ;;  %v3565_v15 = vld [vmem:[%s4212_s4 + $0xa0] sm:$0xff]   ;;  %v3590_v19 = vld [vmem:[%s4212_s4 + $0x98] sm:$0xff]   ;;  %v3615_v23 = vld [vmem:[%s4212_s4 + $0x90] sm:$0xff]   ;;  %s3659_s19 = scalar_lea.vmem %s4208_s0, %s3629_s7  ;;  %s3735_s23 = scalar_lea.vmem %s4209_s1, %s3629_s7 }
  0x18   : > { %2678 = vmatpush3.bf16.msra.mxu1 %v3514_v7  ;;  %2639 = vmatprep.subr.bf16.mxu0 %v3520_v8  ;;  %v3621_v24 = vld [vmem:[%s4212_s4 + $0x48] sm:$0xff]   ;;  %v3647_v28 = vld [vmem:[%s4212_s4 + $0x40] sm:$0xff]   ;;  %v3706_v42 = vld [vmem:[%s4212_s4 + $0x118] sm:$0xff]   ;;  %s3771_s9 = scalar_lea.vmem %s4210_s2, %s3629_s7  ;;  %s3797_s11 = scalar_lea.vmem %s4211_s3, %s3629_s7 }
  0x19   : > { %2679 = vmatprep.subr.bf16.mxu1 %v3526_v9  ;;  %v3627_v25 = vld [vmem:[%s4212_s4 + $0xc8] sm:$0xff]   ;;  %v3653_v29 = vld [vmem:[%s4212_s4 + $0xc0] sm:$0xff]   ;;  %v3217_v45 = vld [vmem:[%s3659_s19 + $0x5c] ss:$20 sps:$4 sm:$0xff]  }
  0x1a   : > { %v3635_v26 = vld [vmem:[%s4212_s4 + $0x8] sm:$0xff]   ;;  %v3665_v30 = vld [vmem:[%s4212_s4] sm:$0xff]   ;;  %v3718_v46 = vld [vmem:[%s4212_s4 + $0x110] sm:$0xff]  }
  0x1b   : > { %2640 = vmatpush3.bf16.msra.mxu0 %v3532_v10  ;;  %v3641_v27 = vld [vmem:[%s4212_s4 + $0x88] sm:$0xff]   ;;  %v3671_v31 = vld [vmem:[%s4212_s4 + $0x80] sm:$0xff]   ;;  %v3223_v50 = vld [vmem:[%s3659_s19 + $0x7c] ss:$20 sps:$4 sm:$0xff]  }
  0x1c   : > { %2680 = vmatpush3.bf16.msra.mxu1 %v3538_v11  ;;  %2641 = vmatprep.subr.bf16.mxu0 %v3544_v12  ;;  %v3200_v32 = vld [vmem:[%s3659_s19] ss:$20 sps:$4 sm:$0xff]   ;;  %v3202_v33 = vld [vmem:[%s3659_s19 + $0x4] ss:$20 sps:$4 sm:$0xff]   ;;  %v3203_v34 = vld [vmem:[%s3659_s19 + $0x8] ss:$20 sps:$4 sm:$0xff]  }
  0x1d   : > { %2681 = vmatprep.subr.bf16.mxu1 %v3550_v13  ;;  %v3205_v35 = vld [vmem:[%s3659_s19 + $0xc] ss:$20 sps:$4 sm:$0xff]   ;;  %905 = vmatprep.mubr.bf16.mxu0 %v3202_v33  ;;  %v3683_v36 = vld [vmem:[%s4212_s4 + $0x128] ss:$0 sps:$4 sm:$0xff]   ;;  %v3213_v43 = vld [vmem:[%s3659_s19 + $0x30] ss:$20 sps:$4 sm:$0xff]  }
  0x1e   : > { %970 = vmatprep.mubr.bf16.mxu1 %v3205_v35  ;;  %v3688_v37 = vld [vmem:[%s4212_s4 + $0x120] sm:$0xff]   ;;  %v3694_v38 = vsel %vm869_vm0, %v3683_v36, 0  ;;  %v3210_v40 = vld [vmem:[%s3659_s19 + $0x34] ss:$20 sps:$4 sm:$0xff]   ;;  %v3220_v49 = vld [vmem:[%s3659_s19 + $0x58] ss:$20 sps:$4 sm:$0xff]  }
  0x1f   : > { %2642 = vmatpush3.bf16.msra.mxu0 %v3556_v14  ;;  %v3208_v39 = vld [vmem:[%s3659_s19 + $0x2c] ss:$20 sps:$4 sm:$0xff]   ;;  %v3212_v41 = vld [vmem:[%s3659_s19 + $0x28] ss:$20 sps:$4 sm:$0xff]   ;;  %v3219_v47 = vld [vmem:[%s3659_s19 + $0x50] ss:$20 sps:$4 sm:$0xff]  }
  0x20   : > { %2682 = vmatpush3.bf16.msra.mxu1 %v3565_v15  ;;  %2643 = vmatprep.subr.bf16.mxu0 %v3571_v16  ;;  %v3215_v44 = vld [vmem:[%s3659_s19 + $0x54] ss:$20 sps:$4 sm:$0xff]   ;;  %v3225_v51 = vld [vmem:[%s3659_s19 + $0x84] ss:$20 sps:$4 sm:$0xff]   ;;  %v3236_v60 = vld [vmem:[%s3735_s23 + $0x2c] ss:$20 sps:$4 sm:$0xff]  }
  0x21   : > { %2683 = vmatprep.subr.bf16.mxu1 %v3577_v17  ;;  %v3727_v48 = vld [vmem:[%s4212_s4 + $0x108] sm:$0xff]   ;;  %v3746_v52 = vld [vmem:[%s4212_s4 + $0x100] sm:$0xff]  }
  0x22   : > { %v3227_v53 = vld [vmem:[%s3659_s19 + $0x78] ss:$20 sps:$4 sm:$0xff]   ;;  %v3228_v54 = vld [vmem:[%s3659_s19 + $0x80] ss:$20 sps:$4 sm:$0xff]   ;;  %v3230_v55 = vld [vmem:[%s3659_s19 + $0x10] ss:$20 sps:$4 sm:$0xff]  }
  0x23   : > { %2644 = vmatpush3.bf16.msra.mxu0 %v3584_v18  ;;  %v3233_v56 = vld [vmem:[%s3735_s23 + $0x4] ss:$20 sps:$4 sm:$0xff]   ;;  %v3231_v58 = vld [vmem:[%s3735_s23] ss:$20 sps:$4 sm:$0xff]   ;;  %v3238_v61 = vld [vmem:[%s3659_s19 + $0x88] ss:$20 sps:$4 sm:$0xff]  }
  0x24   : > { %2684 = vmatpush3.bf16.msra.mxu1 %v3590_v19  ;;  %2645 = vmatprep.subr.bf16.mxu0 %v3596_v20  ;;  %v3234_v57 = vld [vmem:[%s3659_s19 + $0x38] ss:$20 sps:$4 sm:$0xff]   ;;  %v3235_v59 = vld [vmem:[%s3659_s19 + $0x60] ss:$20 sps:$4 sm:$0xff]   ;;  %v3239_v62 = vld [vmem:[%s3735_s23 + $0x28] ss:$20 sps:$4 sm:$0xff]  }
  0x25   : > { %2685 = vmatprep.subr.bf16.mxu1 %v3602_v21  ;;  %v3240_v63 = vld [vmem:[%s3735_s23 + $0x54] ss:$20 sps:$4 sm:$0xff]   ;;  %v3242_v33 = vld [vmem:[%s3735_s23 + $0x50] ss:$20 sps:$4 sm:$0xff]   ;;  %v3245_v35 = vld [vmem:[%s3735_s23 + $0x78] ss:$20 sps:$4 sm:$0xff]  }
  0x27   : > { %2646 = vmatpush3.bf16.msra.mxu0 %v3609_v22 }
  0x28   : > { %2686 = vmatpush3.bf16.msra.mxu1 %v3615_v23  ;;  %2647 = vmatprep.subr.bf16.mxu0 %v3621_v24 }
  0x29   : > { %2687 = vmatprep.subr.bf16.mxu1 %v3627_v25 }
  0x2b   : > { %2648 = vmatpush3.bf16.msra.mxu0 %v3635_v26 }
  0x2c   : > { %2688 = vmatpush3.bf16.msra.mxu1 %v3641_v27  ;;  %2649 = vmatprep.subr.bf16.mxu0 %v3647_v28 }
  0x2d   : > { %2689 = vmatprep.subr.bf16.mxu1 %v3653_v29 }
  0x2f   : > { %2650 = vmatpush3.bf16.msra.mxu0 %v3665_v30 }
  0x30   : > { %2690 = vmatpush3.bf16.msra.mxu1 %v3671_v31  ;;  %3075 = vmatprep.subr.msk.bf16.mxu0 %vm869_vm0, %v3683_v36 }
  0x31   : > { %2725 = vmatprep.subr.bf16.mxu1 %v3473_v0 }
  0x32   : > { %906 = vmatmul.mubr.bf16.vlgmr.msra.gmra.mxu0 %v3200_v32  ;;  %v3248_v32 = vld [vmem:[%s3735_s23 + $0xc] ss:$20 sps:$4 sm:$0xff]  }
  0x33   : > { %971 = vmatmul.mubr.bf16.vlgmr.msra.gmra.mxu1 %v3203_v34  ;;  %2996 = vmatpush3.bf16.msra.mxu0 %v3694_v38  ;;  %v3243_v34 = vld [vmem:[%s3735_s23 + $0x7c] ss:$20 sps:$4 sm:$0xff]  }
  0x34   : > { %2726 = vmatpush3.bf16.msra.mxu1 %v3484_v2  ;;  %2997 = vmatprep.subr.bf16.mxu0 %v3688_v37 }
  0x35   : > { %2727 = vmatprep.subr.bf16.mxu1 %v3496_v4  ;;  %913 = vmatprep.mubr.bf16.mxu0 %v3208_v39  ;;  %v3249_v39 = vld [vmem:[%s3735_s23 + $0x10] ss:$20 sps:$4 sm:$0xff]  }
  0x36   : > { %978 = vmatprep.mubr.bf16.mxu1 %v3210_v40  ;;  %v3246_v40 = vld [vmem:[%s3735_s23 + $0x8] ss:$20 sps:$4 sm:$0xff]  }
  0x37   : > { %2998 = vmatpush3.bf16.msra.mxu0 %v3688_v37 }
  0x38   : > { %2728 = vmatpush3.bf16.msra.mxu1 %v3508_v6  ;;  %2999 = vmatprep.subr.bf16.mxu0 %v3706_v42 }
  0x39   : > { %2729 = vmatprep.subr.bf16.mxu1 %v3520_v8 }
  0x3a   : > { %914 = vmatmul.mubr.bf16.gmra.mxu0 %v3212_v41  ;;  %v3250_v41 = vld [vmem:[%s3735_s23 + $0x38] ss:$20 sps:$4 sm:$0xff]  }
  0x3b   : > { %979 = vmatmul.mubr.bf16.gmra.mxu1 %v3213_v43  ;;  %921 = vmatprep.mubr.bf16.mxu0 %v3215_v44  ;;  %v3251_v43 = vld [vmem:[%s3735_s23 + $0x34] ss:$20 sps:$4 sm:$0xff]  }
  0x3c   : > { %2730 = vmatpush3.bf16.msra.mxu1 %v3532_v10  ;;  %3000 = vmatpush3.bf16.msra.mxu0 %v3706_v42  ;;  %v3257_v44 = vld [vmem:[%s3735_s23 + $0x60] ss:$20 sps:$4 sm:$0xff]  }
  0x3d   : > { %2731 = vmatprep.subr.bf16.mxu1 %v3544_v12  ;;  %986 = vmatprep.mubr.bf16.mxu1 %v3217_v45  ;;  %v3253_v45 = vld [vmem:[%s3735_s23 + $0x30] ss:$20 sps:$4 sm:$0xff]  }
  0x3e   : > { %3001 = vmatprep.subr.bf16.mxu0 %v3718_v46 }
  0x40   : > { %2732 = vmatpush3.bf16.msra.mxu1 %v3556_v14  ;;  %3002 = vmatpush3.bf16.msra.mxu0 %v3718_v46 }
  0x41   : > { %2733 = vmatprep.subr.bf16.mxu1 %v3571_v16  ;;  %3003 = vmatprep.subr.bf16.mxu0 %v3727_v48 }
  0x42   : > { %922 = vmatmul.mubr.bf16.gmra.mxu0 %v3219_v47  ;;  %v3254_v47 = vld [vmem:[%s3735_s23 + $0x5c] ss:$20 sps:$4 sm:$0xff]  }
  0x43   : > { %987 = vmatmul.mubr.bf16.gmra.mxu1 %v3220_v49  ;;  %929 = vmatprep.mubr.bf16.mxu0 %v3223_v50  ;;  %v3258_v49 = vld [vmem:[%s3735_s23 + $0x88] ss:$20 sps:$4 sm:$0xff]   ;;  %v3267_v50 = vld [vmem:[%s3771_s9 + $0xc] ss:$20 sps:$4 sm:$0xff]  }
  0x44   : > { %2734 = vmatpush3.bf16.msra.mxu1 %v3584_v18  ;;  %994 = vmatprep.mubr.bf16.mxu1 %v3225_v51  ;;  %v3256_v51 = vld [vmem:[%s3735_s23 + $0x58] ss:$20 sps:$4 sm:$0xff]  }
  0x45   : > { %2735 = vmatprep.subr.bf16.mxu1 %v3596_v20  ;;  %3004 = vmatpush3.bf16.msra.mxu0 %v3727_v48 }
  0x46   : > { %3005 = vmatprep.subr.bf16.mxu0 %v3746_v52 }
  0x48   : > { %2736 = vmatpush3.bf16.msra.mxu1 %v3609_v22 }
  0x49   : > { %2737 = vmatprep.subr.bf16.mxu1 %v3621_v24  ;;  %3006 = vmatpush3.bf16.msra.mxu0 %v3746_v52 }
  0x4a   : > { %930 = vmatmul.mubr.bf16.gmra.mxu0 %v3227_v53  ;;  %2765 = vmatprep.subr.bf16.mxu0 %v3478_v1  ;;  %v3259_v53 = vld [vmem:[%s3735_s23 + $0x84] ss:$20 sps:$4 sm:$0xff]  }
  0x4b   : > { %995 = vmatmul.mubr.bf16.gmra.mxu1 %v3228_v54  ;;  %3007 = vmatprep.mubr.msk.bf16.mxu0 %vm856_vm1, %v3230_v55  ;;  %v3261_v54 = vld [vmem:[%s3735_s23 + $0x80] ss:$20 sps:$4 sm:$0xff]   ;;  %v3264_v55 = vld [vmem:[%s3771_s9 + $0x4] ss:$20 sps:$4 sm:$0xff]   ;;  %s4154_s23 = scalar_lea.vmem (%p3466_p4), %s4214_s6, %s2609_s16  }
  0x4c   : > { %2738 = vmatpush3.bf16.msra.mxu1 %v3635_v26  ;;  %1236 = vmatprep.mubr.bf16.mxu1 %v3233_v56  ;;  %v3262_v56 = vld [vmem:[%s3771_s9] ss:$20 sps:$4 sm:$0xff]  }
  0x4d   : > { %2739 = vmatprep.subr.bf16.mxu1 %v3647_v28 }
  0x50   : > { %2740 = vmatpush3.bf16.msra.mxu1 %v3665_v30 }
  0x51   : > { %3076 = vmatprep.subr.msk.bf16.mxu1 %vm869_vm0, %v3683_v36 }
  0x52   : > { %3008 = vmatmul.mubr.msk.bf16.vlgmr.msra.gmra.mxu0 %vm856_vm1, %v3234_v57  ;;  %v3265_v57 = vld [vmem:[%s3771_s9 + $0x8] ss:$20 sps:$4 sm:$0xff]  }
  0x53   : > { %1237 = vmatmul.mubr.bf16.vlgmr.msra.gmra.mxu1 %v3231_v58  ;;  %2766 = vmatpush3.bf16.msra.mxu0 %v3490_v3  ;;  %v3268_v58 = vld [vmem:[%s3771_s9 + $0x2c] ss:$20 sps:$4 sm:$0xff]  }
  0x54   : > { %2767 = vmatprep.subr.bf16.mxu0 %v3502_v5  ;;  %3011 = vmatprep.mubr.msk.bf16.mxu0 %vm856_vm1, %v3235_v59  ;;  %v3270_v59 = vld [vmem:[%s3771_s9 + $0x34] ss:$20 sps:$4 sm:$0xff]  }
  0x55   : > { %1244 = vmatprep.mubr.bf16.mxu1 %v3236_v60  ;;  %3016 = vmatpush3.bf16.msra.mxu1 %v3694_v38  ;;  %v3272_v60 = vld [vmem:[%s3771_s9 + $0x28] ss:$20 sps:$4 sm:$0xff]  }
  0x56   : > { %3017 = vmatprep.subr.bf16.mxu1 %v3688_v37 }
  0x57   : > { %2768 = vmatpush3.bf16.msra.mxu0 %v3514_v7 }
  0x58   : > { %2769 = vmatprep.subr.bf16.mxu0 %v3526_v9 }
  0x59   : > { %3018 = vmatpush3.bf16.msra.mxu1 %v3688_v37 }
  0x5a   : > { %3012 = vmatmul.mubr.msk.bf16.gmra.mxu0 %vm856_vm1, %v3238_v61  ;;  %3019 = vmatprep.subr.bf16.mxu1 %v3706_v42  ;;  %v3274_v61 = vld [vmem:[%s3771_s9 + $0x54] ss:$20 sps:$4 sm:$0xff]  }
  0x5b   : > { %1245 = vmatmul.mubr.bf16.gmra.mxu1 %v3239_v62  ;;  %2770 = vmatpush3.bf16.msra.mxu0 %v3538_v11  ;;  %v3286_v62 = vld [vmem:[%s3771_s9 + $0x10] ss:$20 sps:$4 sm:$0xff]  }
  0x5c   : > { %2771 = vmatprep.subr.bf16.mxu0 %v3550_v13  ;;  %1252 = vmatprep.mubr.bf16.mxu1 %v3240_v63 }
  0x5d   : > { %3020 = vmatpush3.bf16.msra.mxu1 %v3706_v42  ;;  %1301 = vmatprep.mubr.bf16.mxu0 %v3248_v32 }
  0x5e   : > { %3021 = vmatprep.subr.bf16.mxu1 %v3718_v46 }
  0x5f   : > { %2772 = vmatpush3.bf16.msra.mxu0 %v3565_v15 }
  0x60   : > { %2773 = vmatprep.subr.bf16.mxu0 %v3577_v17 }
  0x61   : > { %3022 = vmatpush3.bf16.msra.mxu1 %v3718_v46 }
  0x62   : > { %3023 = vmatprep.subr.bf16.mxu1 %v3727_v48 }
  0x63   : > { %1253 = vmatmul.mubr.bf16.gmra.mxu1 %v3242_v33  ;;  %2774 = vmatpush3.bf16.msra.mxu0 %v3590_v19 }
  0x64   : > { %2775 = vmatprep.subr.bf16.mxu0 %v3602_v21  ;;  %1260 = vmatprep.mubr.bf16.mxu1 %v3243_v34 }
  0x65   : > { %3024 = vmatpush3.bf16.msra.mxu1 %v3727_v48 }
  0x66   : > { %3025 = vmatprep.subr.bf16.mxu1 %v3746_v52 }
  0x67   : > { %2776 = vmatpush3.bf16.msra.mxu0 %v3615_v23 }
  0x68   : > { %2777 = vmatprep.subr.bf16.mxu0 %v3627_v25 }
  0x69   : > { %3026 = vmatpush3.bf16.msra.mxu1 %v3746_v52 }
  0x6a   : > { %2855 = vmatprep.subr.bf16.mxu1 %v3478_v1 }
  0x6b   : > { %1261 = vmatmul.mubr.bf16.gmra.mxu1 %v3245_v35  ;;  %2778 = vmatpush3.bf16.msra.mxu0 %v3641_v27 }
  0x6c   : > { %2779 = vmatprep.subr.bf16.mxu0 %v3653_v29  ;;  %3027 = vmatprep.mubr.msk.bf16.mxu1 %vm856_vm1, %v3249_v39 }
  0x6f   : > { %2780 = vmatpush3.bf16.msra.mxu0 %v3671_v31 }
  0x70   : > { %2815 = vmatprep.subr.bf16.mxu0 %v3473_v0 }
  0x72   : > { %1302 = vmatmul.mubr.bf16.vlgmr.msra.gmra.mxu0 %v3246_v40 }
  0x73   : > { %3028 = vmatmul.mubr.msk.bf16.vlgmr.msra.gmra.mxu1 %vm856_vm1, %v3250_v41  ;;  %2816 = vmatpush3.bf16.msra.mxu0 %v3484_v2 }
  0x74   : > { %2856 = vmatpush3.bf16.msra.mxu1 %v3490_v3  ;;  %2817 = vmatprep.subr.bf16.mxu0 %v3496_v4 }
  0x75   : > { %2857 = vmatprep.subr.bf16.mxu1 %v3502_v5  ;;  %1309 = vmatprep.mubr.bf16.mxu0 %v3251_v43 }
  0x76   : > { %3031 = vmatprep.mubr.msk.bf16.mxu1 %vm856_vm1, %v3257_v44 }
  0x77   : > { %2818 = vmatpush3.bf16.msra.mxu0 %v3508_v6 }
  0x78   : > { %2858 = vmatpush3.bf16.msra.mxu1 %v3514_v7  ;;  %2819 = vmatprep.subr.bf16.mxu0 %v3520_v8 }
  0x79   : > { %2859 = vmatprep.subr.bf16.mxu1 %v3526_v9 }
  0x7a   : > { %1310 = vmatmul.mubr.bf16.gmra.mxu0 %v3253_v45 }
  0x7b   : > { %2820 = vmatpush3.bf16.msra.mxu0 %v3532_v10  ;;  %1317 = vmatprep.mubr.bf16.mxu0 %v3254_v47 }
  0x7c   : > { %2860 = vmatpush3.bf16.msra.mxu1 %v3538_v11  ;;  %2821 = vmatprep.subr.bf16.mxu0 %v3544_v12 }
  0x7d   : > { %2861 = vmatprep.subr.bf16.mxu1 %v3550_v13  ;;  %3032 = vmatmul.mubr.msk.bf16.gmra.mxu1 %vm856_vm1, %v3258_v49 }
  0x7e   : > { %1640 = vmatprep.mubr.bf16.mxu1 %v3267_v50 }
  0x7f   : > { %2822 = vmatpush3.bf16.msra.mxu0 %v3556_v14 }
  0x80   : > { %2862 = vmatpush3.bf16.msra.mxu1 %v3565_v15  ;;  %2823 = vmatprep.subr.bf16.mxu0 %v3571_v16 }
  0x81   : > { %2863 = vmatprep.subr.bf16.mxu1 %v3577_v17 }
  0x82   : > { %1318 = vmatmul.mubr.bf16.gmra.mxu0 %v3256_v51 }
  0x83   : > { %2824 = vmatpush3.bf16.msra.mxu0 %v3584_v18  ;;  %1325 = vmatprep.mubr.bf16.mxu0 %v3259_v53 }
  0x84   : > { %2864 = vmatpush3.bf16.msra.mxu1 %v3590_v19  ;;  %2825 = vmatprep.subr.bf16.mxu0 %v3596_v20 }
  0x85   : > { %2865 = vmatprep.subr.bf16.mxu1 %v3602_v21 }
  0x87   : > { %2826 = vmatpush3.bf16.msra.mxu0 %v3609_v22 }
  0x88   : > { %2866 = vmatpush3.bf16.msra.mxu1 %v3615_v23  ;;  %2827 = vmatprep.subr.bf16.mxu0 %v3621_v24 }
  0x89   : > { %2867 = vmatprep.subr.bf16.mxu1 %v3627_v25 }
  0x8a   : > { %1326 = vmatmul.mubr.bf16.gmra.mxu0 %v3261_v54 }
  0x8b   : > { %2828 = vmatpush3.bf16.msra.mxu0 %v3635_v26  ;;  %1575 = vmatprep.mubr.bf16.mxu0 %v3264_v55 }
  0x8c   : > { %2868 = vmatpush3.bf16.msra.mxu1 %v3641_v27  ;;  %2829 = vmatprep.subr.bf16.mxu0 %v3647_v28 }
  0x8d   : > { %2869 = vmatprep.subr.bf16.mxu1 %v3653_v29 }
  0x8f   : > { %2830 = vmatpush3.bf16.msra.mxu0 %v3665_v30 }
  0x90   : > { %2870 = vmatpush3.bf16.msra.mxu1 %v3671_v31  ;;  %3077 = vmatprep.subr.msk.bf16.mxu0 %vm869_vm0, %v3683_v36 }
  0x91   : > { %2905 = vmatprep.subr.bf16.mxu1 %v3473_v0  ;;  %v3273_v0 = vld [vmem:[%s3771_s9 + $0x30] ss:$20 sps:$4 sm:$0xff]  }
  0x92   : > { %1576 = vmatmul.mubr.bf16.vlgmr.msra.gmra.mxu0 %v3262_v56 }
  0x93   : > { %1641 = vmatmul.mubr.bf16.vlgmr.msra.gmra.mxu1 %v3265_v57  ;;  %3036 = vmatpush3.bf16.msra.mxu0 %v3694_v38 }
  0x94   : > { %2906 = vmatpush3.bf16.msra.mxu1 %v3484_v2  ;;  %3037 = vmatprep.subr.bf16.mxu0 %v3688_v37  ;;  %v3276_v2 = vld [vmem:[%s3771_s9 + $0x5c] ss:$20 sps:$4 sm:$0xff]  }
  0x95   : > { %1583 = vmatprep.mubr.bf16.mxu0 %v3268_v58  ;;  %1648 = vmatprep.mubr.bf16.mxu1 %v3270_v59 }
  0x96   : > { %2907 = vmatprep.subr.bf16.mxu1 %v3496_v4  ;;  %v3278_v4 = vld [vmem:[%s3771_s9 + $0x50] ss:$20 sps:$4 sm:$0xff]  }
  0x97   : > { %3038 = vmatpush3.bf16.msra.mxu0 %v3688_v37 }
  0x98   : > { %2908 = vmatpush3.bf16.msra.mxu1 %v3508_v6  ;;  %3039 = vmatprep.subr.bf16.mxu0 %v3706_v42  ;;  %v3279_v6 = vld [vmem:[%s3771_s9 + $0x58] ss:$20 sps:$4 sm:$0xff]  }
  0x99   : > { %2909 = vmatprep.subr.bf16.mxu1 %v3520_v8  ;;  %v3280_v8 = vld [vmem:[%s3771_s9 + $0x7c] ss:$20 sps:$4 sm:$0xff]  }
  0x9a   : > { %1584 = vmatmul.mubr.bf16.gmra.mxu0 %v3272_v60 }
  0x9b   : > { %1649 = vmatmul.mubr.bf16.gmra.mxu1 %v3273_v0  ;;  %3040 = vmatpush3.bf16.msra.mxu0 %v3706_v42 }
  0x9c   : > { %2910 = vmatpush3.bf16.msra.mxu1 %v3532_v10  ;;  %1591 = vmatprep.mubr.bf16.mxu0 %v3274_v61  ;;  %v3282_v10 = vld [vmem:[%s3771_s9 + $0x84] ss:$20 sps:$4 sm:$0xff]  }
  0x9d   : > { %1656 = vmatprep.mubr.bf16.mxu1 %v3276_v2  ;;  %2911 = vmatprep.subr.bf16.mxu1 %v3544_v12  ;;  %v3284_v12 = vld [vmem:[%s3771_s9 + $0x78] ss:$20 sps:$4 sm:$0xff]  }
  0x9e   : > { %3041 = vmatprep.subr.bf16.mxu0 %v3718_v46 }
  0x9f   : > { %3042 = vmatpush3.bf16.msra.mxu0 %v3718_v46 }
  0xa0   : > { %2912 = vmatpush3.bf16.msra.mxu1 %v3556_v14  ;;  %3043 = vmatprep.subr.bf16.mxu0 %v3727_v48  ;;  %v3285_v14 = vld [vmem:[%s3771_s9 + $0x80] ss:$20 sps:$4 sm:$0xff]  }
  0xa1   : > { %2913 = vmatprep.subr.bf16.mxu1 %v3571_v16  ;;  %v3290_v16 = vld [vmem:[%s3797_s11 + $0x4] ss:$20 sps:$4 sm:$0xff]  }
  0xa2   : > { %1592 = vmatmul.mubr.bf16.gmra.mxu0 %v3278_v4 }
  0xa3   : > { %1657 = vmatmul.mubr.bf16.gmra.mxu1 %v3279_v6  ;;  %1599 = vmatprep.mubr.bf16.mxu0 %v3280_v8 }
  0xa4   : > { %2914 = vmatpush3.bf16.msra.mxu1 %v3584_v18  ;;  %1664 = vmatprep.mubr.bf16.mxu1 %v3282_v10  ;;  %v3287_v18 = vld [vmem:[%s3771_s9 + $0x38] ss:$20 sps:$4 sm:$0xff]  }
  0xa5   : > { %3044 = vmatpush3.bf16.msra.mxu0 %v3727_v48  ;;  %2915 = vmatprep.subr.bf16.mxu1 %v3596_v20  ;;  %v3288_v20 = vld [vmem:[%s3797_s11] ss:$20 sps:$4 sm:$0xff]  }
  0xa6   : > { %3045 = vmatprep.subr.bf16.mxu0 %v3746_v52 }
  0xa8   : > { %2916 = vmatpush3.bf16.msra.mxu1 %v3609_v22  ;;  %v3291_v22 = vld [vmem:[%s3771_s9 + $0x60] ss:$20 sps:$4 sm:$0xff]  }
  0xa9   : > { %2917 = vmatprep.subr.bf16.mxu1 %v3621_v24  ;;  %3046 = vmatpush3.bf16.msra.mxu0 %v3746_v52  ;;  %v3293_v24 = vld [vmem:[%s3797_s11 + $0x2c] ss:$20 sps:$4 sm:$0xff]  }
  0xaa   : > { %1600 = vmatmul.mubr.bf16.gmra.mxu0 %v3284_v12  ;;  %2945 = vmatprep.subr.bf16.mxu0 %v3478_v1  ;;  %v3292_v1 = vld [vmem:[%s3771_s9 + $0x88] ss:$20 sps:$4 sm:$0xff]  }
  0xab   : > { %1665 = vmatmul.mubr.bf16.gmra.mxu1 %v3285_v14  ;;  %3047 = vmatprep.mubr.msk.bf16.mxu0 %vm856_vm1, %v3286_v62 }
  0xac   : > { %2918 = vmatpush3.bf16.msra.mxu1 %v3635_v26  ;;  %1914 = vmatprep.mubr.bf16.mxu1 %v3290_v16  ;;  %v3295_v26 = vld [vmem:[%s3797_s11 + $0x28] ss:$20 sps:$4 sm:$0xff]  }
  0xad   : > { %2919 = vmatprep.subr.bf16.mxu1 %v3647_v28  ;;  %v3296_v28 = vld [vmem:[%s3797_s11 + $0x54] ss:$20 sps:$4 sm:$0xff]  }
  0xb0   : > { %2920 = vmatpush3.bf16.msra.mxu1 %v3665_v30  ;;  %v3317_v30 = vld [vmem:[%s3797_s11 + $0x80] ss:$20 sps:$4 sm:$0xff]  }
  0xb1   : > { %3078 = vmatprep.subr.msk.bf16.mxu1 %vm869_vm0, %v3683_v36 }
  0xb2   : > { %3048 = vmatmul.mubr.msk.bf16.vlgmr.msra.gmra.mxu0 %vm856_vm1, %v3287_v18 }
  0xb3   : > { %2946 = vmatpush3.bf16.msra.mxu0 %v3490_v3  ;;  %1915 = vmatmul.mubr.bf16.vlgmr.msra.gmra.mxu1 %v3288_v20  ;;  %v3304_v3 = vld [vmem:[%s3797_s11 + $0xc] ss:$20 sps:$4 sm:$0xff]  }
  0xb4   : > { %2947 = vmatprep.subr.bf16.mxu0 %v3502_v5  ;;  %3051 = vmatprep.mubr.msk.bf16.mxu0 %vm856_vm1, %v3291_v22  ;;  %v3298_v5 = vld [vmem:[%s3797_s11 + $0x50] ss:$20 sps:$4 sm:$0xff]  }
  0xb5   : > { %1922 = vmatprep.mubr.bf16.mxu1 %v3293_v24  ;;  %3056 = vmatpush3.bf16.msra.mxu1 %v3694_v38 }
  0xb6   : > { %3057 = vmatprep.subr.bf16.mxu1 %v3688_v37 }
  0xb7   : > { %2948 = vmatpush3.bf16.msra.mxu0 %v3514_v7  ;;  %v3299_v7 = vld [vmem:[%s3797_s11 + $0x7c] ss:$20 sps:$4 sm:$0xff]  }
  0xb8   : > { %2949 = vmatprep.subr.bf16.mxu0 %v3526_v9  ;;  %v3301_v9 = vld [vmem:[%s3797_s11 + $0x78] ss:$20 sps:$4 sm:$0xff]  }
  0xb9   : > { %3058 = vmatpush3.bf16.msra.mxu1 %v3688_v37 }
  0xba   : > { %3052 = vmatmul.mubr.msk.bf16.gmra.mxu0 %vm856_vm1, %v3292_v1  ;;  %3059 = vmatprep.subr.bf16.mxu1 %v3706_v42 }
  0xbb   : > { %2950 = vmatpush3.bf16.msra.mxu0 %v3538_v11  ;;  %1923 = vmatmul.mubr.bf16.gmra.mxu1 %v3295_v26  ;;  %v3305_v11 = vld [vmem:[%s3797_s11 + $0x10] ss:$20 sps:$4 sm:$0xff]  }
  0xbc   : > { %2951 = vmatprep.subr.bf16.mxu0 %v3550_v13  ;;  %1930 = vmatprep.mubr.bf16.mxu1 %v3296_v28  ;;  %v3302_v13 = vld [vmem:[%s3797_s11 + $0x8] ss:$20 sps:$4 sm:$0xff]  }
  0xbd   : > { %3060 = vmatpush3.bf16.msra.mxu1 %v3706_v42  ;;  %1979 = vmatprep.mubr.bf16.mxu0 %v3304_v3 }
  0xbe   : > { %3061 = vmatprep.subr.bf16.mxu1 %v3718_v46 }
  0xbf   : > { %2952 = vmatpush3.bf16.msra.mxu0 %v3565_v15  ;;  %v3306_v15 = vld [vmem:[%s3797_s11 + $0x38] ss:$20 sps:$4 sm:$0xff]  }
  0xc0   : > { %2953 = vmatprep.subr.bf16.mxu0 %v3577_v17  ;;  %v3307_v17 = vld [vmem:[%s3797_s11 + $0x34] ss:$20 sps:$4 sm:$0xff]  }
  0xc1   : > { %3062 = vmatpush3.bf16.msra.mxu1 %v3718_v46 }
  0xc2   : > { %3063 = vmatprep.subr.bf16.mxu1 %v3727_v48 }
  0xc3   : > { %2954 = vmatpush3.bf16.msra.mxu0 %v3590_v19  ;;  %1931 = vmatmul.mubr.bf16.gmra.mxu1 %v3298_v5  ;;  %v3313_v19 = vld [vmem:[%s3797_s11 + $0x60] ss:$20 sps:$4 sm:$0xff]  }
  0xc4   : > { %2955 = vmatprep.subr.bf16.mxu0 %v3602_v21  ;;  %1938 = vmatprep.mubr.bf16.mxu1 %v3299_v7  ;;  %v3309_v21 = vld [vmem:[%s3797_s11 + $0x30] ss:$20 sps:$4 sm:$0xff]  }
  0xc5   : > { %3064 = vmatpush3.bf16.msra.mxu1 %v3727_v48 }
  0xc6   : > { %3065 = vmatprep.subr.bf16.mxu1 %v3746_v52 }
  0xc7   : > { %2956 = vmatpush3.bf16.msra.mxu0 %v3615_v23  ;;  %v3310_v23 = vld [vmem:[%s3797_s11 + $0x5c] ss:$20 sps:$4 sm:$0xff]  }
  0xc8   : > { %2957 = vmatprep.subr.bf16.mxu0 %v3627_v25  ;;  %v3314_v25 = vld [vmem:[%s3797_s11 + $0x88] ss:$20 sps:$4 sm:$0xff]  }
  0xc9   : > { %3066 = vmatpush3.bf16.msra.mxu1 %v3746_v52 }
  0xcb   : > { %2958 = vmatpush3.bf16.msra.mxu0 %v3641_v27  ;;  %1939 = vmatmul.mubr.bf16.gmra.mxu1 %v3301_v9  ;;  %v3312_v27 = vld [vmem:[%s3797_s11 + $0x58] ss:$20 sps:$4 sm:$0xff]  }
  0xcc   : > { %2959 = vmatprep.subr.bf16.mxu0 %v3653_v29  ;;  %3067 = vmatprep.mubr.msk.bf16.mxu1 %vm856_vm1, %v3305_v11  ;;  %v3315_v29 = vld [vmem:[%s3797_s11 + $0x84] ss:$20 sps:$4 sm:$0xff]  }
  0xcf   : > { %2960 = vmatpush3.bf16.msra.mxu0 %v3671_v31 }
  0xd2   : > { %1980 = vmatmul.mubr.bf16.vlgmr.msra.gmra.mxu0 %v3302_v13 }
  0xd3   : > { %3068 = vmatmul.mubr.msk.bf16.vlgmr.msra.gmra.mxu1 %vm856_vm1, %v3306_v15  ;;  %1987 = vmatprep.mubr.bf16.mxu0 %v3307_v17 }
  0xd4   : > { %3071 = vmatprep.mubr.msk.bf16.mxu1 %vm856_vm1, %v3313_v19 }
  0xda   : > { %1988 = vmatmul.mubr.bf16.gmra.mxu0 %v3309_v21 }
  0xdb   : > { %1995 = vmatprep.mubr.bf16.mxu0 %v3310_v23  ;;  %3072 = vmatmul.mubr.msk.bf16.gmra.mxu1 %vm856_vm1, %v3314_v25 }
  0xe2   : > { %1996 = vmatmul.mubr.bf16.gmra.mxu0 %v3312_v27 }
  0xe3   : > { %2003 = vmatprep.mubr.bf16.mxu0 %v3315_v29 }
  0xea   : > { %2004 = vmatmul.mubr.bf16.gmra.mxu0 %v3317_v30 }
  0xf2   : > { %v2651_v31 = vpop.f32.mrf.mxu0 }
  0xf3   : > { %v2691_v36 = vpop.f32.mrf.mxu1 }
  0xf4   : > { %v2652_v37 = vpop.f32.mrf.mxu0 }
  0xf5   : > { %v2653_v38 = vadd.f32 %v2652_v37, %v2651_v31  ;;  %v2692_v42 = vpop.f32.mrf.mxu1 }
  0xf6   : > { %v2693_v46 = vadd.f32 %v2692_v42, %v2691_v36  ;;  %v2654_v48 = vpop.f32.mrf.mxu0 }
  0xf7   : > { %v2694_v52 = vpop.f32.mrf.mxu1 }
  0xf8   : > { %v2655_v63 = vpop.f32.mrf.mxu0  ;;  %v973_v32 = vadd.f32 %v2693_v46, %v2653_v38 }
  0xf9   : > { %v2656_v33 = vadd.f32 %v2655_v63, %v2654_v48  ;;  %v2695_v34 = vpop.f32.mrf.mxu1 }
  0xfa   : > { %v2696_v35 = vadd.f32 %v2695_v34, %v2694_v52  ;;  %v2657_v39 = vpop.f32.mrf.mxu0 }
  0xfb   : > { %v2697_v40 = vpop.f32.mrf.mxu1 }
  0xfc   : > { %v2658_v41 = vpop.f32.mrf.mxu0  ;;  %v976_v43 = vadd.f32 %v2696_v35, %v2656_v33 }
  0xfd   : > { %v2659_v44 = vadd.f32 %v2658_v41, %v2657_v39  ;;  %v2698_v45 = vpop.f32.mrf.mxu1 }
  0xfe   : > { %v2699_v47 = vadd.f32 %v2698_v45, %v2697_v40  ;;  %v2660_v49 = vpop.f32.mrf.mxu0 }
  0xff   : > { %v2700_v50 = vpop.f32.mrf.mxu1 }
 0x100   : > { %v2661_v51 = vpop.f32.mrf.mxu0  ;;  %v981_v53 = vadd.f32 %v2699_v47, %v2659_v44 }
 0x101   : > { %v2662_v54 = vadd.f32 %v2661_v51, %v2660_v49  ;;  %v2701_v55 = vpop.f32.mrf.mxu1 }
 0x102   : > { %v2702_v56 = vadd.f32 %v2701_v55, %v2700_v50  ;;  %v2663_v57 = vpop.f32.mrf.mxu0 }
 0x103   : > { %v2703_v58 = vpop.f32.mrf.mxu1 }
 0x104   : > { %v2664_v59 = vpop.f32.mrf.mxu0  ;;  %v984_v60 = vadd.f32 %v2702_v56, %v2662_v54 }
 0x105   : > { %v2665_v0 = vadd.f32 %v2664_v59, %v2663_v57  ;;  %v2704_v61 = vpop.f32.mrf.mxu1 }
 0x106   : > { %v2705_v2 = vadd.f32 %v2704_v61, %v2703_v58  ;;  %v2666_v4 = vpop.f32.mrf.mxu0 }
 0x107   : > { %v2706_v6 = vpop.f32.mrf.mxu1 }
 0x108   : > { %v2667_v8 = vpop.f32.mrf.mxu0  ;;  %v989_v10 = vadd.f32 %v2705_v2, %v2665_v0 }
 0x109   : > { %v2668_v12 = vadd.f32 %v2667_v8, %v2666_v4  ;;  %v2707_v14 = vpop.f32.mrf.mxu1 }
 0x10a   : > { %v2708_v62 = vadd.f32 %v2707_v14, %v2706_v6  ;;  %v2669_v16 = vpop.f32.mrf.mxu0 }
 0x10b   : > { %v2709_v18 = vpop.f32.mrf.mxu1 }
 0x10c   : > { %v2670_v20 = vpop.f32.mrf.mxu0  ;;  %v992_v22 = vadd.f32 %v2708_v62, %v2668_v12 }
 0x10d   : > { %v2671_v24 = vadd.f32 %v2670_v20, %v2669_v16  ;;  %v2710_v1 = vpop.f32.mrf.mxu1 }
 0x10e   : > { %v2711_v26 = vadd.f32 %v2710_v1, %v2709_v18  ;;  %v2672_v28 = vpop.f32.mrf.mxu0 }
 0x10f   : > { %v2712_v3 = vpop.f32.mrf.mxu1 }
 0x110   : > { %v2673_v5 = vpop.f32.mrf.mxu0  ;;  %v997_v7 = vadd.f32 %v2711_v26, %v2671_v24 }
 0x111   : > { %v2674_v9 = vadd.f32 %v2673_v5, %v2672_v28  ;;  %v2713_v11 = vpop.f32.mrf.mxu1 }
 0x112   : > { %v2714_v13 = vadd.f32 %v2713_v11, %v2712_v3  ;;  %v3009_v15 = vpop.f32.mrf.mxu0 }
 0x113   : > { %v3971_v17 = vadd.f32 %v3009_v15, %v981_v53  ;;  %v2741_v19 = vpop.f32.mrf.mxu1 }
 0x114   : > { %v1037_v21 = vpop.f32.mrf.mxu0  ;;  %v1000_v23 = vadd.f32 %v2714_v13, %v2674_v9 }
 0x115   : > { %v3973_v25 = vadd.f32 %v1037_v21, %v973_v32  ;;  %v2742_v27 = vpop.f32.mrf.mxu1 }
 0x116   : > { %v3010_v29 = vpop.f32.mrf.mxu0  ;;  %v2743_v30 = vadd.f32 %v2742_v27, %v2741_v19 }
 0x117   : > { %v3975_v31 = vadd.f32 %v3010_v29, %v984_v60  ;;  %v2744_v36 = vpop.f32.mrf.mxu1 }
 0x118   : > { %v1040_v37 = vpop.f32.mrf.mxu0 }
 0x119   : > { %v3977_v38 = vadd.f32 %v1040_v37, %v976_v43  ;;  %v2745_v42 = vpop.f32.mrf.mxu1 }
 0x11a   : > { %v3013_v46 = vpop.f32.mrf.mxu0  ;;  %v2746_v48 = vadd.f32 %v2745_v42, %v2744_v36 }
 0x11b   : > { %v3979_v52 = vadd.f32 %v3013_v46, %v997_v7  ;;  %v2747_v63 = vpop.f32.mrf.mxu1 }
 0x11c   : > { %v1053_v33 = vpop.f32.mrf.mxu0 }
 0x11d   : > { %v3981_v34 = vadd.f32 %v1053_v33, %v989_v10  ;;  %v2748_v32 = vpop.f32.mrf.mxu1 }
 0x11e   : > { %v3014_v35 = vpop.f32.mrf.mxu0  ;;  %v2749_v39 = vadd.f32 %v2748_v32, %v2747_v63 }
 0x11f   : > { %v3983_v40 = vadd.f32 %v3014_v35, %v1000_v23  ;;  %v2750_v41 = vpop.f32.mrf.mxu1 }
 0x120   : > { %v1056_v44 = vpop.f32.mrf.mxu0 }
 0x121   : > { %v3985_v45 = vadd.f32 %v1056_v44, %v992_v22  ;;  %v2751_v43 = vpop.f32.mrf.mxu1 }
 0x122   : > { %v2752_v47 = vadd.f32 %v2751_v43, %v2750_v41 }
 0x123   : > { %v2753_v49 = vpop.f32.mrf.mxu1 }
 0x125   : > { %v2754_v50 = vpop.f32.mrf.mxu1 }
 0x126   : > { %v2755_v51 = vadd.f32 %v2754_v50, %v2753_v49 }
 0x127   : > { %v2756_v53 = vpop.f32.mrf.mxu1 }
 0x129   : > { %v2757_v54 = vpop.f32.mrf.mxu1 }
 0x12a   : > { %v2758_v55 = vadd.f32 %v2757_v54, %v2756_v53 }
 0x12b   : > { %v2759_v56 = vpop.f32.mrf.mxu1 }
 0x12d   : > { %v2760_v57 = vpop.f32.mrf.mxu1 }
 0x12e   : > { %v2761_v58 = vadd.f32 %v2760_v57, %v2759_v56 }
 0x12f   : > { %v2762_v59 = vpop.f32.mrf.mxu1 }
 0x131   : > { %v2763_v60 = vpop.f32.mrf.mxu1 }
 0x132   : > { %v2781_v0 = vpop.f32.mrf.mxu0  ;;  %v2764_v61 = vadd.f32 %v2763_v60, %v2762_v59 }
 0x133   : > { %v3029_v2 = vpop.f32.mrf.mxu1 }
 0x134   : > { %v2782_v4 = vpop.f32.mrf.mxu0 }
 0x135   : > { %v2783_v6 = vadd.f32 %v2782_v4, %v2781_v0  ;;  %v1368_v8 = vpop.f32.mrf.mxu1 }
 0x136   : > { %v2784_v10 = vpop.f32.mrf.mxu0 }
 0x137   : > { %v1304_v12 = vadd.f32 %v2783_v6, %v2743_v30  ;;  %v3030_v14 = vpop.f32.mrf.mxu1 }
 0x138   : > { %v2785_v62 = vpop.f32.mrf.mxu0 }
 0x139   : > { %v2786_v16 = vadd.f32 %v2785_v62, %v2784_v10  ;;  %v3987_v18 = vadd.f32 %v1368_v8, %v1304_v12  ;;  %v1371_v22 = vpop.f32.mrf.mxu1 }
 0x13a   : > { %v2787_v20 = vpop.f32.mrf.mxu0 }
 0x13b   : > { %v1399_v24 = vmax.f32 %v3973_v25, %v3987_v18  ;;  %v1307_v1 = vadd.f32 %v2786_v16, %v2746_v48 }
 0x13c   : > { %v2788_v26 = vpop.f32.mrf.mxu0 }
 0x13d   : > { %v2789_v28 = vadd.f32 %v2788_v26, %v2787_v20  ;;  %v3991_v3 = vadd.f32 %v1371_v22, %v1307_v1  ;;  %v3033_v7 = vpop.f32.mrf.mxu1 }
 0x13e   : > { %v2790_v5 = vpop.f32.mrf.mxu0 }
 0x13f   : > { %v1312_v9 = vadd.f32 %v2789_v28, %v2749_v39  ;;  %v1384_v23 = vpop.f32.mrf.mxu1 }
 0x140   : > { %v2791_v13 = vpop.f32.mrf.mxu0 }
 0x141   : > { %v3995_v15 = vadd.f32 %v3029_v2, %v1312_v9  ;;  %v2792_v19 = vadd.f32 %v2791_v13, %v2790_v5  ;;  %v3034_v46 = vpop.f32.mrf.mxu1 }
 0x142   : > { %v2793_v21 = vpop.f32.mrf.mxu0 }
 0x143   : > { %v1315_v27 = vadd.f32 %v2792_v19, %v2752_v47  ;;  %v1401_v29 = vmax.f32 %v3971_v17, %v3995_v15  ;;  %v1387_v41 = vpop.f32.mrf.mxu1 }
 0x144   : > { %v2794_v30 = vpop.f32.mrf.mxu0 }
 0x145   : > { %v3999_v36 = vadd.f32 %v3030_v14, %v1315_v27  ;;  %v2795_v37 = vadd.f32 %v2794_v30, %v2793_v21 }
 0x146   : > { %v2796_v42 = vpop.f32.mrf.mxu0 }
 0x147   : > { %v1320_v48 = vadd.f32 %v2795_v37, %v2755_v51 }
 0x148   : > { %v2797_v33 = vpop.f32.mrf.mxu0 }
 0x149   : > { %v2798_v32 = vadd.f32 %v2797_v33, %v2796_v42  ;;  %v4003_v35 = vadd.f32 %v1384_v23, %v1320_v48 }
 0x14a   : > { %v2799_v39 = vpop.f32.mrf.mxu0 }
 0x14b   : > { %v1403_v44 = vmax.f32 %v3981_v34, %v4003_v35  ;;  %v1323_v43 = vadd.f32 %v2798_v32, %v2758_v55 }
 0x14c   : > { %v2800_v47 = vpop.f32.mrf.mxu0 }
 0x14d   : > { %v2801_v49 = vadd.f32 %v2800_v47, %v2799_v39  ;;  %v4007_v50 = vadd.f32 %v1387_v41, %v1323_v43 }
 0x14e   : > { %v2802_v53 = vpop.f32.mrf.mxu0 }
 0x14f   : > { %v1328_v54 = vadd.f32 %v2801_v49, %v2761_v58 }
 0x150   : > { %v2803_v56 = vpop.f32.mrf.mxu0 }
 0x151   : > { %v4011_v57 = vadd.f32 %v3033_v7, %v1328_v54  ;;  %v2804_v59 = vadd.f32 %v2803_v56, %v2802_v53 }
 0x152   : > { %v2831_v60 = vpop.f32.mrf.mxu0 }
 0x153   : > { %v1331_v0 = vadd.f32 %v2804_v59, %v2764_v61  ;;  %v2871_v2 = vpop.f32.mrf.mxu1  ;;  %v1405_v4 = vmax.f32 %v3979_v52, %v4011_v57 }
 0x154   : > { %v2832_v55 = vpop.f32.mrf.mxu0 }
 0x155   : > { %v4015_v6 = vadd.f32 %v3034_v46, %v1331_v0  ;;  %v2872_v8 = vpop.f32.mrf.mxu1  ;;  %v2833_v39 = vadd.f32 %v2832_v55, %v2831_v60 }
 0x156   : > { %v4017_v10 = vpop.f32.mrf.mxu0  ;;  %v2873_v41 = vadd.f32 %v2872_v8, %v2871_v2 }
 0x157   : > { %4217 = vst [vmem:[#allocation3_spill] sm:$0xff] %v4015_v6  ;;  %v4019_v58 = vpop.f32.mrf.mxu1 }
 0x158   : > { %v4023_v14 = vpop.f32.mrf.mxu0  ;;  %v1643_v57 = vadd.f32 %v2873_v41, %v2833_v39 }
 0x159   : > { %v4025_v62 = vpop.f32.mrf.mxu1 }
 0x15a   : > { %v2837_v61 = vpop.f32.mrf.mxu0 }
 0x15b   : > { %v2877_v16 = vpop.f32.mrf.mxu1 }
 0x15c   : > { %v2838_v20 = vpop.f32.mrf.mxu0 }
 0x15d   : > { %v2878_v22 = vpop.f32.mrf.mxu1  ;;  %v2839_v46 = vadd.f32 %v2838_v20, %v2837_v61 }
 0x15e   : > { %v4027_v52 = vpop.f32.mrf.mxu0  ;;  %v2879_v48 = vadd.f32 %v2878_v22, %v2877_v16 }
 0x15f   : > { %v4029_v1 = vpop.f32.mrf.mxu1 }
 0x160   : > { %v4031_v26 = vpop.f32.mrf.mxu0  ;;  %v1651_v53 = vadd.f32 %v2879_v48, %v2839_v46 }
 0x161   : > { %v4033_v28 = vpop.f32.mrf.mxu1 }
 0x162   : > { %v2843_v5 = vpop.f32.mrf.mxu0 }
 0x163   : > { %v2883_v7 = vpop.f32.mrf.mxu1 }
 0x164   : > { %v2844_v9 = vpop.f32.mrf.mxu0 }
 0x165   : > { %v2884_v13 = vpop.f32.mrf.mxu1  ;;  %v2845_v8 = vadd.f32 %v2844_v9, %v2843_v5 }
 0x166   : > { %v4035_v19 = vpop.f32.mrf.mxu0  ;;  %v2885_v20 = vadd.f32 %v2884_v13, %v2883_v7 }
 0x167   : > { %v4037_v21 = vpop.f32.mrf.mxu1 }
 0x168   : > { %v4039_v23 = vpop.f32.mrf.mxu0 }
 0x169   : > { %v4041_v27 = vpop.f32.mrf.mxu1 }
 0x16a   : > { %v2849_v30 = vpop.f32.mrf.mxu0 }
 0x16b   : > { %v2889_v37 = vpop.f32.mrf.mxu1 }
 0x16c   : > { %v2850_v42 = vpop.f32.mrf.mxu0 }
 0x16d   : > { %v2890_v33 = vpop.f32.mrf.mxu1  ;;  %v2851_v12 = vadd.f32 %v2850_v42, %v2849_v30 }
 0x16e   : > { %v4043_v32 = vpop.f32.mrf.mxu0  ;;  %v2891_v61 = vadd.f32 %v2890_v33, %v2889_v37  ;;  %v1659_v33 = vadd.f32 %v2885_v20, %v2845_v8 }
 0x16f   : > { %v4045_v43 = vpop.f32.mrf.mxu1 }
 0x170   : > { %v4047_v47 = vpop.f32.mrf.mxu0  ;;  %v1667_v39 = vadd.f32 %v2891_v61, %v2851_v12 }
 0x171   : > { %v4049_v49 = vpop.f32.mrf.mxu1 }
 0x172   : > { %v3049_v54 = vpop.f32.mrf.mxu0 }
 0x173   : > { %v1716_v56 = vadd.f32 %v3049_v54, %v1651_v53  ;;  %v2921_v59 = vpop.f32.mrf.mxu1 }
 0x174   : > { %v1707_v0 = vpop.f32.mrf.mxu0 }
 0x175   : > { %v4054_v16 = vmax.f32 %v1401_v29, %v1716_v56  ;;  %v1708_v60 = vadd.f32 %v1707_v0, %v1643_v57  ;;  %v2922_v2 = vpop.f32.mrf.mxu1  ;;  %v2836_v57 = vadd.f32 %v4023_v14, %v4017_v10  ;;  %v2876_v0 = vadd.f32 %v4025_v62, %v4019_v58 }
 0x176   : > { %v4056_v55 = vpop.f32.mrf.mxu0  ;;  %v2923_v8 = vadd.f32 %v2922_v2, %v2921_v59  ;;  %v2842_v10 = vadd.f32 %v4031_v26, %v4027_v52  ;;  %v2882_v58 = vadd.f32 %v4033_v28, %v4029_v1 }
 0x177   : > { %v1738_v22 = vmax.f32 %v1399_v24, %v1708_v60  ;;  %v2924_v46 = vpop.f32.mrf.mxu1 }
 0x178   : > { %v1710_v48 = vpop.f32.mrf.mxu0  ;;  %v1654_v26 = vadd.f32 %v2882_v58, %v2842_v10 }
 0x179   : > { %v2925_v30 = vpop.f32.mrf.mxu1 }
 0x17a   : > { %v3053_v37 = vpop.f32.mrf.mxu0  ;;  %v2926_v63 = vadd.f32 %v2925_v30, %v2924_v46  ;;  %v4218_v46 = vmax.f32 %v3977_v38, %v3991_v3 }
 0x17b   : > { %v1732_v42 = vadd.f32 %v3053_v37, %v1667_v39  ;;  %v2927_v17 = vpop.f32.mrf.mxu1 }
 0x17c   : > { %v1723_v15 = vpop.f32.mrf.mxu0 }
 0x17d   : > { %v4061_v29 = vmax.f32 %v1405_v4, %v1732_v42  ;;  %v1724_v41 = vadd.f32 %v1723_v15, %v1659_v33  ;;  %v2928_v53 = vpop.f32.mrf.mxu1  ;;  %v1646_v42 = vadd.f32 %v2876_v0, %v2836_v57 }
 0x17e   : > { %v4076_v4 = vpop.f32.mrf.mxu0  ;;  %v2929_v57 = vadd.f32 %v2928_v53, %v2927_v17  ;;  %v2888_v17 = vadd.f32 %v4041_v27, %v4037_v21 }
 0x17f   : > { %v4066_v5 = vmax.f32 %v1403_v44, %v1724_v41  ;;  %v2930_v25 = vpop.f32.mrf.mxu1  ;;  %v1711_v51 = vadd.f32 %v1710_v48, %v1646_v42 }
 0x180   : > { %v4082_v34 = vpop.f32.mrf.mxu0 }
 0x181   : > { %v2931_v18 = vpop.f32.mrf.mxu1  ;;  %v1739_v30 = vmax.f32 %v4218_v46, %v1711_v51  ;;  %v2848_v51 = vadd.f32 %v4039_v23, %v4035_v19 }
 0x183   : > { %v4068_v24 = vpop.f32.mrf.mxu1  ;;  %v1662_v23 = vadd.f32 %v2888_v17, %v2848_v51  ;;  %v4221_v51 = vld [vmem:[#allocation3_spill] sm:$0xff] }
 0x184   : > { %v4222_v17 = vmax.f32 %v3983_v40, %v4221_v51 }
 0x185   : > { %v2934_v12 = vpop.f32.mrf.mxu1 }
 0x187   : > { %v4070_v7 = vpop.f32.mrf.mxu1 }
 0x189   : > { %v4072_v9 = vpop.f32.mrf.mxu1 }
 0x18b   : > { %v4074_v13 = vpop.f32.mrf.mxu1 }
 0x18d   : > { %v4078_v54 = vpop.f32.mrf.mxu1 }
 0x18f   : > { %v4080_v56 = vpop.f32.mrf.mxu1 }
 0x191   : > { %v4084_v35 = vpop.f32.mrf.mxu1 }
 0x192   : > { %v2961_v44 = vpop.f32.mrf.mxu0 }
 0x193   : > { %v3069_v61 = vpop.f32.mrf.mxu1 }
 0x194   : > { %v2962_v60 = vpop.f32.mrf.mxu0 }
 0x195   : > { %v2963_v20 = vadd.f32 %v2962_v60, %v2961_v44  ;;  %v2046_v39 = vpop.f32.mrf.mxu1  ;;  %v4097_v44 = vld [vmem:[%s4213_s5] ss:$0 sm:$0xff] }
 0x196   : > { %v2964_v37 = vpop.f32.mrf.mxu0 }
 0x197   : > { %v1982_v33 = vadd.f32 %v2963_v20, %v2923_v8  ;;  %v3070_v15 = vpop.f32.mrf.mxu1  ;;  %v2932_v8 = vadd.f32 %v2931_v18, %v2930_v25  ;;  %v4219_v25 = vmax.f32 %v3975_v31, %v3999_v36  ;;  %v1727_v31 = vadd.f32 %v4082_v34, %v1662_v23 }
 0x198   : > { %v2965_v41 = vpop.f32.mrf.mxu0 }
 0x199   : > { %v2966_v11 = vadd.f32 %v2965_v41, %v2964_v37  ;;  %v2047_v6 = vadd.f32 %v2046_v39, %v1982_v33  ;;  %v2049_v62 = vpop.f32.mrf.mxu1  ;;  %v2935_v41 = vadd.f32 %v2934_v12, %v4068_v24  ;;  %v2938_v24 = vadd.f32 %v4072_v9, %v4070_v7 }
 0x19a   : > { %v2967_v14 = vpop.f32.mrf.mxu0  ;;  %v4220_v7 = vmax.f32 %v3985_v45, %v4007_v50  ;;  %v2944_v45 = vadd.f32 %v4084_v35, %v4080_v56 }
 0x19b   : > { %v2077_v59 = vmax.f32 %v1738_v22, %v2047_v6  ;;  %v1985_v2 = vadd.f32 %v2966_v11, %v2926_v63  ;;  %v3073_v28 = vpop.f32.mrf.mxu1  ;;  %v1719_v22 = vadd.f32 %v4056_v55, %v1654_v26 }
 0x19c   : > { %v2968_v48 = vpop.f32.mrf.mxu0  ;;  %v1743_v9 = vmax.f32 %v4220_v7, %v1727_v31 }
 0x19d   : > { %v2969_v0 = vadd.f32 %v2968_v48, %v2967_v14  ;;  %v2050_v52 = vadd.f32 %v2049_v62, %v1985_v2  ;;  %v2092_v6 = vadd.f32 %v4097_v44, %v2077_v59  ;;  %v2062_v39 = vpop.f32.mrf.mxu1  ;;  %v1741_v18 = vmax.f32 %v4219_v25, %v1719_v22 }
 0x19e   : > { %v2970_v1 = vpop.f32.mrf.mxu0  ;;  %v2854_v2 = vadd.f32 %v4047_v47, %v4043_v32  ;;  %v2894_v48 = vadd.f32 %v4049_v49, %v4045_v43 }
 0x19f   : > { %v1990_v11 = vadd.f32 %v2969_v0, %v2929_v57  ;;  %v2078_v63 = vmax.f32 %v1739_v30, %v2050_v52  ;;  %v2100_v37 = vmax.f32 %v2092_v6, 0.0  ;;  %v3074_v21 = vpop.f32.mrf.mxu1 }
 0x1a0   : > { %v2971_v60 = vpop.f32.mrf.mxu0 }
 0x1a1   : > { %v2055_v20 = vadd.f32 %v3069_v61, %v1990_v11  ;;  %v2093_v38 = vadd.f32 %v4097_v44, %v2078_v63  ;;  %v2972_v3 = vadd.f32 %v2971_v60, %v2970_v1  ;;  %v2065_v30 = vpop.f32.mrf.mxu1  ;;  %v2941_v1 = vadd.f32 %v4078_v54, %v4074_v13 }
 0x1a2   : > { %v2973_v53 = vpop.f32.mrf.mxu0  ;;  %v1670_v11 = vadd.f32 %v2894_v48, %v2854_v2 }
 0x1a3   : > { %v2079_v42 = vmax.f32 %v4054_v16, %v2055_v20  ;;  %v2101_v33 = vmax.f32 %v2093_v38, 0.0  ;;  %v1993_v55 = vadd.f32 %v2972_v3, %v2932_v8 }
 0x1a4   : > { %v2974_v61 = vpop.f32.mrf.mxu0  ;;  %v1735_v22 = vadd.f32 %v4076_v4, %v1670_v11 }
 0x1a5   : > { %v2615_v10 = vpack.c.bf16 %v2101_v33, %v2100_v37  ;;  %v2058_v58 = vadd.f32 %v3070_v15, %v1993_v55  ;;  %v2975_v19 = vadd.f32 %v2974_v61, %v2973_v53  ;;  %v2094_v27 = vadd.f32 %v4097_v44, %v2079_v42 }
 0x1a6   : > { %v2976_v14 = vpop.f32.mrf.mxu0  ;;  %v1745_v53 = vmax.f32 %v4222_v17, %v1735_v22 }
 0x1a7   : > { %2616 = vst [vmem:[%s4116_s21] sm:$0xff] %v2615_v10   ;;  %v2080_v16 = vmax.f32 %v1741_v18, %v2058_v58  ;;  %v1998_v62 = vadd.f32 %v2975_v19, %v2935_v41  ;;  %v2102_v57 = vmax.f32 %v2094_v27, 0.0 }
 0x1a8   : > { %v2977_v36 = vpop.f32.mrf.mxu0 }
 0x1a9   : > { %v2095_v12 = vadd.f32 %v4097_v44, %v2080_v16  ;;  %v2978_v15 = vadd.f32 %v2977_v36, %v2976_v14  ;;  %v2063_v59 = vadd.f32 %v2062_v39, %v1998_v62 }
 0x1aa   : > { %v2979_v46 = vpop.f32.mrf.mxu0 }
 0x1ab   : > { %v2103_v0 = vmax.f32 %v2095_v12, 0.0  ;;  %v2081_v34 = vmax.f32 %v4066_v5, %v2063_v59  ;;  %v2001_v52 = vadd.f32 %v2978_v15, %v2938_v24 }
 0x1ac   : > { %v2980_v26 = vpop.f32.mrf.mxu0 }
 0x1ad   : > { %v2620_v32 = vpack.c.bf16 %v2103_v0, %v2102_v57  ;;  %v2981_v47 = vadd.f32 %v2980_v26, %v2979_v46  ;;  %v2066_v6 = vadd.f32 %v2065_v30, %v2001_v52  ;;  %v2096_v49 = vadd.f32 %v4097_v44, %v2081_v34 }
 0x1ae   : > { %v2982_v43 = vpop.f32.mrf.mxu0 }
 0x1af   : > { %2632 = vst [vmem:[%s4116_s21 + $0x8] sm:$0xff] %v2620_v32   ;;  %v2006_v63 = vadd.f32 %v2981_v47, %v2941_v1  ;;  %v2082_v5 = vmax.f32 %v1743_v9, %v2066_v6  ;;  %v2104_v8 = vmax.f32 %v2096_v49, 0.0 }
 0x1b0   : > { %v2983_v60 = vpop.f32.mrf.mxu0 }
 0x1b1   : > { %v2071_v50 = vadd.f32 %v3073_v28, %v2006_v63  ;;  %v2097_v13 = vadd.f32 %v4097_v44, %v2082_v5  ;;  %v2984_v54 = vadd.f32 %v2983_v60, %v2982_v43 }
 0x1b3   : > { %v2083_v20 = vmax.f32 %v4061_v29, %v2071_v50  ;;  %v2105_v38 = vmax.f32 %v2097_v13, 0.0  ;;  %v2009_v3 = vadd.f32 %v2984_v54, %v2944_v45 }
 0x1b5   : > { %v2625_v39 = vpack.c.bf16 %v2105_v38, %v2104_v8  ;;  %v2074_v4 = vadd.f32 %v3074_v21, %v2009_v3  ;;  %v2098_v37 = vadd.f32 %v4097_v44, %v2083_v20 }
 0x1b7   : > { %2633 = vst [vmem:[%s4116_s21 + $0x10] sm:$0xff] %v2625_v39   ;;  %v2084_v56 = vmax.f32 %v1745_v53, %v2074_v4  ;;  %v2106_v28 = vmax.f32 %v2098_v37, 0.0 }
 0x1b9   : > { %v2099_v35 = vadd.f32 %v4097_v44, %v2084_v56 }
 0x1bb   : > { %v2107_v42 = vmax.f32 %v2099_v35, 0.0  ;;  %2154 = sbr.rel (!%p3466_p4) target bundleno = 492 (0x1ec), region = 48 }
 0x1bd   : > { %v2630_v33 = vpack.c.bf16 %v2107_v42, %v2106_v28 }
 0x1bf   : > { %2634 = vst [vmem:[%s4116_s21 + $0x18] sm:$0xff] %v2630_v33  }
 0x1c0   : > { %s4230_s15 = smov (!%p2157_p8, %s2156_s15), 8 }
 0x1c1   : > { %s2586_s26 = sshll.u32 %s4230_s15, 6 }
 0x1c2   : > { %p2589_p9 = scmp.eq.s32.totalorder %s2586_s26, 0 }
 0x1c3   : > { %s4160_s27 = sshrl.u32 (!%p2589_p9), %s4230_s15, 3 }
 0x1c4   : > { %2165 = sbr.rel (%p2589_p9) target bundleno = 492 (0x1ec), region = 52  ;;  %p2590_p10 = scmp.le.s32.totalorder (!%p2589_p9), %s4160_s27, 0 }
 0x1c9   : > { %2366 = sbr.rel (%p2590_p10) target bundleno = 475 (0x1db), region = 133  ;;  %s4223_s24 = smov (!%p2590_p10), %s4154_s23 }
 0x1ca   : > { %s4224_s29 = smov (!%p2590_p10), %s4116_s21  ;;  %s4169_s18 = smov (!%p2590_p10), 0  }
 0x1cb   : > { %s4171_s30 = smov (!%p2590_p10), 0  }
 0x1ce LB: >> { %v2182_v40 = vld [vmem:[%s3380_s29] sm:$0xf]  ;;  %v2184_v29 = vld [vmem:[%s3380_s29 + $0x4] sm:$0xf]  ;;  %v2186_v44 = vld [vmem:[%s3380_s29 + $0x8] sm:$0xf]  ;;  %s3388_s30 = sphi %s4171_s30, %s2176_s30   ;;  %s3384_s18 = sphi %s4169_s18, %s4225_s18   ;;  %s3380_s29 = sphi %s4224_s29, %s2203_s29   ;;  %s3376_s24 = sphi %s4223_s24, %s2204_s24  }
 0x1cf   : >> { %2183 = vst [vmem:[%s3376_s24] sm:$0xf] %v2182_v40  ;;  %2185 = vst [vmem:[%s3376_s24 + $0x4] sm:$0xf] %v2184_v29  ;;  %v2188_v55 = vld [vmem:[%s3380_s29 + $0xc] sm:$0xf]  ;;  %s2198_s8 = sadd.s32 1, %s3384_s18 }
 0x1d0   : >> { %2187 = vst [vmem:[%s3376_s24 + $0x8] sm:$0xf] %v2186_v44  ;;  %v2190_v25 = vld [vmem:[%s3380_s29 + $0x10] sm:$0xf]  ;;  %v2192_v18 = vld [vmem:[%s3380_s29 + $0x14] sm:$0xf]  ;;  %p2199_p11 = scmp.ge.s32.totalorder %s2198_s8, %s4160_s27 }
 0x1d1   : >> { %2189 = vst [vmem:[%s3376_s24 + $0xc] sm:$0xf] %v2188_v55  ;;  %2191 = vst [vmem:[%s3376_s24 + $0x10] sm:$0xf] %v2190_v25  ;;  %v2194_v61 = vld [vmem:[%s3380_s29 + $0x18] sm:$0xf] }
 0x1d2   : >> { %2193 = vst [vmem:[%s3376_s24 + $0x14] sm:$0xf] %v2192_v18  ;;  %v2196_v41 = vld [vmem:[%s3380_s29 + $0x1c] sm:$0xf]  ;;  %2195 = vst [vmem:[%s3376_s24 + $0x18] sm:$0xf] %v2194_v61 }
 0x1d3   : >> { %2197 = vst [vmem:[%s3376_s24 + $0x1c] sm:$0xf] %v2196_v41  ;;  %s4232_s8 = smov (%p2199_p11, %s2198_s8), 0  ;;  %s2176_s30 = sadd.s32 1, %s3388_s30  }
 0x1d4   : >> { %s2591_s9 = sshll.u32 %s4232_s8, 5  ;;  %p2175_p12 = scmp.ge.s32.totalorder %s2176_s30, %s4160_s27 }
 0x1d5   : >> { %s2203_s29 = scalar_lea.vmem %s4116_s21, %s2591_s9 [#allocation2]   ;;  %s2204_s24 = scalar_lea.vmem %s4154_s23, %s2591_s9  }
 0x1d6   : >> { %s4225_s18 = smov %s4232_s8  ;;  %2178 = sbr.rel (!%p2175_p12) target bundleno = 462 (0x1ce), region = 139 }
 0x1db PF: > { %s4190_s19 = sand.u32 7, %s4230_s15   ;;  %s2610_s10 = sshll.u32 %s4160_s27, 5 }
 0x1dc   : > { %s2209_s11 = scalar_lea.vmem %s4116_s21, %s2610_s10 [#allocation2]   ;;  %s2211_s7 = scalar_lea.vmem %s4154_s23, %s2610_s10  }
 0x1dd   : > { %p2596_p13 = scmp.le.s32.totalorder %s4190_s19, 0 }
 0x1de   : > { %s3390_s12 = smov (!%p2596_p13), %s2211_s7   ;;  %s3394_s13 = smov (!%p2596_p13), %s2209_s11  }
 0x1df   : > { %2380 = sbr.rel (%p2596_p13) target bundleno = 492 (0x1ec), region = 144  ;;  %s3398_s14 = smov (!%p2596_p13), 0  }
 0x1e0   : > { %s3402_s16 = smov (!%p2596_p13), 0  }
 0x1e4 LB: >> { %v2221_v10 = vld [vmem:[%s3396_s13] sm:$0xf]  ;;  %s2223_s15 = sadd.s32 1, %s3400_s14  ;;  %s2215_s16 = sadd.s32 1, %s3404_s16   ;;  %s3404_s16 = sphi %s3402_s16, %s2215_s16   ;;  %s3400_s14 = sphi %s3398_s14, %s3399_s14   ;;  %s3396_s13 = sphi %s3394_s13, %s2228_s13   ;;  %s3392_s12 = sphi %s3390_s12, %s2229_s12  }
 0x1e5   : >> { %2222 = vst [vmem:[%s3392_s12] sm:$0xf] %v2221_v10  ;;  %p2224_p0 = scmp.ge.s32.totalorder %s2223_s15, %s4190_s19  ;;  %p2214_p1 = scmp.ge.s32.totalorder %s2215_s16, %s4190_s19 }
 0x1e7   : >> { %s4234_s15 = smov (%p2224_p0, %s2223_s15), 0  ;;  %2217 = sbr.rel (!%p2214_p1) target bundleno = 484 (0x1e4), region = 150 }
 0x1e8   : >> { %s2597_s21 = sshll.u32 %s4234_s15, 2  ;;  %s3399_s14 = smov %s4234_s15  }
 0x1e9   : >> { %s2228_s13 = scalar_lea.vmem %s2209_s11, %s2597_s21 [#allocation2]   ;;  %s2229_s12 = scalar_lea.vmem %s2211_s7, %s2597_s21  }
 0x1ec PF: > { %p13_p2 = scmp.ge.s32.totalorder %s3456_s25, 4   ;;  %s4226_s21 = smov %s3368_s22 }
 0x1ed   : > { %s4227_s22 = smov %s3464_s28  ;;  %s4228_s23 = smov %s3456_s25 }
 0x1ee   :  { %15 = sbr.rel (!%p13_p2) target bundleno = 2 (0x2), region = 161 }

// kernel: encoder_forward.7
= control target key start
LH: loop header
LB: loop body
LE: loop exit
PB: predicated region body
PF: predicated region fallthrough
CT: control target
= control target key end

     0   :  { %v889_v38 = vmov 0.0   ;;  %vm890_vm0 = vmmov 0   ;;  %vm497_vm1 = vcmask 785408   ;;  %s1103_s1 = inlined_call_operand.vmem [shape: bf16[864,128], index: 1, kind: input, shape index: {}]   ;;  %s1104_s0 = inlined_call_operand.vmem [shape: bf16[16,864], index: 0, kind: input, shape index: {}]   ;;  %s1105_s2 = inlined_call_operand.vmem [shape: f32[1,128], index: 2, kind: input, shape index: {}]   ;;  %s1106_s3 = inlined_call_operand.vmem [shape: f32[16,128], index: 3, kind: output, shape index: {}]  }
   0x1   :  { %v825_v0 = vld [vmem:[%s1103_s1 + $0x78] sm:$0xff]   ;;  %v829_v4 = vld [vmem:[%s1103_s1 + $0x70] sm:$0xff]   ;;  %v833_v8 = vld [vmem:[%s1103_s1 + $0x68] sm:$0xff]  }
   0x2   :  { %v826_v1 = vld [vmem:[%s1103_s1 + $0x38] sm:$0xff]   ;;  %734 = vmatprep.subr.bf16.mxu0 %v825_v0  ;;  %v830_v5 = vld [vmem:[%s1103_s1 + $0x30] sm:$0xff]   ;;  %v834_v9 = vld [vmem:[%s1103_s1 + $0x28] sm:$0xff]  }
   0x3   :  { %v827_v2 = vld [vmem:[%s1103_s1 + $0xf8] sm:$0xff]   ;;  %735 = vmatpush3.bf16.msra.mxu0 %v826_v1  ;;  %v831_v6 = vld [vmem:[%s1103_s1 + $0xf0] sm:$0xff]   ;;  %v835_v10 = vld [vmem:[%s1103_s1 + $0xe8] sm:$0xff]  }
   0x4   :  { %v828_v3 = vld [vmem:[%s1103_s1 + $0xb8] sm:$0xff]   ;;  %756 = vmatprep.subr.bf16.mxu1 %v827_v2  ;;  %736 = vmatprep.subr.bf16.mxu0 %v829_v4  ;;  %v832_v7 = vld [vmem:[%s1103_s1 + $0xb0] sm:$0xff]   ;;  %v836_v11 = vld [vmem:[%s1103_s1 + $0xa8] sm:$0xff]  }
   0x5   :  { %757 = vmatpush3.bf16.msra.mxu1 %v828_v3  ;;  %v837_v12 = vld [vmem:[%s1103_s1 + $0x60] sm:$0xff]   ;;  %v841_v16 = vld [vmem:[%s1103_s1 + $0x58] sm:$0xff]   ;;  %v845_v20 = vld [vmem:[%s1103_s1 + $0x50] sm:$0xff]  }
   0x6   :  { %758 = vmatprep.subr.bf16.mxu1 %v831_v6  ;;  %v838_v13 = vld [vmem:[%s1103_s1 + $0x20] sm:$0xff]   ;;  %v842_v17 = vld [vmem:[%s1103_s1 + $0x18] sm:$0xff]   ;;  %v846_v21 = vld [vmem:[%s1103_s1 + $0x10] sm:$0xff]  }
   0x7   :  { %737 = vmatpush3.bf16.msra.mxu0 %v830_v5  ;;  %v839_v14 = vld [vmem:[%s1103_s1 + $0xe0] sm:$0xff]   ;;  %v843_v18 = vld [vmem:[%s1103_s1 + $0xd8] sm:$0xff]   ;;  %v847_v22 = vld [vmem:[%s1103_s1 + $0xd0] sm:$0xff]  }
   0x8   :  { %738 = vmatprep.subr.bf16.mxu0 %v833_v8  ;;  %v840_v15 = vld [vmem:[%s1103_s1 + $0xa0] sm:$0xff]   ;;  %v844_v19 = vld [vmem:[%s1103_s1 + $0x98] sm:$0xff]   ;;  %v848_v23 = vld [vmem:[%s1103_s1 + $0x90] sm:$0xff]  }
   0x9   :  { %759 = vmatpush3.bf16.msra.mxu1 %v832_v7  ;;  %v849_v24 = vld [vmem:[%s1103_s1 + $0x48] sm:$0xff]   ;;  %v853_v28 = vld [vmem:[%s1103_s1 + $0x40] sm:$0xff]   ;;  %v860_v34 = vld [vmem:[%s1103_s1 + $0x178] sm:$0xff]  }
   0xa   :  { %760 = vmatprep.subr.bf16.mxu1 %v835_v10  ;;  %v850_v25 = vld [vmem:[%s1103_s1 + $0x8] sm:$0xff]   ;;  %v854_v29 = vld [vmem:[%s1103_s1] sm:$0xff]   ;;  %v864_v37 = vld [vmem:[%s1103_s1 + $0x138] sm:$0xff]  }
   0xb   :  { %739 = vmatpush3.bf16.msra.mxu0 %v834_v9  ;;  %v851_v26 = vld [vmem:[%s1103_s1 + $0xc8] sm:$0xff]   ;;  %v855_v30 = vld [vmem:[%s1103_s1 + $0xc0] sm:$0xff]   ;;  %v865_v39 = vld [vmem:[%s1103_s1 + $0x170] sm:$0xff]  }
   0xc   :  { %740 = vmatprep.subr.bf16.mxu0 %v837_v12  ;;  %v852_v27 = vld [vmem:[%s1103_s1 + $0x88] sm:$0xff]   ;;  %v856_v31 = vld [vmem:[%s1104_s0] ss:$28 sps:$4 sm:$0xff]   ;;  %v866_v40 = vld [vmem:[%s1103_s1 + $0x130] sm:$0xff]  }
   0xd   :  { %761 = vmatpush3.bf16.msra.mxu1 %v836_v11  ;;  %v858_v32 = vld [vmem:[%s1104_s0 + $0x4] ss:$28 sps:$4 sm:$0xff]   ;;  %v863_v36 = vld [vmem:[%s1104_s0 + $0xc] ss:$28 sps:$4 sm:$0xff]   ;;  %v873_v47 = vld [vmem:[%s1103_s1 + $0x158] sm:$0xff]  }
   0xe   :  { %762 = vmatprep.subr.bf16.mxu1 %v839_v14  ;;  %v859_v33 = vld [vmem:[%s1103_s1 + $0x80] sm:$0xff]   ;;  %533 = vmatprep.mubr.bf16.mxu0 %v858_v32  ;;  %v867_v41 = vld [vmem:[%s1103_s1 + $0x168] sm:$0xff]   ;;  %v875_v48 = vld [vmem:[%s1103_s1 + $0x198] sm:$0xff]  }
   0xf   :  { %741 = vmatpush3.bf16.msra.mxu0 %v838_v13  ;;  %v861_v35 = vld [vmem:[%s1104_s0 + $0x8] ss:$28 sps:$4 sm:$0xff]   ;;  %574 = vmatprep.mubr.bf16.mxu1 %v863_v36  ;;  %v874_v49 = vld [vmem:[%s1103_s1 + $0x118] sm:$0xff]   ;;  %v876_v50 = vld [vmem:[%s1103_s1 + $0x150] sm:$0xff]  }
  0x10   :  { %742 = vmatprep.subr.bf16.mxu0 %v841_v16  ;;  %v869_v42 = vld [vmem:[%s1103_s1 + $0x1a8] sm:$0xff]   ;;  %v870_v44 = vld [vmem:[%s1103_s1 + $0x160] sm:$0xff]   ;;  %v878_v51 = vld [vmem:[%s1103_s1 + $0x190] sm:$0xff]  }
  0x11   :  { %763 = vmatpush3.bf16.msra.mxu1 %v840_v15  ;;  %v868_v43 = vld [vmem:[%s1103_s1 + $0x128] sm:$0xff]   ;;  %v872_v45 = vld [vmem:[%s1103_s1 + $0x1a0] sm:$0xff]   ;;  %v877_v52 = vld [vmem:[%s1103_s1 + $0x110] sm:$0xff]  }
  0x12   :  { %764 = vmatprep.subr.bf16.mxu1 %v843_v18  ;;  %v871_v46 = vld [vmem:[%s1103_s1 + $0x120] sm:$0xff]   ;;  %v879_v53 = vld [vmem:[%s1103_s1 + $0x148] sm:$0xff]   ;;  %v887_v55 = vld [vmem:[%s1104_s0 + $0x14] ss:$28 sps:$4 sm:$0xff]  }
  0x13   :  { %743 = vmatpush3.bf16.msra.mxu0 %v842_v17  ;;  %v881_v54 = vld [vmem:[%s1103_s1 + $0x188] sm:$0xff]   ;;  %v882_v57 = vld [vmem:[%s1103_s1 + $0x140] sm:$0xff]   ;;  %v888_v60 = vld [vmem:[%s1104_s0 + $0x18] ss:$28 sps:$4 sm:$0xff]  }
  0x14   :  { %744 = vmatprep.subr.bf16.mxu0 %v845_v20  ;;  %v880_v56 = vld [vmem:[%s1103_s1 + $0x108] sm:$0xff]   ;;  %v884_v58 = vld [vmem:[%s1103_s1 + $0x180] sm:$0xff]  }
  0x15   :  { %765 = vmatpush3.bf16.msra.mxu1 %v844_v19  ;;  %v883_v59 = vld [vmem:[%s1103_s1 + $0x100] sm:$0xff]   ;;  %v885_v61 = vld [vmem:[%s1104_s0 + $0x10] ss:$28 sps:$4 sm:$0xff]  }
  0x16   :  { %766 = vmatprep.subr.bf16.mxu1 %v847_v22  ;;  %v671_v6 = vld [vmem:[%s1105_s2] ss:$0 sm:$0xff] }
  0x17   :  { %745 = vmatpush3.bf16.msra.mxu0 %v846_v21 }
  0x18   :  { %746 = vmatprep.subr.bf16.mxu0 %v849_v24 }
  0x19   :  { %767 = vmatpush3.bf16.msra.mxu1 %v848_v23 }
  0x1a   :  { %768 = vmatprep.subr.bf16.mxu1 %v851_v26 }
  0x1b   :  { %747 = vmatpush3.bf16.msra.mxu0 %v850_v25 }
  0x1c   :  { %748 = vmatprep.subr.bf16.mxu0 %v853_v28 }
  0x1d   :  { %769 = vmatpush3.bf16.msra.mxu1 %v852_v27 }
  0x1e   :  { %770 = vmatprep.subr.bf16.mxu1 %v855_v30 }
  0x1f   :  { %749 = vmatpush3.bf16.msra.mxu0 %v854_v29 }
  0x20   :  { %778 = vmatprep.subr.bf16.mxu0 %v860_v34 }
  0x21   :  { %771 = vmatpush3.bf16.msra.mxu1 %v859_v33 }
  0x22   :  { %534 = vmatmul.mubr.bf16.vlgmr.msra.gmra.mxu0 %v856_v31  ;;  %807 = vmatprep.subr.bf16.mxu1 %v889_v38 }
  0x23   :  { %779 = vmatpush3.bf16.msra.mxu0 %v864_v37  ;;  %615 = vmatprep.mubr.bf16.mxu0 %v887_v55 }
  0x24   :  { %575 = vmatmul.mubr.bf16.vlgmr.msra.gmra.mxu1 %v861_v35  ;;  %780 = vmatprep.subr.bf16.mxu0 %v865_v39 }
  0x25   :  { %819 = vmatprep.mubr.msk.bf16.mxu1 %vm890_vm0, %v889_v38  ;;  %808 = vmatpush3.bf16.msra.mxu1 %v869_v42 }
  0x26   :  { %809 = vmatprep.subr.bf16.mxu1 %v889_v38 }
  0x27   :  { %781 = vmatpush3.bf16.msra.mxu0 %v866_v40 }
  0x28   :  { %782 = vmatprep.subr.bf16.mxu0 %v867_v41 }
  0x29   :  { %810 = vmatpush3.bf16.msra.mxu1 %v872_v45 }
  0x2a   :  { %811 = vmatprep.subr.bf16.mxu1 %v889_v38 }
  0x2b   :  { %783 = vmatpush3.bf16.msra.mxu0 %v868_v43 }
  0x2c   :  { %784 = vmatprep.subr.bf16.mxu0 %v870_v44 }
  0x2d   :  { %812 = vmatpush3.bf16.msra.mxu1 %v875_v48 }
  0x2e   :  { %813 = vmatprep.subr.bf16.mxu1 %v889_v38 }
  0x2f   :  { %785 = vmatpush3.bf16.msra.mxu0 %v871_v46 }
  0x30   :  { %786 = vmatprep.subr.bf16.mxu0 %v873_v47 }
  0x31   :  { %814 = vmatpush3.bf16.msra.mxu1 %v878_v51 }
  0x32   :  { %815 = vmatprep.subr.bf16.mxu1 %v889_v38 }
  0x33   :  { %787 = vmatpush3.bf16.msra.mxu0 %v874_v49 }
  0x34   :  { %788 = vmatprep.subr.bf16.mxu0 %v876_v50 }
  0x35   :  { %816 = vmatpush3.bf16.msra.mxu1 %v881_v54 }
  0x36   :  { %817 = vmatprep.subr.bf16.mxu1 %v889_v38 }
  0x37   :  { %789 = vmatpush3.bf16.msra.mxu0 %v877_v52 }
  0x38   :  { %790 = vmatprep.subr.bf16.mxu0 %v879_v53 }
  0x39   :  { %818 = vmatpush3.bf16.msra.mxu1 %v884_v58 }
  0x3b   :  { %791 = vmatpush3.bf16.msra.mxu0 %v880_v56 }
  0x3c   :  { %792 = vmatprep.subr.bf16.mxu0 %v882_v57  ;;  %820 = vmatmul.mubr.msk.bf16.vlgmr.msra.gmra.mxu1 %vm497_vm1, %v888_v60 }
  0x3f   :  { %793 = vmatpush3.bf16.msra.mxu0 %v883_v59 }
  0x42   :  { %616 = vmatmul.mubr.bf16.vlgmr.msra.gmra.mxu0 %v885_v61 }
  0xe2   :  { %v750_v63 = vpop.f32.mrf.mxu0 }
  0xe4   :  { %v772_v62 = vpop.f32.mrf.mxu1  ;;  %v751_v1 = vpop.f32.mrf.mxu0 }
  0xe5   :  { %v752_v4 = vadd.f32 %v751_v1, %v750_v63 }
  0xe6   :  { %v773_v0 = vpop.f32.mrf.mxu1  ;;  %v753_v3 = vpop.f32.mrf.mxu0 }
  0xe7   :  { %v536_v9 = vadd.f32 %v752_v4, %v671_v6  ;;  %v774_v10 = vadd.f32 %v773_v0, %v772_v62 }
  0xe8   :  { %v775_v2 = vpop.f32.mrf.mxu1  ;;  %v754_v7 = vpop.f32.mrf.mxu0 }
  0xe9   :  { %v755_v11 = vadd.f32 %v754_v7, %v753_v3  ;;  %v577_v16 = vadd.f32 %v774_v10, %v536_v9 }
  0xea   :  { %v776_v5 = vpop.f32.mrf.mxu1 }
  0xeb   :  { %v539_v17 = vadd.f32 %v755_v11, %v671_v6  ;;  %v777_v18 = vadd.f32 %v776_v5, %v775_v2 }
  0xed   :  { %v580_v24 = vadd.f32 %v777_v18, %v539_v17 }
  0xfc   :  { %v658_v8 = vpop.f32.mrf.mxu1 }
  0xfe   :  { %v821_v12 = vpop.f32.mrf.mxu1 }
 0x100   :  { %v661_v14 = vpop.f32.mrf.mxu1 }
 0x102   :  { %v794_v13 = vpop.f32.mrf.mxu0  ;;  %v822_v20 = vpop.f32.mrf.mxu1 }
 0x104   :  { %v795_v15 = vpop.f32.mrf.mxu0 }
 0x105   :  { %v796_v19 = vadd.f32 %v795_v15, %v794_v13 }
 0x106   :  { %v797_v21 = vpop.f32.mrf.mxu0 }
 0x107   :  { %v618_v22 = vadd.f32 %v796_v19, %v577_v16 }
 0x108   :  { %v798_v23 = vpop.f32.mrf.mxu0 }
 0x109   :  { %v659_v25 = vadd.f32 %v658_v8, %v618_v22  ;;  %v799_v26 = vadd.f32 %v798_v23, %v797_v21 }
 0x10b   :  { %665 = vst [vmem:[%s1106_s3] sm:$0xff] %v659_v25  ;;  %v621_v27 = vadd.f32 %v799_v26, %v580_v24 }
 0x10d   :  { %v662_v28 = vadd.f32 %v661_v14, %v621_v27 }
 0x10f   :  { %666 = vst [vmem:[%s1106_s3 + $0x8] sm:$0xff] %v662_v28 }

// kernel: encoder_forward.6
= control target key start
LH: loop header
LB: loop body
LE: loop exit
PB: predicated region body
PF: predicated region fallthrough
CT: control target
= control target key end

     0   :  { %s3285_s21 = smov 0   ;;  %s3287_s22 = smov 0   ;;  %s4250_s0 = inlined_call_operand.vmem [shape: bf16[18,1200], index: 0, kind: input, shape index: {}]   ;;  %s4251_s1 = inlined_call_operand.vmem [shape: bf16[18,1200], index: 1, kind: input, shape index: {}]   ;;  %s4252_s2 = inlined_call_operand.vmem [shape: bf16[18,1200], index: 2, kind: input, shape index: {}]   ;;  %s4253_s3 = inlined_call_operand.vmem [shape: bf16[18,1200], index: 3, kind: input, shape index: {}]   ;;  %s4254_s4 = inlined_call_operand.vmem [shape: bf16[1200,128], index: 4, kind: input, shape index: {}]   ;;  %s4255_s5 = inlined_call_operand.vmem [shape: f32[1,128], index: 5, kind: input, shape index: {}]   ;;  %s4256_s6 = inlined_call_operand.vmem [shape: bf16[18,128], index: 6, kind: output, shape index: {}]  }
   0x1   :  { %s3289_s23 = smov 0  }
   0x2 LB: > { %s3298_s24 = sadd.s32 4294967295, %s3215_s23   ;;  %s3300_s25 = sadd.s32 1, %s3215_s23   ;;  %s3215_s23 = sphi %s3289_s23, %s4327_s23   ;;  %s3211_s22 = sphi %s3287_s22, %s4326_s22   ;;  %s3207_s21 = sphi %s3285_s21, %s4325_s21  }
   0x3   : > { %s166_s26 = ssub.s32 %s3215_s23, %s3300_s25  ;;  %s169_s27 = sadd.s32 1, %s3211_s22 }
   0x4   : > { %p167_p0 = scmp.eq.s32.totalorder %s166_s26, 0  ;;  %p179_p1 = scmp.ne.s32.totalorder %s3211_s22, %s3207_s21 }
   0x5   : > { %p180_p2 = scmp.eq.s32.totalorder %s3298_s24, 1  ;;  %p2387_p3 = scmp.ge.s32.totalorder %s3215_s23, 1 }
   0x6   : > { %s3308_s28 = scalar_select %p167_p0, %s3211_s22, %s169_s27  }
   0x7   : > { %p3310_p4 = por %p180_p2, %p179_p1  ;;  %p290_p5 = scmp.lt.s32.totalorder %s3215_s23, 3 }
   0x9   : > { %p291_p6 = pnand %p2387_p3, %p290_p5 }
   0xb   : > { %294 = sbr.rel (%p291_p6) target bundleno = 621 (0x26d), region = 44 }
  0x10   : > { %v3317_v0 = vld [vmem:[%s4254_s4 + $0x78] sm:$0xff]   ;;  %v3340_v4 = vld [vmem:[%s4254_s4 + $0x70] sm:$0xff]   ;;  %v3364_v8 = vld [vmem:[%s4254_s4 + $0x68] sm:$0xff]   ;;  %s3403_s18 = sshll.u32 %s3298_s24, 1  ;;  %vm1091_vm0 = vcmask 392192   ;;  %s2538_s13 = sshll.u32 (%p3310_p4), %s3298_s24, 3 }
  0x11   : > { %v3322_v1 = vld [vmem:[%s4254_s4 + $0xf8] sm:$0xff]   ;;  %2546 = vmatprep.subr.bf16.mxu0 %v3317_v0  ;;  %v3346_v5 = vld [vmem:[%s4254_s4 + $0xf0] sm:$0xff]   ;;  %4286 = vst [vmem:[#allocation4_spill] sm:$0xff] %v3364_v8  ;;  %v3370_v9 = vld [vmem:[%s4254_s4 + $0xe8] sm:$0xff]   ;;  %p364_p7 = scmp.lt.s32.totalorder %s3403_s18, 2 }
  0x12   : > { %v3328_v2 = vld [vmem:[%s4254_s4 + $0x38] sm:$0xff]   ;;  %2568 = vmatprep.subr.bf16.mxu1 %v3322_v1  ;;  %v3352_v6 = vld [vmem:[%s4254_s4 + $0x30] sm:$0xff]   ;;  %v3376_v10 = vld [vmem:[%s4254_s4 + $0x28] sm:$0xff]  }
  0x13   : > { %v3334_v3 = vld [vmem:[%s4254_s4 + $0xb8] sm:$0xff]   ;;  %2547 = vmatpush3.bf16.msra.mxu0 %v3328_v2  ;;  %v3358_v7 = vld [vmem:[%s4254_s4 + $0xb0] sm:$0xff]   ;;  %v3382_v11 = vld [vmem:[%s4254_s4 + $0xa8] sm:$0xff]   ;;  %s365_s15 = scalar_select %p364_p7, %s3403_s18, 2 }
  0x14   : > { %4285 = vst [vmem:[#allocation3_spill] sm:$0xff] %v3334_v3  ;;  %2569 = vmatpush3.bf16.msra.mxu1 %v3334_v3  ;;  %2548 = vmatprep.subr.bf16.mxu0 %v3340_v4  ;;  %v3388_v12 = vld [vmem:[%s4254_s4 + $0x60] sm:$0xff]   ;;  %v3415_v16 = vld [vmem:[%s4254_s4 + $0x58] sm:$0xff]   ;;  %v3440_v20 = vld [vmem:[%s4254_s4 + $0x50] sm:$0xff]  }
  0x15   : > { %2570 = vmatprep.subr.bf16.mxu1 %v3346_v5  ;;  %v3394_v13 = vld [vmem:[%s4254_s4 + $0xe0] sm:$0xff]   ;;  %v3421_v17 = vld [vmem:[%s4254_s4 + $0xd8] sm:$0xff]   ;;  %4287 = vst [vmem:[#allocation5_spill] sm:$0xff] %v3440_v20  ;;  %v3446_v21 = vld [vmem:[%s4254_s4 + $0xd0] sm:$0xff]   ;;  %s3473_s7 = smul.u32 40, %s365_s15  ;;  %s4216_s15 = scalar_lea.vmem (%p3310_p4), %s4256_s6, %s2538_s13  }
  0x16   : > { %v3400_v14 = vld [vmem:[%s4254_s4 + $0x20] sm:$0xff]   ;;  %v3428_v18 = vld [vmem:[%s4254_s4 + $0x18] sm:$0xff]   ;;  %v3453_v22 = vld [vmem:[%s4254_s4 + $0x10] sm:$0xff]  }
  0x17   : > { %2549 = vmatpush3.bf16.msra.mxu0 %v3352_v6  ;;  %v3409_v15 = vld [vmem:[%s4254_s4 + $0xa0] sm:$0xff]   ;;  %v3434_v19 = vld [vmem:[%s4254_s4 + $0x98] sm:$0xff]   ;;  %4288 = vst [vmem:[#allocation6_spill] sm:$0xff] %v3453_v22  ;;  %v3459_v23 = vld [vmem:[%s4254_s4 + $0x90] sm:$0xff]   ;;  %s3503_s19 = scalar_lea.vmem %s4250_s0, %s3473_s7  ;;  %s3739_s17 = scalar_lea.vmem %s4251_s1, %s3473_s7 }
  0x18   : > { %2571 = vmatpush3.bf16.msra.mxu1 %v3358_v7  ;;  %2550 = vmatprep.subr.bf16.mxu0 %v3364_v8  ;;  %v3465_v24 = vld [vmem:[%s4254_s4 + $0x48] sm:$0xff]   ;;  %v3491_v28 = vld [vmem:[%s4254_s4 + $0x40] sm:$0xff]   ;;  %v3526_v36 = vld [vmem:[%s4254_s4 + $0x178] sm:$0xff]   ;;  %s3775_s11 = scalar_lea.vmem %s4252_s2, %s3473_s7  ;;  %s3889_s12 = scalar_lea.vmem %s4253_s3, %s3473_s7 }
  0x19   : > { %2572 = vmatprep.subr.bf16.mxu1 %v3370_v9  ;;  %4289 = vst [vmem:[#allocation7_spill] sm:$0xff] %v3465_v24  ;;  %v3471_v25 = vld [vmem:[%s4254_s4 + $0xc8] sm:$0xff]   ;;  %4291 = vst [vmem:[#allocation9_spill] sm:$0xff] %v3491_v28  ;;  %v3497_v29 = vld [vmem:[%s4254_s4 + $0xc0] sm:$0xff]  }
  0x1a   : > { %v3479_v26 = vld [vmem:[%s4254_s4 + $0x8] sm:$0xff]   ;;  %v3509_v30 = vld [vmem:[%s4254_s4] sm:$0xff]   ;;  %v3531_v37 = vld [vmem:[%s4254_s4 + $0x1f8] sm:$0xff]  }
  0x1b   : > { %2551 = vmatpush3.bf16.msra.mxu0 %v3376_v10  ;;  %4290 = vst [vmem:[#allocation8_spill] sm:$0xff] %v3479_v26  ;;  %v3485_v27 = vld [vmem:[%s4254_s4 + $0x88] sm:$0xff]   ;;  %4292 = vst [vmem:[#allocation10_spill] sm:$0xff] %v3509_v30  ;;  %v3515_v31 = vld [vmem:[%s4254_s4 + $0x80] sm:$0xff]  }
  0x1c   : > { %2573 = vmatpush3.bf16.msra.mxu1 %v3382_v11  ;;  %2552 = vmatprep.subr.bf16.mxu0 %v3388_v12  ;;  %v3020_v32 = vld [vmem:[%s3503_s19] ss:$40 sps:$4 sm:$0xff]   ;;  %v3022_v33 = vld [vmem:[%s3503_s19 + $0x4] ss:$40 sps:$4 sm:$0xff]   ;;  %v3537_v38 = vld [vmem:[%s4254_s4 + $0x138] sm:$0xff]  }
  0x1d   : > { %2574 = vmatprep.subr.bf16.mxu1 %v3394_v13  ;;  %v3023_v34 = vld [vmem:[%s3503_s19 + $0x8] ss:$40 sps:$4 sm:$0xff]   ;;  %v3025_v35 = vld [vmem:[%s3503_s19 + $0xc] ss:$40 sps:$4 sm:$0xff]   ;;  %1127 = vmatprep.mubr.bf16.mxu0 %v3022_v33  ;;  %v3543_v39 = vld [vmem:[%s4254_s4 + $0x1b8] sm:$0xff]  }
  0x1e   : > { %1168 = vmatprep.mubr.bf16.mxu1 %v3025_v35  ;;  %v3549_v40 = vld [vmem:[%s4254_s4 + $0x170] sm:$0xff]   ;;  %v3573_v44 = vld [vmem:[%s4254_s4 + $0x168] sm:$0xff]   ;;  %v3597_v48 = vld [vmem:[%s4254_s4 + $0x160] sm:$0xff]  }
  0x1f   : > { %2553 = vmatpush3.bf16.msra.mxu0 %v3400_v14  ;;  %v3555_v41 = vld [vmem:[%s4254_s4 + $0x1f0] sm:$0xff]   ;;  %v3579_v45 = vld [vmem:[%s4254_s4 + $0x1e8] sm:$0xff]   ;;  %v3603_v49 = vld [vmem:[%s4254_s4 + $0x1e0] sm:$0xff]  }
  0x20   : > { %2575 = vmatpush3.bf16.msra.mxu1 %v3409_v15  ;;  %2554 = vmatprep.subr.bf16.mxu0 %v3415_v16  ;;  %v3561_v42 = vld [vmem:[%s4254_s4 + $0x130] sm:$0xff]   ;;  %v3585_v46 = vld [vmem:[%s4254_s4 + $0x128] sm:$0xff]   ;;  %v3609_v50 = vld [vmem:[%s4254_s4 + $0x120] sm:$0xff]  }
  0x21   : > { %2576 = vmatprep.subr.bf16.mxu1 %v3421_v17  ;;  %v3567_v43 = vld [vmem:[%s4254_s4 + $0x1b0] sm:$0xff]   ;;  %v3591_v47 = vld [vmem:[%s4254_s4 + $0x1a8] sm:$0xff]   ;;  %v3615_v51 = vld [vmem:[%s4254_s4 + $0x1a0] sm:$0xff]  }
  0x22   : > { %4293 = vst [vmem:[#allocation11_spill] sm:$0xff] %v3591_v47  ;;  %v3621_v52 = vld [vmem:[%s4254_s4 + $0x158] sm:$0xff]   ;;  %v3645_v56 = vld [vmem:[%s4254_s4 + $0x150] sm:$0xff]   ;;  %v3669_v60 = vld [vmem:[%s4254_s4 + $0x148] sm:$0xff]  }
  0x23   : > { %2555 = vmatpush3.bf16.msra.mxu0 %v3428_v18  ;;  %v3627_v53 = vld [vmem:[%s4254_s4 + $0x1d8] sm:$0xff]   ;;  %v3651_v57 = vld [vmem:[%s4254_s4 + $0x1d0] sm:$0xff]   ;;  %v3675_v61 = vld [vmem:[%s4254_s4 + $0x1c8] sm:$0xff]  }
  0x24   : > { %2577 = vmatpush3.bf16.msra.mxu1 %v3434_v19  ;;  %2556 = vmatprep.subr.bf16.mxu0 %v3440_v20  ;;  %4294 = vst [vmem:[#allocation12_spill] sm:$0xff] %v3627_v53  ;;  %v3633_v54 = vld [vmem:[%s4254_s4 + $0x118] sm:$0xff]   ;;  %4296 = vst [vmem:[#allocation14_spill] sm:$0xff] %v3651_v57  ;;  %v3657_v58 = vld [vmem:[%s4254_s4 + $0x110] sm:$0xff]  }
  0x25   : > { %2578 = vmatprep.subr.bf16.mxu1 %v3446_v21  ;;  %v3639_v55 = vld [vmem:[%s4254_s4 + $0x198] sm:$0xff]   ;;  %v3663_v59 = vld [vmem:[%s4254_s4 + $0x190] sm:$0xff]   ;;  %4298 = vst [vmem:[#allocation16_spill] sm:$0xff] %v3675_v61  ;;  %v3681_v62 = vld [vmem:[%s4254_s4 + $0x108] sm:$0xff]  }
  0x26   : > { %4295 = vst [vmem:[#allocation13_spill] sm:$0xff] %v3639_v55  ;;  %4297 = vst [vmem:[#allocation15_spill] sm:$0xff] %v3663_v59  ;;  %v3687_v63 = vld [vmem:[%s4254_s4 + $0x188] sm:$0xff]   ;;  %v3699_v33 = vld [vmem:[%s4254_s4 + $0x1c0] sm:$0xff]  }
  0x27   : > { %2557 = vmatpush3.bf16.msra.mxu0 %v3453_v22  ;;  %4299 = vst [vmem:[#allocation17_spill] sm:$0xff] %v3687_v63  ;;  %4300 = vst [vmem:[#allocation18_spill] sm:$0xff] %v3699_v33  ;;  %v3711_v35 = vld [vmem:[%s4254_s4 + $0x180] sm:$0xff]  }
  0x28   : > { %2579 = vmatpush3.bf16.msra.mxu1 %v3459_v23  ;;  %2558 = vmatprep.subr.bf16.mxu0 %v3465_v24  ;;  %4301 = vst [vmem:[#allocation19_spill] sm:$0xff] %v3711_v35 }
  0x29   : > { %2580 = vmatprep.subr.bf16.mxu1 %v3471_v25 }
  0x2b   : > { %2559 = vmatpush3.bf16.msra.mxu0 %v3479_v26 }
  0x2c   : > { %2581 = vmatpush3.bf16.msra.mxu1 %v3485_v27  ;;  %2560 = vmatprep.subr.bf16.mxu0 %v3491_v28 }
  0x2d   : > { %2582 = vmatprep.subr.bf16.mxu1 %v3497_v29 }
  0x2f   : > { %2561 = vmatpush3.bf16.msra.mxu0 %v3509_v30 }
  0x30   : > { %2583 = vmatpush3.bf16.msra.mxu1 %v3515_v31  ;;  %2590 = vmatprep.subr.bf16.mxu0 %v3526_v36 }
  0x31   : > { %2612 = vmatprep.subr.bf16.mxu1 %v3531_v37 }
  0x32   : > { %1128 = vmatmul.mubr.bf16.vlgmr.msra.gmra.mxu0 %v3020_v32  ;;  %v3693_v32 = vld [vmem:[%s4254_s4 + $0x140] sm:$0xff]  }
  0x33   : > { %1169 = vmatmul.mubr.bf16.vlgmr.msra.gmra.mxu1 %v3023_v34  ;;  %2591 = vmatpush3.bf16.msra.mxu0 %v3537_v38  ;;  %v3705_v34 = vld [vmem:[%s4254_s4 + $0x100] sm:$0xff]  }
  0x34   : > { %2613 = vmatpush3.bf16.msra.mxu1 %v3543_v39  ;;  %2592 = vmatprep.subr.bf16.mxu0 %v3549_v40 }
  0x35   : > { %2614 = vmatprep.subr.bf16.mxu1 %v3555_v41 }
  0x37   : > { %2593 = vmatpush3.bf16.msra.mxu0 %v3561_v42 }
  0x38   : > { %2615 = vmatpush3.bf16.msra.mxu1 %v3567_v43  ;;  %2594 = vmatprep.subr.bf16.mxu0 %v3573_v44 }
  0x39   : > { %2616 = vmatprep.subr.bf16.mxu1 %v3579_v45 }
  0x3b   : > { %2595 = vmatpush3.bf16.msra.mxu0 %v3585_v46 }
  0x3c   : > { %2617 = vmatpush3.bf16.msra.mxu1 %v3591_v47  ;;  %2596 = vmatprep.subr.bf16.mxu0 %v3597_v48 }
  0x3d   : > { %2618 = vmatprep.subr.bf16.mxu1 %v3603_v49 }
  0x3f   : > { %2597 = vmatpush3.bf16.msra.mxu0 %v3609_v50 }
  0x40   : > { %2619 = vmatpush3.bf16.msra.mxu1 %v3615_v51  ;;  %2598 = vmatprep.subr.bf16.mxu0 %v3621_v52 }
  0x41   : > { %2620 = vmatprep.subr.bf16.mxu1 %v3627_v53 }
  0x43   : > { %2599 = vmatpush3.bf16.msra.mxu0 %v3633_v54 }
  0x44   : > { %2621 = vmatpush3.bf16.msra.mxu1 %v3639_v55  ;;  %2600 = vmatprep.subr.bf16.mxu0 %v3645_v56  ;;  %v3063_v55 = vld [vmem:[%s3503_s19 + $0x1c] ss:$40 sps:$4 sm:$0xff]  }
  0x45   : > { %2622 = vmatprep.subr.bf16.mxu1 %v3651_v57  ;;  %v3249_v57 = vmov 0   ;;  %1250 = vmatprep.mubr.bf16.mxu1 %v3063_v55  ;;  %v3745_v55 = vld [vmem:[%s4254_s4 + $0x228] sm:$0xff]  }
  0x46   : > { %4302 = vst [vmem:[#allocation20_spill] sm:$0xff] %v3745_v55 }
  0x47   : > { %2601 = vmatpush3.bf16.msra.mxu0 %v3657_v58 }
  0x48   : > { %2623 = vmatpush3.bf16.msra.mxu1 %v3663_v59  ;;  %2602 = vmatprep.subr.bf16.mxu0 %v3669_v60  ;;  %v3061_v59 = vld [vmem:[%s3503_s19 + $0x18] ss:$40 sps:$4 sm:$0xff]  }
  0x49   : > { %2624 = vmatprep.subr.bf16.mxu1 %v3675_v61  ;;  %v3060_v61 = vld [vmem:[%s3503_s19 + $0x14] ss:$40 sps:$4 sm:$0xff]  }
  0x4a   : > { %1209 = vmatprep.mubr.bf16.mxu0 %v3060_v61  ;;  %v3755_v61 = vld [vmem:[%s4254_s4 + $0x220] sm:$0xff]  }
  0x4b   : > { %2603 = vmatpush3.bf16.msra.mxu0 %v3681_v62 }
  0x4c   : > { %2625 = vmatpush3.bf16.msra.mxu1 %v3687_v63  ;;  %2604 = vmatprep.subr.bf16.mxu0 %v3693_v32  ;;  %v3058_v63 = vld [vmem:[%s3503_s19 + $0x10] ss:$40 sps:$4 sm:$0xff]  }
  0x4d   : > { %2626 = vmatprep.subr.bf16.mxu1 %v3699_v33  ;;  %v3724_v33 = vld [vmem:[%s4254_s4 + $0x238] sm:$0xff]  }
  0x4f   : > { %2605 = vmatpush3.bf16.msra.mxu0 %v3705_v34 }
  0x50   : > { %2627 = vmatpush3.bf16.msra.mxu1 %v3711_v35  ;;  %1259 = vmatprep.subr.bf16.mxu0 %v3249_v57  ;;  %v3730_v35 = vld [vmem:[%s4254_s4 + $0x230] sm:$0xff]  }
  0x51   : > { %2634 = vmatprep.subr.bf16.mxu1 %v3317_v0 }
  0x52   : > { %1210 = vmatmul.mubr.bf16.vlgmr.msra.gmra.mxu0 %v3058_v63  ;;  %v3078_v63 = vld [vmem:[%s3503_s19 + $0x24] ss:$40 sps:$4 sm:$0xff]  }
  0x53   : > { %1251 = vmatmul.mubr.bf16.vlgmr.msra.gmra.mxu1 %v3061_v59  ;;  %1260 = vmatpush1.bf16.msra.mxu0 %v3724_v33  ;;  %v3074_v59 = vld [vmem:[%s3739_s17 + $0x4] ss:$40 sps:$4 sm:$0xff]  }
  0x54   : > { %2635 = vmatpush3.bf16.msra.mxu1 %v3328_v2  ;;  %1261 = vmatprep.subr.bf16.mxu0 %v3249_v57 }
  0x55   : > { %2636 = vmatprep.subr.bf16.mxu1 %v3340_v4  ;;  %1394 = vmatprep.mubr.bf16.mxu1 %v3074_v59  ;;  %v3781_v59 = vld [vmem:[%s4254_s4 + $0x210] sm:$0xff]  }
  0x56   : > { %2482 = vmatprep.mubr.msk.bf16.mxu0 %vm1091_vm0, %v3078_v63  ;;  %v3790_v63 = vld [vmem:[%s4254_s4 + $0x208] sm:$0xff]  }
  0x57   : > { %1262 = vmatpush1.bf16.msra.mxu0 %v3730_v35 }
  0x58   : > { %2637 = vmatpush3.bf16.msra.mxu1 %v3352_v6  ;;  %1263 = vmatprep.subr.bf16.mxu0 %v3249_v57 }
  0x59   : > { %2638 = vmatprep.subr.bf16.mxu1 %v3364_v8  ;;  %v3765_v8 = vld [vmem:[%s4254_s4 + $0x218] sm:$0xff]  }
  0x5b   : > { %1264 = vmatpush1.bf16.msra.mxu0 %v3745_v55 }
  0x5c   : > { %2639 = vmatpush3.bf16.msra.mxu1 %v3376_v10  ;;  %1265 = vmatprep.subr.bf16.mxu0 %v3249_v57 }
  0x5d   : > { %2640 = vmatprep.subr.bf16.mxu1 %v3388_v12 }
  0x5f   : > { %1266 = vmatpush1.bf16.msra.mxu0 %v3755_v61 }
  0x60   : > { %2641 = vmatpush3.bf16.msra.mxu1 %v3400_v14  ;;  %1267 = vmatprep.subr.bf16.mxu0 %v3249_v57 }
  0x61   : > { %2642 = vmatprep.subr.bf16.mxu1 %v3415_v16 }
  0x63   : > { %1268 = vmatpush1.bf16.msra.mxu0 %v3765_v8 }
  0x64   : > { %2643 = vmatpush3.bf16.msra.mxu1 %v3428_v18  ;;  %1269 = vmatprep.subr.bf16.mxu0 %v3249_v57 }
  0x65   : > { %2644 = vmatprep.subr.bf16.mxu1 %v3440_v20  ;;  %v3799_v20 = vld [vmem:[%s4254_s4 + $0x200] sm:$0xff]  }
  0x67   : > { %1270 = vmatpush1.bf16.msra.mxu0 %v3781_v59 }
  0x68   : > { %2645 = vmatpush3.bf16.msra.mxu1 %v3453_v22  ;;  %1271 = vmatprep.subr.bf16.mxu0 %v3249_v57  ;;  %v3072_v22 = vld [vmem:[%s3739_s17] ss:$40 sps:$4 sm:$0xff]  }
  0x69   : > { %2646 = vmatprep.subr.bf16.mxu1 %v3465_v24  ;;  %v3809_v24 = vld [vmem:[%s4254_s4 + $0x250] sm:$0xff]  }
  0x6b   : > { %1272 = vmatpush1.bf16.msra.mxu0 %v3790_v63 }
  0x6c   : > { %2647 = vmatpush3.bf16.msra.mxu1 %v3479_v26  ;;  %1273 = vmatprep.subr.bf16.mxu0 %v3249_v57  ;;  %v3083_v26 = vld [vmem:[%s3739_s17 + $0xc] ss:$40 sps:$4 sm:$0xff]  }
  0x6d   : > { %2648 = vmatprep.subr.bf16.mxu1 %v3491_v28  ;;  %v3819_v28 = vld [vmem:[%s4254_s4 + $0x248] sm:$0xff]  }
  0x6f   : > { %1274 = vmatpush1.bf16.msra.mxu0 %v3799_v20 }
  0x70   : > { %2649 = vmatpush3.bf16.msra.mxu1 %v3509_v30  ;;  %1285 = vmatprep.subr.bf16.mxu0 %v3249_v57  ;;  %v3828_v30 = vld [vmem:[%s4254_s4 + $0x240] sm:$0xff]  }
  0x71   : > { %2656 = vmatprep.subr.bf16.mxu1 %v3322_v1 }
  0x73   : > { %1286 = vmatpush2.bf16.msra.mxu0 %v3809_v24  ;;  %1395 = vmatmul.mubr.bf16.vlgmr.msra.gmra.mxu1 %v3072_v22  ;;  %v3080_v22 = vld [vmem:[%s3503_s19 + $0x20] ss:$40 sps:$4 sm:$0xff]   ;;  %s355_s19 = sand.u32 1, %s3207_s21  }
  0x74   : > { %2657 = vmatpush3.bf16.msra.mxu1 %v3334_v3  ;;  %1287 = vmatprep.subr.bf16.mxu0 %v3249_v57  ;;  %v3086_v3 = vld [vmem:[%s3739_s17 + $0x14] ss:$40 sps:$4 sm:$0xff]   ;;  %s2388_s10 = sshll.u32 %s355_s19, 3 }
  0x75   : > { %2658 = vmatprep.subr.bf16.mxu1 %v3346_v5  ;;  %1435 = vmatprep.mubr.bf16.mxu1 %v3083_v26  ;;  %v3089_v26 = vld [vmem:[%s3739_s17 + $0x1c] ss:$40 sps:$4 sm:$0xff]   ;;  %s4206_s7 = scalar_lea.vmem [#allocation2], %s2388_s10  }
  0x77   : > { %1288 = vmatpush2.bf16.msra.mxu0 %v3819_v28 }
  0x78   : > { %2659 = vmatpush3.bf16.msra.mxu1 %v3358_v7  ;;  %1289 = vmatprep.subr.bf16.mxu0 %v3249_v57 }
  0x79   : > { %2660 = vmatprep.subr.bf16.mxu1 %v3370_v9 }
  0x7b   : > { %1290 = vmatpush2.bf16.msra.mxu0 %v3828_v30 }
  0x7c   : > { %2661 = vmatpush3.bf16.msra.mxu1 %v3382_v11  ;;  %2678 = vmatprep.subr.bf16.mxu0 %v3526_v36 }
  0x7d   : > { %2662 = vmatprep.subr.bf16.mxu1 %v3394_v13 }
  0x7e   : > { %1292 = vmatmul.mubr.bf16.vlgmr.msra.gmra.mxu0 %v3080_v22  ;;  %v3084_v22 = vld [vmem:[%s3739_s17 + $0x10] ss:$40 sps:$4 sm:$0xff]  }
  0x7f   : > { %2679 = vmatpush3.bf16.msra.mxu0 %v3537_v38  ;;  %1476 = vmatprep.mubr.bf16.mxu0 %v3086_v3  ;;  %v3081_v3 = vld [vmem:[%s3739_s17 + $0x8] ss:$40 sps:$4 sm:$0xff]  }
  0x80   : > { %2663 = vmatpush3.bf16.msra.mxu1 %v3409_v15  ;;  %2680 = vmatprep.subr.bf16.mxu0 %v3549_v40 }
  0x81   : > { %2664 = vmatprep.subr.bf16.mxu1 %v3421_v17 }
  0x83   : > { %2681 = vmatpush3.bf16.msra.mxu0 %v3561_v42 }
  0x84   : > { %2665 = vmatpush3.bf16.msra.mxu1 %v3434_v19  ;;  %2682 = vmatprep.subr.bf16.mxu0 %v3573_v44 }
  0x85   : > { %2666 = vmatprep.subr.bf16.mxu1 %v3446_v21 }
  0x87   : > { %2683 = vmatpush3.bf16.msra.mxu0 %v3585_v46 }
  0x88   : > { %2667 = vmatpush3.bf16.msra.mxu1 %v3459_v23  ;;  %2684 = vmatprep.subr.bf16.mxu0 %v3597_v48 }
  0x89   : > { %2668 = vmatprep.subr.bf16.mxu1 %v3471_v25 }
  0x8b   : > { %2685 = vmatpush3.bf16.msra.mxu0 %v3609_v50 }
  0x8c   : > { %2669 = vmatpush3.bf16.msra.mxu1 %v3485_v27  ;;  %2686 = vmatprep.subr.bf16.mxu0 %v3621_v52 }
  0x8d   : > { %2670 = vmatprep.subr.bf16.mxu1 %v3497_v29 }
  0x8f   : > { %2687 = vmatpush3.bf16.msra.mxu0 %v3633_v54 }
  0x90   : > { %2671 = vmatpush3.bf16.msra.mxu1 %v3515_v31  ;;  %2688 = vmatprep.subr.bf16.mxu0 %v3645_v56 }
  0x91   : > { %2700 = vmatprep.subr.bf16.mxu1 %v3531_v37 }
  0x93   : > { %1436 = vmatmul.mubr.bf16.vlgmr.msra.gmra.mxu1 %v3081_v3  ;;  %2689 = vmatpush3.bf16.msra.mxu0 %v3657_v58  ;;  %v3090_v3 = vld [vmem:[%s3739_s17 + $0x24] ss:$40 sps:$4 sm:$0xff]  }
  0x94   : > { %2701 = vmatpush3.bf16.msra.mxu1 %v3543_v39  ;;  %2690 = vmatprep.subr.bf16.mxu0 %v3669_v60 }
  0x95   : > { %2702 = vmatprep.subr.bf16.mxu1 %v3555_v41  ;;  %1517 = vmatprep.mubr.bf16.mxu1 %v3089_v26  ;;  %v4303_v26 = vld [vmem:[#allocation13_spill] sm:$0xff] }
  0x97   : > { %2691 = vmatpush3.bf16.msra.mxu0 %v3681_v62 }
  0x98   : > { %2703 = vmatpush3.bf16.msra.mxu1 %v3567_v43  ;;  %2692 = vmatprep.subr.bf16.mxu0 %v3693_v32 }
  0x99   : > { %2704 = vmatprep.subr.bf16.mxu1 %v3579_v45 }
  0x9b   : > { %2693 = vmatpush3.bf16.msra.mxu0 %v3705_v34 }
  0x9c   : > { %2705 = vmatpush3.bf16.msra.mxu1 %v3591_v47  ;;  %1526 = vmatprep.subr.bf16.mxu0 %v3249_v57  ;;  %v4304_v47 = vld [vmem:[#allocation14_spill] sm:$0xff] }
  0x9d   : > { %2706 = vmatprep.subr.bf16.mxu1 %v3603_v49 }
  0x9e   : > { %1477 = vmatmul.mubr.bf16.vlgmr.msra.gmra.mxu0 %v3084_v22  ;;  %v4305_v22 = vld [vmem:[#allocation15_spill] sm:$0xff] }
  0x9f   : > { %1527 = vmatpush1.bf16.msra.mxu0 %v3724_v33  ;;  %2493 = vmatprep.mubr.msk.bf16.mxu0 %vm1091_vm0, %v3090_v3  ;;  %v4306_v3 = vld [vmem:[#allocation16_spill] sm:$0xff] }
  0xa0   : > { %2707 = vmatpush3.bf16.msra.mxu1 %v3615_v51  ;;  %1528 = vmatprep.subr.bf16.mxu0 %v3249_v57 }
  0xa1   : > { %2708 = vmatprep.subr.bf16.mxu1 %v3627_v53  ;;  %v4309_v53 = vld [vmem:[#allocation19_spill] sm:$0xff] }
  0xa3   : > { %1529 = vmatpush1.bf16.msra.mxu0 %v3730_v35 }
  0xa4   : > { %2709 = vmatpush3.bf16.msra.mxu1 %v4303_v26  ;;  %1530 = vmatprep.subr.bf16.mxu0 %v3249_v57  ;;  %v4307_v26 = vld [vmem:[#allocation17_spill] sm:$0xff] }
  0xa5   : > { %2710 = vmatprep.subr.bf16.mxu1 %v4304_v47  ;;  %v4308_v47 = vld [vmem:[#allocation18_spill] sm:$0xff] }
  0xa7   : > { %1531 = vmatpush1.bf16.msra.mxu0 %v3745_v55  ;;  %v3087_v55 = vld [vmem:[%s3739_s17 + $0x18] ss:$40 sps:$4 sm:$0xff]  }
  0xa8   : > { %2711 = vmatpush3.bf16.msra.mxu1 %v4305_v22  ;;  %1532 = vmatprep.subr.bf16.mxu0 %v3249_v57  ;;  %v3095_v22 = vld [vmem:[%s3775_s11 + $0x4] ss:$40 sps:$4 sm:$0xff]  }
  0xa9   : > { %2712 = vmatprep.subr.bf16.mxu1 %v4306_v3 }
  0xab   : > { %1533 = vmatpush1.bf16.msra.mxu0 %v3755_v61 }
  0xac   : > { %2713 = vmatpush3.bf16.msra.mxu1 %v4307_v26  ;;  %1534 = vmatprep.subr.bf16.mxu0 %v3249_v57 }
  0xad   : > { %2714 = vmatprep.subr.bf16.mxu1 %v4308_v47 }
  0xaf   : > { %1535 = vmatpush1.bf16.msra.mxu0 %v3765_v8 }
  0xb0   : > { %2715 = vmatpush3.bf16.msra.mxu1 %v4309_v53  ;;  %1536 = vmatprep.subr.bf16.mxu0 %v3249_v57  ;;  %v4310_v53 = vld [vmem:[#allocation4_spill] sm:$0xff] }
  0xb1   : > { %2722 = vmatprep.subr.bf16.mxu1 %v3317_v0  ;;  %v4311_v0 = vld [vmem:[#allocation5_spill] sm:$0xff] }
  0xb3   : > { %1518 = vmatmul.mubr.bf16.vlgmr.msra.gmra.mxu1 %v3087_v55  ;;  %1537 = vmatpush1.bf16.msra.mxu0 %v3781_v59 }
  0xb4   : > { %2723 = vmatpush3.bf16.msra.mxu1 %v3328_v2  ;;  %1538 = vmatprep.subr.bf16.mxu0 %v3249_v57  ;;  %v3092_v2 = vld [vmem:[%s3739_s17 + $0x20] ss:$40 sps:$4 sm:$0xff]   ;;  %s2136_s17 = ssub.s32 (%p3310_p4), 3, %s3403_s18 }
  0xb5   : > { %2724 = vmatprep.subr.bf16.mxu1 %v3340_v4  ;;  %1663 = vmatprep.mubr.bf16.mxu1 %v3095_v22  ;;  %v3098_v4 = vld [vmem:[%s3775_s11 + $0xc] ss:$40 sps:$4 sm:$0xff]   ;;  %v4320_v22 = vld [vmem:[#allocation13_spill] sm:$0xff]  ;;  %p2137_p8 = scmp.lt.s32.totalorder (%p3310_p4), %s2136_s17, 2 }
  0xb7   : > { %1539 = vmatpush1.bf16.msra.mxu0 %v3790_v63 }
  0xb8   : > { %2725 = vmatpush3.bf16.msra.mxu1 %v3352_v6  ;;  %1540 = vmatprep.subr.bf16.mxu0 %v3249_v57  ;;  %v4312_v6 = vld [vmem:[#allocation6_spill] sm:$0xff] }
  0xb9   : > { %2726 = vmatprep.subr.bf16.mxu1 %v4310_v53  ;;  %v4317_v53 = vld [vmem:[#allocation10_spill] sm:$0xff] }
  0xbb   : > { %1541 = vmatpush1.bf16.msra.mxu0 %v3799_v20 }
  0xbc   : > { %2727 = vmatpush3.bf16.msra.mxu1 %v3376_v10  ;;  %1552 = vmatprep.subr.bf16.mxu0 %v3249_v57  ;;  %v4313_v10 = vld [vmem:[#allocation7_spill] sm:$0xff] }
  0xbd   : > { %2728 = vmatprep.subr.bf16.mxu1 %v3388_v12  ;;  %v4314_v12 = vld [vmem:[#allocation3_spill] sm:$0xff] }
  0xbf   : > { %1553 = vmatpush2.bf16.msra.mxu0 %v3809_v24 }
  0xc0   : > { %2729 = vmatpush3.bf16.msra.mxu1 %v3400_v14  ;;  %1554 = vmatprep.subr.bf16.mxu0 %v3249_v57  ;;  %v4315_v14 = vld [vmem:[#allocation8_spill] sm:$0xff] }
  0xc1   : > { %2730 = vmatprep.subr.bf16.mxu1 %v3415_v16  ;;  %v4316_v16 = vld [vmem:[#allocation9_spill] sm:$0xff] }
  0xc3   : > { %1555 = vmatpush2.bf16.msra.mxu0 %v3819_v28 }
  0xc4   : > { %2731 = vmatpush3.bf16.msra.mxu1 %v3428_v18  ;;  %1556 = vmatprep.subr.bf16.mxu0 %v3249_v57  ;;  %v3093_v18 = vld [vmem:[%s3775_s11] ss:$40 sps:$4 sm:$0xff]  }
  0xc5   : > { %2732 = vmatprep.subr.bf16.mxu1 %v4311_v0  ;;  %v4321_v0 = vld [vmem:[#allocation20_spill] sm:$0xff] }
  0xc7   : > { %1557 = vmatpush2.bf16.msra.mxu0 %v3828_v30 }
  0xc8   : > { %2733 = vmatpush3.bf16.msra.mxu1 %v4312_v6  ;;  %2744 = vmatprep.subr.bf16.mxu0 %v3322_v1  ;;  %v3101_v1 = vld [vmem:[%s3775_s11 + $0x14] ss:$40 sps:$4 sm:$0xff]   ;;  %v3102_v6 = vld [vmem:[%s3775_s11 + $0x18] ss:$40 sps:$4 sm:$0xff]  }
  0xc9   : > { %2734 = vmatprep.subr.bf16.mxu1 %v4313_v10  ;;  %v4324_v10 = vld [vmem:[#allocation19_spill] sm:$0xff] }
  0xca   : > { %1559 = vmatmul.mubr.bf16.vlgmr.msra.gmra.mxu0 %v3092_v2  ;;  %v4322_v2 = vld [vmem:[#allocation14_spill] sm:$0xff] }
  0xcb   : > { %2745 = vmatpush3.bf16.msra.mxu0 %v4314_v12  ;;  %1704 = vmatprep.mubr.bf16.mxu0 %v3098_v4  ;;  %v4323_v4 = vld [vmem:[#allocation15_spill] sm:$0xff]  ;;  %v3110_v12 = vld [vmem:[%s3889_s12 + $0x4] ss:$40 sps:$4 sm:$0xff]  }
  0xcc   : > { %2735 = vmatpush3.bf16.msra.mxu1 %v4315_v14  ;;  %2746 = vmatprep.subr.bf16.mxu0 %v3346_v5  ;;  %v3096_v5 = vld [vmem:[%s3775_s11 + $0x8] ss:$40 sps:$4 sm:$0xff]   ;;  %v3123_v14 = vld [vmem:[%s4254_s4 + $0x78] sm:$0xff]  }
  0xcd   : > { %2736 = vmatprep.subr.bf16.mxu1 %v4316_v16  ;;  %v3124_v16 = vld [vmem:[%s4254_s4 + $0x38] sm:$0xff]  }
  0xcf   : > { %2747 = vmatpush3.bf16.msra.mxu0 %v3358_v7  ;;  %v3104_v7 = vld [vmem:[%s3775_s11 + $0x1c] ss:$40 sps:$4 sm:$0xff]  }
  0xd0   : > { %2737 = vmatpush3.bf16.msra.mxu1 %v4317_v53  ;;  %2748 = vmatprep.subr.bf16.mxu0 %v3370_v9  ;;  %v3099_v9 = vld [vmem:[%s3775_s11 + $0x10] ss:$40 sps:$4 sm:$0xff]  }
  0xd1   : > { %2766 = vmatprep.subr.bf16.mxu1 %v3526_v36  ;;  %v3126_v53 = vld [vmem:[%s4254_s4 + $0x30] sm:$0xff]  }
  0xd3   : > { %1664 = vmatmul.mubr.bf16.vlgmr.msra.gmra.mxu1 %v3093_v18  ;;  %2749 = vmatpush3.bf16.msra.mxu0 %v3382_v11  ;;  %v3125_v18 = vld [vmem:[%s4254_s4 + $0x70] sm:$0xff]  }
  0xd4   : > { %2767 = vmatpush3.bf16.msra.mxu1 %v3537_v38  ;;  %2750 = vmatprep.subr.bf16.mxu0 %v3394_v13 }
  0xd5   : > { %2768 = vmatprep.subr.bf16.mxu1 %v3549_v40  ;;  %1745 = vmatprep.mubr.bf16.mxu1 %v3101_v1  ;;  %v3127_v1 = vld [vmem:[%s4254_s4 + $0x68] sm:$0xff]  }
  0xd7   : > { %2751 = vmatpush3.bf16.msra.mxu0 %v3409_v15 }
  0xd8   : > { %2769 = vmatpush3.bf16.msra.mxu1 %v3561_v42  ;;  %2752 = vmatprep.subr.bf16.mxu0 %v3421_v17  ;;  %v3105_v17 = vld [vmem:[%s3775_s11 + $0x24] ss:$40 sps:$4 sm:$0xff]  }
  0xd9   : > { %2770 = vmatprep.subr.bf16.mxu1 %v3573_v44 }
  0xdb   : > { %2753 = vmatpush3.bf16.msra.mxu0 %v3434_v19 }
  0xdc   : > { %2771 = vmatpush3.bf16.msra.mxu1 %v3585_v46  ;;  %2754 = vmatprep.subr.bf16.mxu0 %v3446_v21 }
  0xdd   : > { %2772 = vmatprep.subr.bf16.mxu1 %v3597_v48 }
  0xdf   : > { %2755 = vmatpush3.bf16.msra.mxu0 %v3459_v23  ;;  %v4318_v23 = vld [vmem:[#allocation11_spill] sm:$0xff] }
  0xe0   : > { %2773 = vmatpush3.bf16.msra.mxu1 %v3609_v50  ;;  %2756 = vmatprep.subr.bf16.mxu0 %v3471_v25 }
  0xe1   : > { %2774 = vmatprep.subr.bf16.mxu1 %v3621_v52 }
  0xe3   : > { %2757 = vmatpush3.bf16.msra.mxu0 %v3485_v27 }
  0xe4   : > { %2775 = vmatpush3.bf16.msra.mxu1 %v3633_v54  ;;  %2758 = vmatprep.subr.bf16.mxu0 %v3497_v29 }
  0xe5   : > { %2776 = vmatprep.subr.bf16.mxu1 %v3645_v56 }
  0xe7   : > { %2759 = vmatpush3.bf16.msra.mxu0 %v3515_v31 }
  0xe8   : > { %2777 = vmatpush3.bf16.msra.mxu1 %v3657_v58  ;;  %2788 = vmatprep.subr.bf16.mxu0 %v3531_v37 }
  0xe9   : > { %2778 = vmatprep.subr.bf16.mxu1 %v3669_v60 }
  0xea   : > { %1705 = vmatmul.mubr.bf16.vlgmr.msra.gmra.mxu0 %v3096_v5 }
  0xeb   : > { %2789 = vmatpush3.bf16.msra.mxu0 %v3543_v39  ;;  %1786 = vmatprep.mubr.bf16.mxu0 %v3104_v7  ;;  %v3128_v7 = vld [vmem:[%s4254_s4 + $0x28] sm:$0xff]  }
  0xec   : > { %2779 = vmatpush3.bf16.msra.mxu1 %v3681_v62  ;;  %2790 = vmatprep.subr.bf16.mxu0 %v3555_v41 }
  0xed   : > { %2780 = vmatprep.subr.bf16.mxu1 %v3693_v32 }
  0xef   : > { %2791 = vmatpush3.bf16.msra.mxu0 %v3567_v43 }
  0xf0   : > { %2781 = vmatpush3.bf16.msra.mxu1 %v3705_v34  ;;  %2792 = vmatprep.subr.bf16.mxu0 %v3579_v45  ;;  %v4319_v45 = vld [vmem:[#allocation12_spill] sm:$0xff] }
  0xf1   : > { %1795 = vmatprep.subr.bf16.mxu1 %v3249_v57 }
  0xf2   : > { %v2562_v11 = vpop.f32.mrf.mxu0 }
  0xf3   : > { %v2584_v13 = vpop.f32.mrf.mxu1  ;;  %1746 = vmatmul.mubr.bf16.vlgmr.msra.gmra.mxu1 %v3099_v9  ;;  %2793 = vmatpush3.bf16.msra.mxu0 %v4318_v23 }
  0xf4   : > { %v2563_v15 = vpop.f32.mrf.mxu0  ;;  %1796 = vmatpush1.bf16.msra.mxu1 %v3724_v33  ;;  %2794 = vmatprep.subr.bf16.mxu0 %v3603_v49 }
  0xf5   : > { %v2564_v19 = vadd.f32 %v2563_v15, %v2562_v11  ;;  %v2585_v21 = vpop.f32.mrf.mxu1  ;;  %1797 = vmatprep.subr.bf16.mxu1 %v3249_v57  ;;  %2504 = vmatprep.mubr.msk.bf16.mxu1 %vm1091_vm0, %v3105_v17  ;;  %v3129_v15 = vld [vmem:[%s4254_s4 + $0x60] sm:$0xff]  }
  0xf6   : > { %v2586_v25 = vadd.f32 %v2585_v21, %v2584_v13  ;;  %v2565_v27 = vpop.f32.mrf.mxu0 }
  0xf7   : > { %v2587_v29 = vpop.f32.mrf.mxu1  ;;  %2795 = vmatpush3.bf16.msra.mxu0 %v3615_v51 }
  0xf8   : > { %v1171_v31 = vadd.f32 %v2586_v25, %v2564_v19  ;;  %v2566_v37 = vpop.f32.mrf.mxu0  ;;  %1798 = vmatpush1.bf16.msra.mxu1 %v3730_v35  ;;  %2796 = vmatprep.subr.bf16.mxu0 %v4319_v45  ;;  %v3130_v25 = vld [vmem:[%s4254_s4 + $0x20] sm:$0xff]  }
  0xf9   : > { %v2567_v39 = vadd.f32 %v2566_v37, %v2565_v27  ;;  %v2588_v41 = vpop.f32.mrf.mxu1  ;;  %1799 = vmatprep.subr.bf16.mxu1 %v3249_v57 }
  0xfa   : > { %v2589_v43 = vadd.f32 %v2588_v41, %v2587_v29 }
  0xfb   : > { %2797 = vmatpush3.bf16.msra.mxu0 %v4320_v22 }
  0xfc   : > { %v1174_v55 = vadd.f32 %v2589_v43, %v2567_v39  ;;  %1800 = vmatpush1.bf16.msra.mxu1 %v4321_v0  ;;  %2798 = vmatprep.subr.bf16.mxu0 %v4322_v2  ;;  %v3131_v39 = vld [vmem:[%s4254_s4 + $0x58] sm:$0xff]  }
  0xfd   : > { %1801 = vmatprep.subr.bf16.mxu1 %v3249_v57 }
  0xff   : > { %2799 = vmatpush3.bf16.msra.mxu0 %v4323_v4 }
 0x100   : > { %1802 = vmatpush1.bf16.msra.mxu1 %v3755_v61  ;;  %2800 = vmatprep.subr.bf16.mxu0 %v4306_v3 }
 0x101   : > { %1803 = vmatprep.subr.bf16.mxu1 %v3249_v57 }
 0x103   : > { %2801 = vmatpush3.bf16.msra.mxu0 %v4307_v26 }
 0x104   : > { %1804 = vmatpush1.bf16.msra.mxu1 %v3765_v8  ;;  %2802 = vmatprep.subr.bf16.mxu0 %v4308_v47 }
 0x105   : > { %1805 = vmatprep.subr.bf16.mxu1 %v3249_v57 }
 0x107   : > { %2803 = vmatpush3.bf16.msra.mxu0 %v4324_v10 }
 0x108   : > { %1806 = vmatpush1.bf16.msra.mxu1 %v3781_v59  ;;  %2810 = vmatprep.subr.bf16.mxu0 %v3123_v14  ;;  %v3107_v14 = vld [vmem:[%s3775_s11 + $0x20] ss:$40 sps:$4 sm:$0xff]  }
 0x109   : > { %1807 = vmatprep.subr.bf16.mxu1 %v3249_v57 }
 0x10a   : > { %1787 = vmatmul.mubr.bf16.vlgmr.msra.gmra.mxu0 %v3102_v6 }
 0x10b   : > { %2811 = vmatpush3.bf16.msra.mxu0 %v3124_v16  ;;  %1932 = vmatprep.mubr.bf16.mxu0 %v3110_v12  ;;  %v3132_v12 = vld [vmem:[%s4254_s4 + $0x18] sm:$0xff]   ;;  %v3133_v16 = vld [vmem:[%s4254_s4 + $0x50] sm:$0xff]  }
 0x10c   : > { %1808 = vmatpush1.bf16.msra.mxu1 %v3790_v63  ;;  %2812 = vmatprep.subr.bf16.mxu0 %v3125_v18 }
 0x10d   : > { %1809 = vmatprep.subr.bf16.mxu1 %v3249_v57 }
 0x10f   : > { %2813 = vmatpush3.bf16.msra.mxu0 %v3126_v53  ;;  %v3113_v53 = vld [vmem:[%s3889_s12 + $0xc] ss:$40 sps:$4 sm:$0xff]  }
 0x110   : > { %1810 = vmatpush1.bf16.msra.mxu1 %v3799_v20  ;;  %2814 = vmatprep.subr.bf16.mxu0 %v3127_v1  ;;  %v3135_v1 = vld [vmem:[%s4254_s4 + $0x10] sm:$0xff]  }
 0x111   : > { %1821 = vmatprep.subr.bf16.mxu1 %v3249_v57 }
 0x112   : > { %v2606_v5 = vpop.f32.mrf.mxu0 }
 0x113   : > { %2815 = vmatpush3.bf16.msra.mxu0 %v3128_v7  ;;  %v2628_v11 = vpop.f32.mrf.mxu1  ;;  %v3137_v7 = vld [vmem:[%s4254_s4 + $0x48] sm:$0xff]  }
 0x114   : > { %v2607_v9 = vpop.f32.mrf.mxu0  ;;  %1822 = vmatpush2.bf16.msra.mxu1 %v3809_v24  ;;  %2816 = vmatprep.subr.bf16.mxu0 %v3129_v15  ;;  %v3141_v15 = vld [vmem:[%s4254_s4 + $0x40] sm:$0xff]  }
 0x115   : > { %v2608_v13 = vadd.f32 %v2607_v9, %v2606_v5  ;;  %v2629_v19 = vpop.f32.mrf.mxu1  ;;  %1823 = vmatprep.subr.bf16.mxu1 %v3249_v57  ;;  %v3136_v5 = vld [vmem:[%s4254_s4 + $0xb8] sm:$0xff]   ;;  %v3138_v9 = vld [vmem:[%s4254_s4 + $0xf0] sm:$0xff]  }
 0x116   : > { %v2609_v17 = vpop.f32.mrf.mxu0  ;;  %v2630_v23 = vadd.f32 %v2629_v19, %v2628_v11  ;;  %v3139_v11 = vld [vmem:[%s4254_s4 + $0x8] sm:$0xff]  }
 0x117   : > { %v1212_v21 = vadd.f32 %v2608_v13, %v1171_v31  ;;  %2817 = vmatpush3.bf16.msra.mxu0 %v3130_v25  ;;  %v2631_v29 = vpop.f32.mrf.mxu1  ;;  %v3140_v13 = vld [vmem:[%s4254_s4 + $0xb0] sm:$0xff]   ;;  %v3108_v19 = vld [vmem:[%s3889_s12] ss:$40 sps:$4 sm:$0xff]  }
 0x118   : > { %v2610_v27 = vpop.f32.mrf.mxu0  ;;  %1824 = vmatpush2.bf16.msra.mxu1 %v3819_v28  ;;  %2818 = vmatprep.subr.bf16.mxu0 %v3131_v39  ;;  %v3144_v25 = vld [vmem:[%s4254_s4 + $0xa8] sm:$0xff]   ;;  %v3150_v39 = vld [vmem:[%s4254_s4 + $0x90] sm:$0xff]  }
 0x119   : > { %v2611_v37 = vadd.f32 %v2610_v27, %v2609_v17  ;;  %v4036_v41 = vadd.f32 %v2630_v23, %v1212_v21  ;;  %v2632_v31 = vpop.f32.mrf.mxu1  ;;  %1825 = vmatprep.subr.bf16.mxu1 %v3249_v57  ;;  %v3142_v17 = vld [vmem:[%s4254_s4 + $0xe8] sm:$0xff]   ;;  %v3143_v21 = vld [vmem:[%s4254_s4] sm:$0xff]   ;;  %v3116_v23 = vld [vmem:[%s3889_s12 + $0x14] ss:$40 sps:$4 sm:$0xff]  }
 0x11a   : > { %v2633_v6 = vadd.f32 %v2632_v31, %v2631_v29  ;;  %v3145_v27 = vld [vmem:[%s4254_s4 + $0xe0] sm:$0xff]  }
 0x11b   : > { %v1215_v43 = vadd.f32 %v2611_v37, %v1174_v55  ;;  %2819 = vmatpush3.bf16.msra.mxu0 %v3132_v12  ;;  %v3134_v55 = vld [vmem:[%s4254_s4 + $0xf8] sm:$0xff]   ;;  %v3146_v29 = vld [vmem:[%s4254_s4 + $0xa0] sm:$0xff]  }
 0x11c   : > { %1826 = vmatpush2.bf16.msra.mxu1 %v3828_v30  ;;  %2820 = vmatprep.subr.bf16.mxu0 %v3133_v16  ;;  %v3148_v37 = vld [vmem:[%s4254_s4 + $0x98] sm:$0xff]  }
 0x11d   : > { %v4047_v18 = vadd.f32 %v2633_v6, %v1215_v43  ;;  %2832 = vmatprep.subr.bf16.mxu1 %v3134_v55  ;;  %v3152_v43 = vld [vmem:[%s4254_s4 + $0x88] sm:$0xff]   ;;  %v3119_v16 = vld [vmem:[%s3889_s12 + $0x1c] ss:$40 sps:$4 sm:$0xff]  }
 0x11f   : > { %1828 = vmatmul.mubr.bf16.vlgmr.msra.gmra.mxu1 %v3107_v14  ;;  %2821 = vmatpush3.bf16.msra.mxu0 %v3135_v1  ;;  %v3154_v14 = vld [vmem:[%s4254_s4 + $0x80] sm:$0xff]   ;;  %v3157_v1 = vld [vmem:[%s4254_s4 + $0x1f0] sm:$0xff]  }
 0x120   : > { %2833 = vmatpush3.bf16.msra.mxu1 %v3136_v5  ;;  %2822 = vmatprep.subr.bf16.mxu0 %v3137_v7 }
 0x121   : > { %2834 = vmatprep.subr.bf16.mxu1 %v3138_v9  ;;  %1973 = vmatprep.mubr.bf16.mxu1 %v3113_v53  ;;  %v3114_v9 = vld [vmem:[%s3889_s12 + $0x10] ss:$40 sps:$4 sm:$0xff]  }
 0x123   : > { %2823 = vmatpush3.bf16.msra.mxu0 %v3139_v11 }
 0x124   : > { %2835 = vmatpush3.bf16.msra.mxu1 %v3140_v13  ;;  %2824 = vmatprep.subr.bf16.mxu0 %v3141_v15 }
 0x125   : > { %2836 = vmatprep.subr.bf16.mxu1 %v3142_v17 }
 0x127   : > { %2825 = vmatpush3.bf16.msra.mxu0 %v3143_v21 }
 0x128   : > { %2837 = vmatpush3.bf16.msra.mxu1 %v3144_v25  ;;  %2854 = vmatprep.subr.bf16.mxu0 %v3526_v36  ;;  %v3147_v36 = vld [vmem:[%s4254_s4 + $0xd8] sm:$0xff]  }
 0x129   : > { %2838 = vmatprep.subr.bf16.mxu1 %v3145_v27 }
 0x12a   : > { %1933 = vmatmul.mubr.bf16.vlgmr.msra.gmra.mxu0 %v3108_v19 }
 0x12b   : > { %2855 = vmatpush3.bf16.msra.mxu0 %v3537_v38  ;;  %2014 = vmatprep.mubr.bf16.mxu0 %v3116_v23  ;;  %v3149_v38 = vld [vmem:[%s4254_s4 + $0xd0] sm:$0xff]  }
 0x12c   : > { %2839 = vmatpush3.bf16.msra.mxu1 %v3146_v29  ;;  %2856 = vmatprep.subr.bf16.mxu0 %v3549_v40 }
 0x12d   : > { %2840 = vmatprep.subr.bf16.mxu1 %v3147_v36 }
 0x12f   : > { %2857 = vmatpush3.bf16.msra.mxu0 %v3561_v42  ;;  %v3151_v42 = vld [vmem:[%s4254_s4 + $0xc8] sm:$0xff]  }
 0x130   : > { %2841 = vmatpush3.bf16.msra.mxu1 %v3148_v37  ;;  %2858 = vmatprep.subr.bf16.mxu0 %v3573_v44 }
 0x131   : > { %2842 = vmatprep.subr.bf16.mxu1 %v3149_v38 }
 0x133   : > { %2859 = vmatpush3.bf16.msra.mxu0 %v3585_v46  ;;  %v2650_v40 = vpop.f32.mrf.mxu1 }
 0x134   : > { %2843 = vmatpush3.bf16.msra.mxu1 %v3150_v39  ;;  %2860 = vmatprep.subr.bf16.mxu0 %v3597_v48  ;;  %v3153_v48 = vld [vmem:[%s4254_s4 + $0xc0] sm:$0xff]  }
 0x135   : > { %2844 = vmatprep.subr.bf16.mxu1 %v3151_v42  ;;  %v2651_v44 = vpop.f32.mrf.mxu1 }
 0x136   : > { %v4113_v31 = vadd.f32 %v2651_v44, %v2650_v40 }
 0x137   : > { %2861 = vmatpush3.bf16.msra.mxu0 %v3609_v50  ;;  %v2653_v46 = vpop.f32.mrf.mxu1  ;;  %v3111_v50 = vld [vmem:[%s3889_s12 + $0x8] ss:$40 sps:$4 sm:$0xff]  }
 0x138   : > { %2845 = vmatpush3.bf16.msra.mxu1 %v3152_v43  ;;  %2862 = vmatprep.subr.bf16.mxu0 %v3621_v52  ;;  %v3155_v52 = vld [vmem:[%s4254_s4 + $0x1f8] sm:$0xff]  }
 0x139   : > { %2846 = vmatprep.subr.bf16.mxu1 %v3153_v48  ;;  %v2654_v6 = vpop.f32.mrf.mxu1 }
 0x13a   : > { %v4123_v12 = vadd.f32 %v2654_v6, %v2653_v46 }
 0x13b   : > { %2863 = vmatpush3.bf16.msra.mxu0 %v3633_v54  ;;  %v3156_v54 = vld [vmem:[%s4254_s4 + $0x1b8] sm:$0xff]  }
 0x13c   : > { %2847 = vmatpush3.bf16.msra.mxu1 %v3154_v14  ;;  %2864 = vmatprep.subr.bf16.mxu0 %v3645_v56 }
 0x13d   : > { %2876 = vmatprep.subr.bf16.mxu1 %v3155_v52 }
 0x13e   : > { %v1293_v55 = vpop.f32.mrf.mxu0 }
 0x13f   : > { %v4136_v53 = vadd.f32 %v1293_v55, %v4036_v41  ;;  %1974 = vmatmul.mubr.bf16.vlgmr.msra.gmra.mxu1 %v3111_v50  ;;  %2865 = vmatpush3.bf16.msra.mxu0 %v3657_v58  ;;  %v3158_v58 = vld [vmem:[%s4254_s4 + $0x1b0] sm:$0xff]  }
 0x140   : > { %2877 = vmatpush3.bf16.msra.mxu1 %v3156_v54  ;;  %v1295_v56 = vpop.f32.mrf.mxu0  ;;  %2866 = vmatprep.subr.bf16.mxu0 %v3669_v60  ;;  %v3159_v60 = vld [vmem:[%s4254_s4 + $0x1e8] sm:$0xff]  }
 0x141   : > { %2878 = vmatprep.subr.bf16.mxu1 %v3157_v1  ;;  %2055 = vmatprep.mubr.bf16.mxu1 %v3119_v16 }
 0x142   : > { %v1296_v41 = vpop.f32.mrf.mxu0 }
 0x143   : > { %v4147_v5 = vadd.f32 %v1296_v41, %v4047_v18  ;;  %2867 = vmatpush3.bf16.msra.mxu0 %v3681_v62  ;;  %v3120_v18 = vld [vmem:[%s3889_s12 + $0x24] ss:$40 sps:$4 sm:$0xff]  }
 0x144   : > { %2879 = vmatpush3.bf16.msra.mxu1 %v3158_v58  ;;  %v1298_v7 = vpop.f32.mrf.mxu0  ;;  %2868 = vmatprep.subr.bf16.mxu0 %v3693_v32  ;;  %v3160_v62 = vld [vmem:[%s4254_s4 + $0x1a8] sm:$0xff]  }
 0x145   : > { %2880 = vmatprep.subr.bf16.mxu1 %v3159_v60 }
 0x147   : > { %2869 = vmatpush3.bf16.msra.mxu0 %v3705_v34 }
 0x148   : > { %2881 = vmatpush3.bf16.msra.mxu1 %v3160_v62  ;;  %2064 = vmatprep.subr.bf16.mxu0 %v3249_v57 }
 0x149   : > { %2882 = vmatprep.subr.bf16.mxu1 %v3603_v49 }
 0x14a   : > { %2015 = vmatmul.mubr.bf16.vlgmr.msra.gmra.mxu0 %v3114_v9 }
 0x14b   : > { %2065 = vmatpush1.bf16.msra.mxu0 %v3724_v33  ;;  %2515 = vmatprep.mubr.msk.bf16.mxu0 %vm1091_vm0, %v3120_v18 }
 0x14c   : > { %2883 = vmatpush3.bf16.msra.mxu1 %v3615_v51  ;;  %2066 = vmatprep.subr.bf16.mxu0 %v3249_v57 }
 0x14d   : > { %2884 = vmatprep.subr.bf16.mxu1 %v4319_v45 }
 0x14f   : > { %2067 = vmatpush1.bf16.msra.mxu0 %v3730_v35 }
 0x150   : > { %2885 = vmatpush3.bf16.msra.mxu1 %v4320_v22  ;;  %2068 = vmatprep.subr.bf16.mxu0 %v3249_v57  ;;  %v3117_v22 = vld [vmem:[%s3889_s12 + $0x18] ss:$40 sps:$4 sm:$0xff]  }
 0x151   : > { %2886 = vmatprep.subr.bf16.mxu1 %v4322_v2 }
 0x153   : > { %v2672_v49 = vpop.f32.mrf.mxu1  ;;  %2069 = vmatpush1.bf16.msra.mxu0 %v4321_v0 }
 0x154   : > { %2887 = vmatpush3.bf16.msra.mxu1 %v4323_v4  ;;  %2070 = vmatprep.subr.bf16.mxu0 %v3249_v57 }
 0x155   : > { %v2673_v51 = vpop.f32.mrf.mxu1  ;;  %2888 = vmatprep.subr.bf16.mxu1 %v4306_v3 }
 0x156   : > { %v2674_v32 = vadd.f32 %v2673_v51, %v2672_v49 }
 0x157   : > { %v2675_v33 = vpop.f32.mrf.mxu1  ;;  %2071 = vmatpush1.bf16.msra.mxu0 %v3755_v61 }
 0x158   : > { %v1438_v34 = vadd.f32 %v2674_v32, %v4113_v31  ;;  %2889 = vmatpush3.bf16.msra.mxu1 %v4307_v26  ;;  %2072 = vmatprep.subr.bf16.mxu0 %v3249_v57 }
 0x159   : > { %v2676_v35 = vpop.f32.mrf.mxu1  ;;  %2890 = vmatprep.subr.bf16.mxu1 %v4308_v47 }
 0x15a   : > { %v2677_v45 = vadd.f32 %v2676_v35, %v2675_v33 }
 0x15b   : > { %2073 = vmatpush1.bf16.msra.mxu0 %v3765_v8 }
 0x15c   : > { %v1441_v0 = vadd.f32 %v2677_v45, %v4123_v12  ;;  %2891 = vmatpush3.bf16.msra.mxu1 %v4324_v10  ;;  %2074 = vmatprep.subr.bf16.mxu0 %v3249_v57 }
 0x15e   : > { %v2694_v61 = vpop.f32.mrf.mxu0 }
 0x15f   : > { %2056 = vmatmul.mubr.bf16.vlgmr.msra.gmra.mxu1 %v3117_v22  ;;  %2075 = vmatpush1.bf16.msra.mxu0 %v3781_v59  ;;  %v3122_v59 = vld [vmem:[%s3889_s12 + $0x20] ss:$40 sps:$4 sm:$0xff]  }
 0x160   : > { %v2695_v26 = vpop.f32.mrf.mxu0  ;;  %2076 = vmatprep.subr.bf16.mxu0 %v3249_v57 }
 0x161   : > { %v2696_v3 = vadd.f32 %v2695_v26, %v2694_v61 }
 0x162   : > { %v2697_v47 = vpop.f32.mrf.mxu0 }
 0x163   : > { %v1479_v2 = vadd.f32 %v2696_v3, %v1438_v34  ;;  %2077 = vmatpush1.bf16.msra.mxu0 %v3790_v63 }
 0x164   : > { %v2698_v8 = vpop.f32.mrf.mxu0  ;;  %2078 = vmatprep.subr.bf16.mxu0 %v3249_v57 }
 0x165   : > { %v2699_v4 = vadd.f32 %v2698_v8, %v2697_v47 }
 0x167   : > { %v1482_v10 = vadd.f32 %v2699_v4, %v1441_v0  ;;  %2079 = vmatpush1.bf16.msra.mxu0 %v3799_v20 }
 0x168   : > { %2090 = vmatprep.subr.bf16.mxu0 %v3249_v57 }
 0x16b   : > { %2091 = vmatpush2.bf16.msra.mxu0 %v3809_v24 }
 0x16c   : > { %2092 = vmatprep.subr.bf16.mxu0 %v3249_v57 }
 0x16f   : > { %2093 = vmatpush2.bf16.msra.mxu0 %v3819_v28 }
 0x170   : > { %2094 = vmatprep.subr.bf16.mxu0 %v3249_v57 }
 0x173   : > { %v2716_v11 = vpop.f32.mrf.mxu1  ;;  %2095 = vmatpush2.bf16.msra.mxu0 %v3828_v30 }
 0x175   : > { %v2717_v63 = vpop.f32.mrf.mxu1 }
 0x176   : > { %v2718_v13 = vadd.f32 %v2717_v63, %v2716_v11  ;;  %2097 = vmatmul.mubr.bf16.vlgmr.msra.gmra.mxu0 %v3122_v59 }
 0x177   : > { %v2719_v15 = vpop.f32.mrf.mxu1 }
 0x178   : > { %v1520_v17 = vadd.f32 %v2718_v13, %v1479_v2 }
 0x179   : > { %v2720_v20 = vpop.f32.mrf.mxu1 }
 0x17a   : > { %v2721_v19 = vadd.f32 %v2720_v20, %v2719_v15 }
 0x17c   : > { %v1523_v21 = vadd.f32 %v2721_v19, %v1482_v10 }
 0x18a   : > { %v1560_v23 = vpop.f32.mrf.mxu0 }
 0x18b   : > { %v1561_v24 = vadd.f32 %v1560_v23, %v1520_v17 }
 0x18c   : > { %v1562_v25 = vpop.f32.mrf.mxu0 }
 0x18d   : > { %v1567_v27 = vmax.f32 %v4136_v53, %v1561_v24 }
 0x18e   : > { %v1563_v28 = vpop.f32.mrf.mxu0 }
 0x18f   : > { %v1564_v29 = vadd.f32 %v1563_v28, %v1523_v21 }
 0x190   : > { %v1565_v57 = vpop.f32.mrf.mxu0 }
 0x191   : > { %v1568_v36 = vmax.f32 %v4147_v5, %v1564_v29 }
 0x193   : > { %v2738_v37 = vpop.f32.mrf.mxu1 }
 0x195   : > { %v2739_v30 = vpop.f32.mrf.mxu1 }
 0x196   : > { %v2740_v38 = vadd.f32 %v2739_v30, %v2738_v37 }
 0x197   : > { %v2741_v40 = vpop.f32.mrf.mxu1 }
 0x199   : > { %v2742_v39 = vpop.f32.mrf.mxu1 }
 0x19a   : > { %v2743_v42 = vadd.f32 %v2742_v39, %v2741_v40 }
 0x1aa   : > { %v2760_v44 = vpop.f32.mrf.mxu0 }
 0x1ac   : > { %v2761_v31 = vpop.f32.mrf.mxu0 }
 0x1ad   : > { %v2762_v43 = vadd.f32 %v2761_v31, %v2760_v44 }
 0x1ae   : > { %v2763_v46 = vpop.f32.mrf.mxu0 }
 0x1af   : > { %v1707_v50 = vadd.f32 %v2762_v43, %v2740_v38 }
 0x1b0   : > { %v2764_v48 = vpop.f32.mrf.mxu0 }
 0x1b1   : > { %v2765_v14 = vadd.f32 %v2764_v48, %v2763_v46  ;;  %v2516_v46 = vld [vmem:[%s4255_s5] ss:$0 sm:$0xff] }
 0x1b3   : > { %v2782_v6 = vpop.f32.mrf.mxu1  ;;  %v1710_v54 = vadd.f32 %v2765_v14, %v2743_v42 }
 0x1b5   : > { %v2783_v12 = vpop.f32.mrf.mxu1 }
 0x1b6   : > { %v2784_v52 = vadd.f32 %v2783_v12, %v2782_v6 }
 0x1b7   : > { %v2785_v16 = vpop.f32.mrf.mxu1 }
 0x1b8   : > { %v1748_v55 = vadd.f32 %v2784_v52, %v1707_v50 }
 0x1b9   : > { %v2786_v53 = vpop.f32.mrf.mxu1 }
 0x1ba   : > { %v2787_v56 = vadd.f32 %v2786_v53, %v2785_v16 }
 0x1bc   : > { %v1751_v1 = vadd.f32 %v2787_v56, %v1710_v54 }
 0x1ca   : > { %v2804_v41 = vpop.f32.mrf.mxu0 }
 0x1cc   : > { %v2805_v5 = vpop.f32.mrf.mxu0 }
 0x1cd   : > { %v2806_v7 = vadd.f32 %v2805_v5, %v2804_v41 }
 0x1ce   : > { %v2807_v58 = vpop.f32.mrf.mxu0 }
 0x1cf   : > { %v1789_v18 = vadd.f32 %v2806_v7, %v1748_v55 }
 0x1d0   : > { %v2808_v60 = vpop.f32.mrf.mxu0 }
 0x1d1   : > { %v2809_v9 = vadd.f32 %v2808_v60, %v2807_v58 }
 0x1d3   : > { %v1792_v33 = vadd.f32 %v2809_v9, %v1751_v1 }
 0x1df   : > { %v1829_v62 = vpop.f32.mrf.mxu1 }
 0x1e0   : > { %v1830_v49 = vadd.f32 %v1829_v62, %v1789_v18 }
 0x1e1   : > { %v1831_v51 = vpop.f32.mrf.mxu1 }
 0x1e2   : > { %v1836_v32 = vmax.f32 %v1567_v27, %v1830_v49 }
 0x1e3   : > { %v1832_v34 = vpop.f32.mrf.mxu1 }
 0x1e4   : > { %v1833_v35 = vadd.f32 %v1832_v34, %v1792_v33 }
 0x1e5   : > { %v1834_v45 = vpop.f32.mrf.mxu1 }
 0x1e6   : > { %v1837_v22 = vmax.f32 %v1568_v36, %v1833_v35 }
 0x1ea   : > { %v2826_v0 = vpop.f32.mrf.mxu0 }
 0x1ec   : > { %v2827_v26 = vpop.f32.mrf.mxu0 }
 0x1ed   : > { %v2828_v20 = vadd.f32 %v2827_v26, %v2826_v0 }
 0x1ee   : > { %v2829_v47 = vpop.f32.mrf.mxu0 }
 0x1f0   : > { %v2830_v8 = vpop.f32.mrf.mxu0 }
 0x1f1   : > { %v2831_v28 = vadd.f32 %v2830_v8, %v2829_v47 }
 0x1ff   : > { %v2848_v61 = vpop.f32.mrf.mxu1 }
 0x201   : > { %v2849_v3 = vpop.f32.mrf.mxu1 }
 0x202   : > { %v2850_v15 = vadd.f32 %v2849_v3, %v2848_v61 }
 0x203   : > { %v2851_v2 = vpop.f32.mrf.mxu1 }
 0x204   : > { %v1976_v23 = vadd.f32 %v2850_v15, %v2828_v20 }
 0x205   : > { %v2852_v4 = vpop.f32.mrf.mxu1 }
 0x206   : > { %v2853_v24 = vadd.f32 %v2852_v4, %v2851_v2 }
 0x208   : > { %v1979_v36 = vadd.f32 %v2853_v24, %v2831_v28 }
 0x20a   : > { %v2870_v10 = vpop.f32.mrf.mxu0 }
 0x20c   : > { %v2871_v11 = vpop.f32.mrf.mxu0 }
 0x20d   : > { %v2872_v19 = vadd.f32 %v2871_v11, %v2870_v10 }
 0x20e   : > { %v2873_v13 = vpop.f32.mrf.mxu0 }
 0x20f   : > { %v2017_v29 = vadd.f32 %v2872_v19, %v1976_v23 }
 0x210   : > { %v2874_v21 = vpop.f32.mrf.mxu0 }
 0x211   : > { %v2875_v57 = vadd.f32 %v2874_v21, %v2873_v13 }
 0x213   : > { %v2020_v40 = vadd.f32 %v2875_v57, %v1979_v36 }
 0x21f   : > { %v2892_v59 = vpop.f32.mrf.mxu1 }
 0x221   : > { %v2893_v63 = vpop.f32.mrf.mxu1 }
 0x222   : > { %v2894_v25 = vadd.f32 %v2893_v63, %v2892_v59 }
 0x223   : > { %v2895_v17 = vpop.f32.mrf.mxu1 }
 0x224   : > { %v2058_v30 = vadd.f32 %v2894_v25, %v2017_v29 }
 0x225   : > { %v2896_v27 = vpop.f32.mrf.mxu1 }
 0x226   : > { %v2897_v37 = vadd.f32 %v2896_v27, %v2895_v17 }
 0x228   : > { %v2061_v31 = vadd.f32 %v2897_v37, %v2020_v40 }
 0x236   : > { %v2098_v38 = vpop.f32.mrf.mxu0 }
 0x237   : > { %v2099_v39 = vadd.f32 %v2098_v38, %v2058_v30 }
 0x238   : > { %v2100_v42 = vpop.f32.mrf.mxu0 }
 0x239   : > { %v2105_v44 = vmax.f32 %v1836_v32, %v2099_v39 }
 0x23a   : > { %v2101_v43 = vpop.f32.mrf.mxu0 }
 0x23b   : > { %v2102_v48 = vadd.f32 %v2101_v43, %v2061_v31  ;;  %v2114_v12 = vadd.f32 %v2516_v46, %v2105_v44 }
 0x23c   : > { %v2103_v6 = vpop.f32.mrf.mxu0 }
 0x23d   : > { %v2106_v50 = vmax.f32 %v1837_v22, %v2102_v48  ;;  %v2116_v52 = vmax.f32 %v2114_v12, 0.0 }
 0x23f   : > { %v2115_v14 = vadd.f32 %v2516_v46, %v2106_v50 }
 0x241   : > { %v2117_v16 = vmax.f32 %v2115_v14, 0.0  ;;  %2134 = sbr.rel (!%p3310_p4) target bundleno = 621 (0x26d), region = 48 }
 0x243   : > { %v2544_v55 = vpack.c.bf16 %v2117_v16, %v2116_v52 }
 0x245   : > { %2545 = vst [vmem:[%s4206_s7] sm:$0xff] %v2544_v55  }
 0x246   : > { %s4329_s17 = smov (!%p2137_p8, %s2136_s17), 2 }
 0x247   : > { %s2521_s16 = sshll.u32 %s4329_s17, 6 }
 0x248   : > { %p2524_p9 = scmp.eq.s32.totalorder %s2521_s16, 0 }
 0x249   : > { %s4222_s20 = sshrl.u32 (!%p2524_p9), %s4329_s17, 1 }
 0x24a   : > { %2145 = sbr.rel (%p2524_p9) target bundleno = 621 (0x26d), region = 52  ;;  %p2525_p10 = scmp.le.s32.totalorder (!%p2524_p9), %s4222_s20, 0 }
 0x24f   : > { %2322 = sbr.rel (%p2525_p10) target bundleno = 604 (0x25c), region = 133  ;;  %s3217_s24 = smov (!%p2525_p10), %s4216_s15  }
 0x250   : > { %s3221_s29 = smov (!%p2525_p10), %s4206_s7   ;;  %s3225_s18 = smov (!%p2525_p10), 0  }
 0x251   : > { %s3229_s23 = smov (!%p2525_p10), 0  }
 0x254 LB: >> { %v2162_v53 = vld [vmem:[%s3223_s29] sm:$0xf]  ;;  %v2164_v54 = vld [vmem:[%s3223_s29 + $0x4] sm:$0xf]  ;;  %s2166_s26 = sadd.s32 1, %s3227_s18  ;;  %s2156_s23 = sadd.s32 1, %s3231_s23   ;;  %s3231_s23 = sphi %s3229_s23, %s2156_s23   ;;  %s3227_s18 = sphi %s3225_s18, %s3226_s18   ;;  %s3223_s29 = sphi %s3221_s29, %s2171_s29   ;;  %s3219_s24 = sphi %s3217_s24, %s2172_s24  }
 0x255   : >> { %2163 = vst [vmem:[%s3219_s24] sm:$0xf] %v2162_v53  ;;  %2165 = vst [vmem:[%s3219_s24 + $0x4] sm:$0xf] %v2164_v54  ;;  %p2167_p11 = scmp.ge.s32.totalorder %s2166_s26, %s4222_s20  ;;  %p2155_p12 = scmp.ge.s32.totalorder %s2156_s23, %s4222_s20 }
 0x257   : >> { %s4331_s26 = smov (%p2167_p11, %s2166_s26), 0  ;;  %2158 = sbr.rel (!%p2155_p12) target bundleno = 596 (0x254), region = 139 }
 0x258   : >> { %s2526_s27 = sshll.u32 %s4331_s26, 3  ;;  %s3226_s18 = smov %s4331_s26  }
 0x259   : >> { %s2171_s29 = scalar_lea.vmem %s4206_s7, %s2526_s27 [#allocation2]   ;;  %s2172_s24 = scalar_lea.vmem %s4216_s15, %s2526_s27  }
 0x25c PF: > { %s4232_s30 = sand.u32 1, %s4329_s17   ;;  %s2539_s11 = sshll.u32 %s4222_s20, 3 }
 0x25d   : > { %s2177_s8 = scalar_lea.vmem %s4206_s7, %s2539_s11 [#allocation2]   ;;  %s2179_s12 = scalar_lea.vmem %s4216_s15, %s2539_s11  }
 0x25e   : > { %p2531_p13 = scmp.le.s32.totalorder %s4232_s30, 0 }
 0x25f   : > { %s3233_s9 = smov (!%p2531_p13), %s2179_s12   ;;  %s3237_s19 = smov (!%p2531_p13), %s2177_s8  }
 0x260   : > { %2336 = sbr.rel (%p2531_p13) target bundleno = 621 (0x26d), region = 144  ;;  %s3241_s10 = smov (!%p2531_p13), 0  }
 0x261   : > { %s3245_s13 = smov (!%p2531_p13), 0  }
 0x265 LB: >> { %v2189_v56 = vld [vmem:[%s3239_s19] sm:$0xf]  ;;  %s2191_s17 = sadd.s32 1, %s3243_s10  ;;  %s2183_s13 = sadd.s32 1, %s3247_s13   ;;  %s3247_s13 = sphi %s3245_s13, %s2183_s13   ;;  %s3243_s10 = sphi %s3241_s10, %s3242_s10   ;;  %s3239_s19 = sphi %s3237_s19, %s2196_s19   ;;  %s3235_s9 = sphi %s3233_s9, %s2197_s9  }
 0x266   : >> { %2190 = vst [vmem:[%s3235_s9] sm:$0xf] %v2189_v56  ;;  %p2192_p0 = scmp.ge.s32.totalorder %s2191_s17, %s4232_s30  ;;  %p2182_p1 = scmp.ge.s32.totalorder %s2183_s13, %s4232_s30 }
 0x268   : >> { %s4333_s17 = smov (%p2192_p0, %s2191_s17), 0  ;;  %2185 = sbr.rel (!%p2182_p1) target bundleno = 613 (0x265), region = 150 }
 0x269   : >> { %s2532_s7 = sshll.u32 %s4333_s17, 2  ;;  %s3242_s10 = smov %s4333_s17  }
 0x26a   : >> { %s2196_s19 = scalar_lea.vmem %s2177_s8, %s2532_s7 [#allocation2]   ;;  %s2197_s9 = scalar_lea.vmem %s2179_s12, %s2532_s7  }
 0x26d PF: > { %p13_p2 = scmp.ge.s32.totalorder %s3300_s25, 4   ;;  %s4325_s21 = smov %s3211_s22 }
 0x26e   : > { %s4326_s22 = smov %s3308_s28  ;;  %s4327_s23 = smov %s3300_s25 }
 0x26f   :  { %15 = sbr.rel (!%p13_p2) target bundleno = 2 (0x2), region = 161 }

</bundles_post_ra>
